<compile_context>
chip_gen: v6e
topology: v6e:2x2x1
jax: 0.10.0
libtpu: 0.0.40
codegen_flags: <defaults>
</compile_context>

<pallas_src>
import functools
import math

import jax
import jax.numpy as jnp
from jax.experimental import pallas as pl
from jax.experimental.pallas import tpu as pltpu

# Per-layer parameter order as passed to the kernel (weights already fused / bf16-cast).
LAYER_PARAM_KEYS = [
    "wp", "bp",          # input_proj (Conv1d k=1): (Cin, E) bf16, (1, E) f32
    "g13", "b13",        # norm13 LayerNorm(E)
    "wqkv", "bqkv",      # fused MHA in_proj (Q pre-scaled): (E, 3E) bf16, (1, 3E) f32
    "wo", "bo",          # MHA out_proj: (E, E) bf16, (1, E) f32
    "g12", "b12n",       # norm12 LayerNorm(E)
    "w11", "b11",        # linear11: (E, F) bf16, (1, F) f32
    "w12", "b12",        # linear12: (F, E) bf16, (1, E) f32
]


def _layernorm(x, gamma, beta, eps=1e-5):
    mu = jnp.mean(x, axis=-1, keepdims=True)
    var = jnp.mean(jnp.square(x - mu), axis=-1, keepdims=True)
    return (x - mu) * jax.lax.rsqrt(var + eps) * gamma + beta


def _gelu_exact(x):
    # torch.nn.GELU() default ('none') = exact erf formulation
    return 0.5 * x * (1.0 + jax.lax.erf(x * (1.0 / math.sqrt(2.0))))


def _ct_math(x, p, nhead, approx_recip):
    """One cross_transformer layer on a point-major (N, Cin) f32 slab; returns (N, E) f32."""
    bf16 = jnp.bfloat16

    # input_proj (Conv1d kernel_size=1 == per-point channel matmul), bf16 operands, f32 acc
    s = jnp.dot(x.astype(bf16), p["wp"], preferred_element_type=jnp.float32) + p["bp"]
    s1 = _layernorm(s, p["g13"], p["b13"])            # src1 == src2 in Attention_Module

    # fused Q/K/V projection: one (N, E) x (E, 3E) matmul; Q already carries 1/sqrt(dh)
    s1_bf = s1.astype(bf16)
    qkv = jnp.dot(s1_bf, p["wqkv"], preferred_element_type=jnp.float32) + p["bqkv"]
    e = p["wo"].shape[0]
    q = qkv[:, 0 * e:1 * e]
    k = qkv[:, 1 * e:2 * e]
    v = qkv[:, 2 * e:3 * e]

    dh = e // nhead

    # per-head attention; accumulate the out-projection per head (no concat)
    attn = jnp.zeros_like(s1)                          # (N, E) f32
    for h in range(nhead):
        sl = slice(h * dh, (h + 1) * dh)
        qh = q[:, sl].astype(bf16)                     # (N, dh), scale pre-folded
        kh = k[:, sl].astype(bf16)
        vh = v[:, sl].astype(bf16)
        sc = jnp.dot(qh, kh.T, preferred_element_type=jnp.float32)   # (N, N) f32
        sc = sc - jnp.max(sc, axis=-1, keepdims=True)
        pr = jnp.exp(sc)
        denom = jnp.sum(pr, axis=-1, keepdims=True)
        if approx_recip:
            pr = pr * pl.reciprocal(denom, approx=True)
        else:
            pr = pr / denom
        oh = jnp.dot(pr.astype(bf16), vh, preferred_element_type=jnp.float32)      # (N, dh)
        attn = attn + jnp.dot(oh.astype(bf16), p["wo"][sl, :],
                              preferred_element_type=jnp.float32)                  # (N, E)
    attn = attn + p["bo"]

    s1 = s1 + attn                                     # dropout12 == identity (p=0)
    s1 = _layernorm(s1, p["g12"], p["b12n"])

    # GELU FFN
    ff = jnp.dot(s1.astype(bf16), p["w11"], preferred_element_type=jnp.float32) + p["b11"]
    ff = _gelu_exact(ff)
    ff = jnp.dot(ff.astype(bf16), p["w12"], preferred_element_type=jnp.float32) + p["b12"]
    return s1 + ff                                     # dropout13 == identity (p=0)


def _forward_one_batch(x_cn, layer_params, nhead, approx_recip):
    """Full sa1->sa2->sa3->softmax(dim=2) on one (Cin, N) slab; returns (E, N)."""
    h = jnp.transpose(x_cn).astype(jnp.float32)        # point-major (N, Cin)
    for p in layer_params:
        h = _ct_math(h, p, nhead, approx_recip)
    logits = jnp.transpose(h)                          # (E, N): point axis lane-dense
    # nn.Softmax(dim=2) on (B, C, N) == softmax over the point axis (last axis here)
    logits = logits - jnp.max(logits, axis=-1, keepdims=True)
    ex = jnp.exp(logits)
    return ex / jnp.sum(ex, axis=-1, keepdims=True)


def fused_kernel(x_ref, *rest, nhead):
    o_ref = rest[-1]
    param_refs = rest[:-1]
    n_per = len(LAYER_PARAM_KEYS)
    n_layers = len(param_refs) // n_per
    layers = []
    for li in range(n_layers):
        refs = param_refs[li * n_per:(li + 1) * n_per]
        layers.append({kname: r[...] for kname, r in zip(LAYER_PARAM_KEYS, refs)})
    out = _forward_one_batch(x_ref[0], layers, nhead, approx_recip=True)
    o_ref[0] = out.astype(o_ref.dtype)


def prepare_layer_params(p, nhead):
    """Fuse QKV weights (Q pre-scaled by 1/sqrt(d_head)) and cast matmul weights to bf16."""
    bf16 = jnp.bfloat16
    e = p["wo"].shape[0]
    scale = 1.0 / math.sqrt(e // nhead)
    wqkv = jnp.concatenate([p["wq"] * scale, p["wk"], p["wv"]], axis=1)
    bqkv = jnp.concatenate([p["bq"] * scale, p["bk"], p["bv"]], axis=1)
    return {
        "wp": p["wp"].astype(bf16),
        "bp": p["bp"],
        "g13": p["g13"], "b13": p["b13"],
        "wqkv": wqkv.astype(bf16),
        "bqkv": bqkv,
        "wo": p["wo"].astype(bf16),
        "bo": p["bo"],
        "g12": p["g12"], "b12n": p["b12n"],
        "w11": p["w11"].astype(bf16), "b11": p["b11"],
        "w12": p["w12"].astype(bf16), "b12": p["b12"],
    }


def attention_module_forward(x_bcn, p_sa1, p_sa2, p_sa3, nhead=4):
    """PyTorch-equivalent forward: x (B, latent_dim, N) -> prob_map (B, num_output, N)."""
    b, cin, n = x_bcn.shape
    layers = [prepare_layer_params(p, nhead) for p in (p_sa1, p_sa2, p_sa3)]
    e = layers[0]["wo"].shape[0]
    plist = [lp[kname] for lp in layers for kname in LAYER_PARAM_KEYS]

    in_specs = [pl.BlockSpec((1, cin, n), lambda i: (i, 0, 0))]
    # all parameters are 2-D and fetched whole; constant index_map -> DMA'd only once
    in_specs += [pl.BlockSpec(a.shape, lambda i: (0, 0)) for a in plist]
    out_spec = pl.BlockSpec((1, e, n), lambda i: (i, 0, 0))

    kern = functools.partial(fused_kernel, nhead=nhead)
    return pl.pallas_call(
        kern,
        out_shape=jax.ShapeDtypeStruct((b, e, n), jnp.float32),
        grid=(b,),
        in_specs=in_specs,
        out_specs=out_spec,
        compiler_params=pltpu.CompilerParams(dimension_semantics=("parallel",)),
    )(x_bcn, *plist)


# ----- pure-JAX reference (same math, no Pallas) for a sanity check -----
def attention_module_ref(x_bcn, p_sa1, p_sa2, p_sa3, nhead=4):
    layers = [prepare_layer_params(p, nhead) for p in (p_sa1, p_sa2, p_sa3)]
    fwd = lambda xc: _forward_one_batch(xc, layers, nhead, approx_recip=False)
    return jax.vmap(fwd)(x_bcn)


# ----- deterministic synthetic parameter init -----
def init_ct_params(key, cin, e, f=1024):
    ks = jax.random.split(key, 18)

    def w(k, fan_in, shape):
        return jax.random.normal(k, shape, jnp.float32) / math.sqrt(fan_in)

    def bias(k, shape):
        return 0.02 * jax.random.normal(k, shape, jnp.float32)

    return {
        "wp": w(ks[0], cin, (cin, e)), "bp": bias(ks[1], (1, e)),
        "g13": 1.0 + 0.05 * jax.random.normal(ks[2], (1, e), jnp.float32),
        "b13": bias(ks[3], (1, e)),
        "wq": w(ks[4], e, (e, e)), "bq": bias(ks[5], (1, e)),
        "wk": w(ks[6], e, (e, e)), "bk": bias(ks[7], (1, e)),
        "wv": w(ks[8], e, (e, e)), "bv": bias(ks[9], (1, e)),
        "wo": w(ks[10], e, (e, e)), "bo": bias(ks[11], (1, e)),
        "g12": 1.0 + 0.05 * jax.random.normal(ks[12], (1, e), jnp.float32),
        "b12n": bias(ks[13], (1, e)),
        "w11": w(ks[14], e, (e, f)), "b11": bias(ks[15], (1, f)),
        "w12": w(ks[16], f, (f, e)), "b12": bias(ks[17], (1, e)),
    }


if __name__ == "__main__":
    B, LATENT_DIM, NUM_OUTPUT, N = 2, 16, 32, 16   # num_output divisible by nhead=4
    NHEAD = 4

    key = jax.random.PRNGKey(0)
    k_x, k1, k2, k3 = jax.random.split(key, 4)
    x = jax.random.normal(k_x, (B, LATENT_DIM, N), jnp.float32)

    p_sa1 = init_ct_params(k1, LATENT_DIM, NUM_OUTPUT)   # cross_transformer(latent_dim, num_output)
    p_sa2 = init_ct_params(k2, NUM_OUTPUT, NUM_OUTPUT)   # cross_transformer(num_output, num_output)
    p_sa3 = init_ct_params(k3, NUM_OUTPUT, NUM_OUTPUT)

    out = attention_module_forward(x, p_sa1, p_sa2, p_sa3, NHEAD)
    out = jax.block_until_ready(out)

    assert out.shape == (B, NUM_OUTPUT, N)
    assert bool(jnp.all(jnp.isfinite(out)))
    # prob_map rows (softmax over dim=2 / point axis) sum to 1
    assert bool(jnp.allclose(jnp.sum(out, axis=2), 1.0, atol=1e-4))
    ref = attention_module_ref(x, p_sa1, p_sa2, p_sa3, NHEAD)
    # kernel uses approx EUP reciprocal in the attention softmax; reference uses exact divide
    assert bool(jnp.allclose(out, ref, atol=5e-3, rtol=5e-3))

    print("KERNEL_OK")
</pallas_src>

<mosaic_0001>
module attributes {stable_mosaic.version = 11 : i64} {
  func.func @fused_kernel(%arg0: i32, %arg1: memref<1x16x16xf32, #tpu.memory_space<vmem>>, %arg2: memref<16x32xbf16, #tpu.memory_space<vmem>>, %arg3: memref<1x32xf32, #tpu.memory_space<vmem>>, %arg4: memref<1x32xf32, #tpu.memory_space<vmem>>, %arg5: memref<1x32xf32, #tpu.memory_space<vmem>>, %arg6: memref<32x96xbf16, #tpu.memory_space<vmem>>, %arg7: memref<1x96xf32, #tpu.memory_space<vmem>>, %arg8: memref<32x32xbf16, #tpu.memory_space<vmem>>, %arg9: memref<1x32xf32, #tpu.memory_space<vmem>>, %arg10: memref<1x32xf32, #tpu.memory_space<vmem>>, %arg11: memref<1x32xf32, #tpu.memory_space<vmem>>, %arg12: memref<32x1024xbf16, #tpu.memory_space<vmem>>, %arg13: memref<1x1024xf32, #tpu.memory_space<vmem>>, %arg14: memref<1024x32xbf16, #tpu.memory_space<vmem>>, %arg15: memref<1x32xf32, #tpu.memory_space<vmem>>, %arg16: memref<32x32xbf16, #tpu.memory_space<vmem>>, %arg17: memref<1x32xf32, #tpu.memory_space<vmem>>, %arg18: memref<1x32xf32, #tpu.memory_space<vmem>>, %arg19: memref<1x32xf32, #tpu.memory_space<vmem>>, %arg20: memref<32x96xbf16, #tpu.memory_space<vmem>>, %arg21: memref<1x96xf32, #tpu.memory_space<vmem>>, %arg22: memref<32x32xbf16, #tpu.memory_space<vmem>>, %arg23: memref<1x32xf32, #tpu.memory_space<vmem>>, %arg24: memref<1x32xf32, #tpu.memory_space<vmem>>, %arg25: memref<1x32xf32, #tpu.memory_space<vmem>>, %arg26: memref<32x1024xbf16, #tpu.memory_space<vmem>>, %arg27: memref<1x1024xf32, #tpu.memory_space<vmem>>, %arg28: memref<1024x32xbf16, #tpu.memory_space<vmem>>, %arg29: memref<1x32xf32, #tpu.memory_space<vmem>>, %arg30: memref<32x32xbf16, #tpu.memory_space<vmem>>, %arg31: memref<1x32xf32, #tpu.memory_space<vmem>>, %arg32: memref<1x32xf32, #tpu.memory_space<vmem>>, %arg33: memref<1x32xf32, #tpu.memory_space<vmem>>, %arg34: memref<32x96xbf16, #tpu.memory_space<vmem>>, %arg35: memref<1x96xf32, #tpu.memory_space<vmem>>, %arg36: memref<32x32xbf16, #tpu.memory_space<vmem>>, %arg37: memref<1x32xf32, #tpu.memory_space<vmem>>, %arg38: memref<1x32xf32, #tpu.memory_space<vmem>>, %arg39: memref<1x32xf32, #tpu.memory_space<vmem>>, %arg40: memref<32x1024xbf16, #tpu.memory_space<vmem>>, %arg41: memref<1x1024xf32, #tpu.memory_space<vmem>>, %arg42: memref<1024x32xbf16, #tpu.memory_space<vmem>>, %arg43: memref<1x32xf32, #tpu.memory_space<vmem>>, %arg44: memref<1x32x16xf32, #tpu.memory_space<vmem>>) attributes {dimension_semantics = [#tpu.dimension_semantics<parallel>], iteration_bounds = array<i64: 2>, scalar_prefetch = 0 : i64, scratch_operands = 0 : i64, tpu.core_type = #tpu.core_type<tc>, window_params = [{transform_indices = @transform_0, window_bounds = array<i64: 1, 16, 16>}, {pipeline_mode = #tpu.pipeline_mode<synchronous>, transform_indices = @transform_1, window_bounds = array<i64: 16, 32>}, {pipeline_mode = #tpu.pipeline_mode<synchronous>, transform_indices = @transform_2, window_bounds = array<i64: 1, 32>}, {pipeline_mode = #tpu.pipeline_mode<synchronous>, transform_indices = @transform_3, window_bounds = array<i64: 1, 32>}, {pipeline_mode = #tpu.pipeline_mode<synchronous>, transform_indices = @transform_4, window_bounds = array<i64: 1, 32>}, {pipeline_mode = #tpu.pipeline_mode<synchronous>, transform_indices = @transform_5, window_bounds = array<i64: 32, 96>}, {pipeline_mode = #tpu.pipeline_mode<synchronous>, transform_indices = @transform_6, window_bounds = array<i64: 1, 96>}, {pipeline_mode = #tpu.pipeline_mode<synchronous>, transform_indices = @transform_7, window_bounds = array<i64: 32, 32>}, {pipeline_mode = #tpu.pipeline_mode<synchronous>, transform_indices = @transform_8, window_bounds = array<i64: 1, 32>}, {pipeline_mode = #tpu.pipeline_mode<synchronous>, transform_indices = @transform_9, window_bounds = array<i64: 1, 32>}, {pipeline_mode = #tpu.pipeline_mode<synchronous>, transform_indices = @transform_10, window_bounds = array<i64: 1, 32>}, {pipeline_mode = #tpu.pipeline_mode<synchronous>, transform_indices = @transform_11, window_bounds = array<i64: 32, 1024>}, {pipeline_mode = #tpu.pipeline_mode<synchronous>, transform_indices = @transform_12, window_bounds = array<i64: 1, 1024>}, {pipeline_mode = #tpu.pipeline_mode<synchronous>, transform_indices = @transform_13, window_bounds = array<i64: 1024, 32>}, {pipeline_mode = #tpu.pipeline_mode<synchronous>, transform_indices = @transform_14, window_bounds = array<i64: 1, 32>}, {pipeline_mode = #tpu.pipeline_mode<synchronous>, transform_indices = @transform_15, window_bounds = array<i64: 32, 32>}, {pipeline_mode = #tpu.pipeline_mode<synchronous>, transform_indices = @transform_16, window_bounds = array<i64: 1, 32>}, {pipeline_mode = #tpu.pipeline_mode<synchronous>, transform_indices = @transform_17, window_bounds = array<i64: 1, 32>}, {pipeline_mode = #tpu.pipeline_mode<synchronous>, transform_indices = @transform_18, window_bounds = array<i64: 1, 32>}, {pipeline_mode = #tpu.pipeline_mode<synchronous>, transform_indices = @transform_19, window_bounds = array<i64: 32, 96>}, {pipeline_mode = #tpu.pipeline_mode<synchronous>, transform_indices = @transform_20, window_bounds = array<i64: 1, 96>}, {pipeline_mode = #tpu.pipeline_mode<synchronous>, transform_indices = @transform_21, window_bounds = array<i64: 32, 32>}, {pipeline_mode = #tpu.pipeline_mode<synchronous>, transform_indices = @transform_22, window_bounds = array<i64: 1, 32>}, {pipeline_mode = #tpu.pipeline_mode<synchronous>, transform_indices = @transform_23, window_bounds = array<i64: 1, 32>}, {pipeline_mode = #tpu.pipeline_mode<synchronous>, transform_indices = @transform_24, window_bounds = array<i64: 1, 32>}, {pipeline_mode = #tpu.pipeline_mode<synchronous>, transform_indices = @transform_25, window_bounds = array<i64: 32, 1024>}, {pipeline_mode = #tpu.pipeline_mode<synchronous>, transform_indices = @transform_26, window_bounds = array<i64: 1, 1024>}, {pipeline_mode = #tpu.pipeline_mode<synchronous>, transform_indices = @transform_27, window_bounds = array<i64: 1024, 32>}, {pipeline_mode = #tpu.pipeline_mode<synchronous>, transform_indices = @transform_28, window_bounds = array<i64: 1, 32>}, {pipeline_mode = #tpu.pipeline_mode<synchronous>, transform_indices = @transform_29, window_bounds = array<i64: 32, 32>}, {pipeline_mode = #tpu.pipeline_mode<synchronous>, transform_indices = @transform_30, window_bounds = array<i64: 1, 32>}, {pipeline_mode = #tpu.pipeline_mode<synchronous>, transform_indices = @transform_31, window_bounds = array<i64: 1, 32>}, {pipeline_mode = #tpu.pipeline_mode<synchronous>, transform_indices = @transform_32, window_bounds = array<i64: 1, 32>}, {pipeline_mode = #tpu.pipeline_mode<synchronous>, transform_indices = @transform_33, window_bounds = array<i64: 32, 96>}, {pipeline_mode = #tpu.pipeline_mode<synchronous>, transform_indices = @transform_34, window_bounds = array<i64: 1, 96>}, {pipeline_mode = #tpu.pipeline_mode<synchronous>, transform_indices = @transform_35, window_bounds = array<i64: 32, 32>}, {pipeline_mode = #tpu.pipeline_mode<synchronous>, transform_indices = @transform_36, window_bounds = array<i64: 1, 32>}, {pipeline_mode = #tpu.pipeline_mode<synchronous>, transform_indices = @transform_37, window_bounds = array<i64: 1, 32>}, {pipeline_mode = #tpu.pipeline_mode<synchronous>, transform_indices = @transform_38, window_bounds = array<i64: 1, 32>}, {pipeline_mode = #tpu.pipeline_mode<synchronous>, transform_indices = @transform_39, window_bounds = array<i64: 32, 1024>}, {pipeline_mode = #tpu.pipeline_mode<synchronous>, transform_indices = @transform_40, window_bounds = array<i64: 1, 1024>}, {pipeline_mode = #tpu.pipeline_mode<synchronous>, transform_indices = @transform_41, window_bounds = array<i64: 1024, 32>}, {pipeline_mode = #tpu.pipeline_mode<synchronous>, transform_indices = @transform_42, window_bounds = array<i64: 1, 32>}, {transform_indices = @transform_43, window_bounds = array<i64: 1, 32, 16>}]} {
    %c0 = arith.constant 0 : index
    %c0_0 = arith.constant 0 : index
    %0 = vector.load %arg2[%c0, %c0_0] : memref<16x32xbf16, #tpu.memory_space<vmem>>, vector<16x32xbf16>
    %c0_1 = arith.constant 0 : index
    %c0_2 = arith.constant 0 : index
    %1 = vector.load %arg3[%c0_1, %c0_2] : memref<1x32xf32, #tpu.memory_space<vmem>>, vector<1x32xf32>
    %c0_3 = arith.constant 0 : index
    %c0_4 = arith.constant 0 : index
    %2 = vector.load %arg4[%c0_3, %c0_4] : memref<1x32xf32, #tpu.memory_space<vmem>>, vector<1x32xf32>
    %c0_5 = arith.constant 0 : index
    %c0_6 = arith.constant 0 : index
    %3 = vector.load %arg5[%c0_5, %c0_6] : memref<1x32xf32, #tpu.memory_space<vmem>>, vector<1x32xf32>
    %c0_7 = arith.constant 0 : index
    %c0_8 = arith.constant 0 : index
    %4 = vector.load %arg6[%c0_7, %c0_8] : memref<32x96xbf16, #tpu.memory_space<vmem>>, vector<32x96xbf16>
    %c0_9 = arith.constant 0 : index
    %c0_10 = arith.constant 0 : index
    %5 = vector.load %arg7[%c0_9, %c0_10] : memref<1x96xf32, #tpu.memory_space<vmem>>, vector<1x96xf32>
    %c0_11 = arith.constant 0 : index
    %c0_12 = arith.constant 0 : index
    %6 = vector.load %arg8[%c0_11, %c0_12] : memref<32x32xbf16, #tpu.memory_space<vmem>>, vector<32x32xbf16>
    %c0_13 = arith.constant 0 : index
    %c0_14 = arith.constant 0 : index
    %7 = vector.load %arg9[%c0_13, %c0_14] : memref<1x32xf32, #tpu.memory_space<vmem>>, vector<1x32xf32>
    %c0_15 = arith.constant 0 : index
    %c0_16 = arith.constant 0 : index
    %8 = vector.load %arg10[%c0_15, %c0_16] : memref<1x32xf32, #tpu.memory_space<vmem>>, vector<1x32xf32>
    %c0_17 = arith.constant 0 : index
    %c0_18 = arith.constant 0 : index
    %9 = vector.load %arg11[%c0_17, %c0_18] : memref<1x32xf32, #tpu.memory_space<vmem>>, vector<1x32xf32>
    %c0_19 = arith.constant 0 : index
    %c0_20 = arith.constant 0 : index
    %10 = vector.load %arg12[%c0_19, %c0_20] : memref<32x1024xbf16, #tpu.memory_space<vmem>>, vector<32x1024xbf16>
    %c0_21 = arith.constant 0 : index
    %c0_22 = arith.constant 0 : index
    %11 = vector.load %arg13[%c0_21, %c0_22] : memref<1x1024xf32, #tpu.memory_space<vmem>>, vector<1x1024xf32>
    %c0_23 = arith.constant 0 : index
    %c0_24 = arith.constant 0 : index
    %12 = vector.load %arg14[%c0_23, %c0_24] : memref<1024x32xbf16, #tpu.memory_space<vmem>>, vector<1024x32xbf16>
    %c0_25 = arith.constant 0 : index
    %c0_26 = arith.constant 0 : index
    %13 = vector.load %arg15[%c0_25, %c0_26] : memref<1x32xf32, #tpu.memory_space<vmem>>, vector<1x32xf32>
    %c0_27 = arith.constant 0 : index
    %c0_28 = arith.constant 0 : index
    %14 = vector.load %arg16[%c0_27, %c0_28] : memref<32x32xbf16, #tpu.memory_space<vmem>>, vector<32x32xbf16>
    %c0_29 = arith.constant 0 : index
    %c0_30 = arith.constant 0 : index
    %15 = vector.load %arg17[%c0_29, %c0_30] : memref<1x32xf32, #tpu.memory_space<vmem>>, vector<1x32xf32>
    %c0_31 = arith.constant 0 : index
    %c0_32 = arith.constant 0 : index
    %16 = vector.load %arg18[%c0_31, %c0_32] : memref<1x32xf32, #tpu.memory_space<vmem>>, vector<1x32xf32>
    %c0_33 = arith.constant 0 : index
    %c0_34 = arith.constant 0 : index
    %17 = vector.load %arg19[%c0_33, %c0_34] : memref<1x32xf32, #tpu.memory_space<vmem>>, vector<1x32xf32>
    %c0_35 = arith.constant 0 : index
    %c0_36 = arith.constant 0 : index
    %18 = vector.load %arg20[%c0_35, %c0_36] : memref<32x96xbf16, #tpu.memory_space<vmem>>, vector<32x96xbf16>
    %c0_37 = arith.constant 0 : index
    %c0_38 = arith.constant 0 : index
    %19 = vector.load %arg21[%c0_37, %c0_38] : memref<1x96xf32, #tpu.memory_space<vmem>>, vector<1x96xf32>
    %c0_39 = arith.constant 0 : index
    %c0_40 = arith.constant 0 : index
    %20 = vector.load %arg22[%c0_39, %c0_40] : memref<32x32xbf16, #tpu.memory_space<vmem>>, vector<32x32xbf16>
    %c0_41 = arith.constant 0 : index
    %c0_42 = arith.constant 0 : index
    %21 = vector.load %arg23[%c0_41, %c0_42] : memref<1x32xf32, #tpu.memory_space<vmem>>, vector<1x32xf32>
    %c0_43 = arith.constant 0 : index
    %c0_44 = arith.constant 0 : index
    %22 = vector.load %arg24[%c0_43, %c0_44] : memref<1x32xf32, #tpu.memory_space<vmem>>, vector<1x32xf32>
    %c0_45 = arith.constant 0 : index
    %c0_46 = arith.constant 0 : index
    %23 = vector.load %arg25[%c0_45, %c0_46] : memref<1x32xf32, #tpu.memory_space<vmem>>, vector<1x32xf32>
    %c0_47 = arith.constant 0 : index
    %c0_48 = arith.constant 0 : index
    %24 = vector.load %arg26[%c0_47, %c0_48] : memref<32x1024xbf16, #tpu.memory_space<vmem>>, vector<32x1024xbf16>
    %c0_49 = arith.constant 0 : index
    %c0_50 = arith.constant 0 : index
    %25 = vector.load %arg27[%c0_49, %c0_50] : memref<1x1024xf32, #tpu.memory_space<vmem>>, vector<1x1024xf32>
    %c0_51 = arith.constant 0 : index
    %c0_52 = arith.constant 0 : index
    %26 = vector.load %arg28[%c0_51, %c0_52] : memref<1024x32xbf16, #tpu.memory_space<vmem>>, vector<1024x32xbf16>
    %c0_53 = arith.constant 0 : index
    %c0_54 = arith.constant 0 : index
    %27 = vector.load %arg29[%c0_53, %c0_54] : memref<1x32xf32, #tpu.memory_space<vmem>>, vector<1x32xf32>
    %c0_55 = arith.constant 0 : index
    %c0_56 = arith.constant 0 : index
    %28 = vector.load %arg30[%c0_55, %c0_56] : memref<32x32xbf16, #tpu.memory_space<vmem>>, vector<32x32xbf16>
    %c0_57 = arith.constant 0 : index
    %c0_58 = arith.constant 0 : index
    %29 = vector.load %arg31[%c0_57, %c0_58] : memref<1x32xf32, #tpu.memory_space<vmem>>, vector<1x32xf32>
    %c0_59 = arith.constant 0 : index
    %c0_60 = arith.constant 0 : index
    %30 = vector.load %arg32[%c0_59, %c0_60] : memref<1x32xf32, #tpu.memory_space<vmem>>, vector<1x32xf32>
    %c0_61 = arith.constant 0 : index
    %c0_62 = arith.constant 0 : index
    %31 = vector.load %arg33[%c0_61, %c0_62] : memref<1x32xf32, #tpu.memory_space<vmem>>, vector<1x32xf32>
    %c0_63 = arith.constant 0 : index
    %c0_64 = arith.constant 0 : index
    %32 = vector.load %arg34[%c0_63, %c0_64] : memref<32x96xbf16, #tpu.memory_space<vmem>>, vector<32x96xbf16>
    %c0_65 = arith.constant 0 : index
    %c0_66 = arith.constant 0 : index
    %33 = vector.load %arg35[%c0_65, %c0_66] : memref<1x96xf32, #tpu.memory_space<vmem>>, vector<1x96xf32>
    %c0_67 = arith.constant 0 : index
    %c0_68 = arith.constant 0 : index
    %34 = vector.load %arg36[%c0_67, %c0_68] : memref<32x32xbf16, #tpu.memory_space<vmem>>, vector<32x32xbf16>
    %c0_69 = arith.constant 0 : index
    %c0_70 = arith.constant 0 : index
    %35 = vector.load %arg37[%c0_69, %c0_70] : memref<1x32xf32, #tpu.memory_space<vmem>>, vector<1x32xf32>
    %c0_71 = arith.constant 0 : index
    %c0_72 = arith.constant 0 : index
    %36 = vector.load %arg38[%c0_71, %c0_72] : memref<1x32xf32, #tpu.memory_space<vmem>>, vector<1x32xf32>
    %c0_73 = arith.constant 0 : index
    %c0_74 = arith.constant 0 : index
    %37 = vector.load %arg39[%c0_73, %c0_74] : memref<1x32xf32, #tpu.memory_space<vmem>>, vector<1x32xf32>
    %c0_75 = arith.constant 0 : index
    %c0_76 = arith.constant 0 : index
    %38 = vector.load %arg40[%c0_75, %c0_76] : memref<32x1024xbf16, #tpu.memory_space<vmem>>, vector<32x1024xbf16>
    %c0_77 = arith.constant 0 : index
    %c0_78 = arith.constant 0 : index
    %39 = vector.load %arg41[%c0_77, %c0_78] : memref<1x1024xf32, #tpu.memory_space<vmem>>, vector<1x1024xf32>
    %c0_79 = arith.constant 0 : index
    %c0_80 = arith.constant 0 : index
    %40 = vector.load %arg42[%c0_79, %c0_80] : memref<1024x32xbf16, #tpu.memory_space<vmem>>, vector<1024x32xbf16>
    %c0_81 = arith.constant 0 : index
    %c0_82 = arith.constant 0 : index
    %41 = vector.load %arg43[%c0_81, %c0_82] : memref<1x32xf32, #tpu.memory_space<vmem>>, vector<1x32xf32>
    %c0_83 = arith.constant 0 : index
    %c0_84 = arith.constant 0 : index
    %c0_85 = arith.constant 0 : index
    %42 = vector.load %arg1[%c0_83, %c0_84, %c0_85] : memref<1x16x16xf32, #tpu.memory_space<vmem>>, vector<1x16x16xf32>
    %43 = vector.shape_cast %42 : vector<1x16x16xf32> to vector<16x16xf32>
    %44 = tpu.transpose %43, [1, 0] : vector<16x16xf32> -> vector<16x16xf32>
    %45 = arith.truncf %44 : vector<16x16xf32> to vector<16x16xbf16>
    %cst = arith.constant dense<0.000000e+00> : vector<16x32xf32>
    %46 = tpu.matmul %45, %0, %cst {dimension_numbers = #tpu.dot_dimension_numbers<[1], [0], [0], [1], [0, 0, 1, 1], [], []>} : vector<16x16xbf16>, vector<16x32xbf16>, vector<16x32xf32> -> vector<16x32xf32>
    %47 = vector.broadcast %1 : vector<1x32xf32> to vector<16x32xf32>
    %48 = arith.addf %46, %47 : vector<16x32xf32>
    %cst_86 = arith.constant dense<0.000000e+00> : vector<16xf32>
    %49 = vector.multi_reduction <add>, %48, %cst_86 [1] : vector<16x32xf32> to vector<16xf32>
    %50 = vector.shape_cast %49 : vector<16xf32> to vector<16x1xf32>
    %cst_87 = arith.constant 3.200000e+01 : f32
    %51 = vector.broadcast %cst_87 : f32 to vector<16x1xf32>
    %52 = arith.divf %50, %51 : vector<16x1xf32>
    %53 = vector.broadcast %52 : vector<16x1xf32> to vector<16x32xf32>
    %54 = arith.subf %48, %53 : vector<16x32xf32>
    %55 = arith.mulf %54, %54 : vector<16x32xf32>
    %cst_88 = arith.constant dense<0.000000e+00> : vector<16xf32>
    %56 = vector.multi_reduction <add>, %55, %cst_88 [1] : vector<16x32xf32> to vector<16xf32>
    %57 = vector.shape_cast %56 : vector<16xf32> to vector<16x1xf32>
    %cst_89 = arith.constant 3.200000e+01 : f32
    %58 = vector.broadcast %cst_89 : f32 to vector<16x1xf32>
    %59 = arith.divf %57, %58 : vector<16x1xf32>
    %60 = vector.broadcast %52 : vector<16x1xf32> to vector<16x32xf32>
    %61 = arith.subf %48, %60 : vector<16x32xf32>
    %cst_90 = arith.constant 9.99999974E-6 : f32
    %62 = vector.broadcast %cst_90 : f32 to vector<16x1xf32>
    %63 = arith.addf %59, %62 : vector<16x1xf32>
    %64 = math.rsqrt %63 : vector<16x1xf32>
    %65 = vector.broadcast %64 : vector<16x1xf32> to vector<16x32xf32>
    %66 = arith.mulf %61, %65 : vector<16x32xf32>
    %67 = vector.broadcast %2 : vector<1x32xf32> to vector<16x32xf32>
    %68 = arith.mulf %66, %67 : vector<16x32xf32>
    %69 = vector.broadcast %3 : vector<1x32xf32> to vector<16x32xf32>
    %70 = arith.addf %68, %69 : vector<16x32xf32>
    %71 = arith.truncf %70 : vector<16x32xf32> to vector<16x32xbf16>
    %cst_91 = arith.constant dense<0.000000e+00> : vector<16x96xf32>
    %72 = tpu.matmul %71, %4, %cst_91 {dimension_numbers = #tpu.dot_dimension_numbers<[1], [0], [0], [1], [0, 0, 1, 1], [], []>} : vector<16x32xbf16>, vector<32x96xbf16>, vector<16x96xf32> -> vector<16x96xf32>
    %73 = vector.broadcast %5 : vector<1x96xf32> to vector<16x96xf32>
    %74 = arith.addf %72, %73 : vector<16x96xf32>
    %75 = vector.extract_strided_slice %74 {offsets = [0, 0], sizes = [16, 32], strides = [1, 1]} : vector<16x96xf32> to vector<16x32xf32>
    %76 = vector.extract_strided_slice %74 {offsets = [0, 32], sizes = [16, 32], strides = [1, 1]} : vector<16x96xf32> to vector<16x32xf32>
    %77 = vector.extract_strided_slice %74 {offsets = [0, 64], sizes = [16, 32], strides = [1, 1]} : vector<16x96xf32> to vector<16x32xf32>
    %cst_92 = arith.constant 0.000000e+00 : f32
    %78 = vector.broadcast %cst_92 : f32 to vector<16x32xf32>
    %79 = vector.extract_strided_slice %75 {offsets = [0, 0], sizes = [16, 8], strides = [1, 1]} : vector<16x32xf32> to vector<16x8xf32>
    %80 = arith.truncf %79 : vector<16x8xf32> to vector<16x8xbf16>
    %81 = vector.extract_strided_slice %76 {offsets = [0, 0], sizes = [16, 8], strides = [1, 1]} : vector<16x32xf32> to vector<16x8xf32>
    %82 = arith.truncf %81 : vector<16x8xf32> to vector<16x8xbf16>
    %83 = vector.extract_strided_slice %77 {offsets = [0, 0], sizes = [16, 8], strides = [1, 1]} : vector<16x32xf32> to vector<16x8xf32>
    %84 = arith.truncf %83 : vector<16x8xf32> to vector<16x8xbf16>
    %85 = tpu.transpose %82, [1, 0] : vector<16x8xbf16> -> vector<8x16xbf16>
    %cst_93 = arith.constant dense<0.000000e+00> : vector<16x16xf32>
    %86 = tpu.matmul %80, %85, %cst_93 {dimension_numbers = #tpu.dot_dimension_numbers<[1], [0], [0], [1], [0, 0, 1, 1], [], []>} : vector<16x8xbf16>, vector<8x16xbf16>, vector<16x16xf32> -> vector<16x16xf32>
    %cst_94 = arith.constant dense<0xFF800000> : vector<16xf32>
    %87 = vector.multi_reduction <maximumf>, %86, %cst_94 [1] : vector<16x16xf32> to vector<16xf32>
    %88 = vector.shape_cast %87 : vector<16xf32> to vector<16x1xf32>
    %89 = vector.broadcast %88 : vector<16x1xf32> to vector<16x16xf32>
    %90 = arith.subf %86, %89 : vector<16x16xf32>
    %91 = math.exp %90 : vector<16x16xf32>
    %cst_95 = arith.constant dense<0.000000e+00> : vector<16xf32>
    %92 = vector.multi_reduction <add>, %91, %cst_95 [1] : vector<16x16xf32> to vector<16xf32>
    %93 = vector.shape_cast %92 : vector<16xf32> to vector<16x1xf32>
    %94 = tpu.reciprocal %93 {approx = true} : vector<16x1xf32> -> vector<16x1xf32>
    %95 = vector.broadcast %94 : vector<16x1xf32> to vector<16x16xf32>
    %96 = arith.mulf %91, %95 : vector<16x16xf32>
    %97 = arith.truncf %96 : vector<16x16xf32> to vector<16x16xbf16>
    %cst_96 = arith.constant dense<0.000000e+00> : vector<16x8xf32>
    %98 = tpu.matmul %97, %84, %cst_96 {dimension_numbers = #tpu.dot_dimension_numbers<[1], [0], [0], [1], [0, 0, 1, 1], [], []>} : vector<16x16xbf16>, vector<16x8xbf16>, vector<16x8xf32> -> vector<16x8xf32>
    %99 = arith.truncf %98 : vector<16x8xf32> to vector<16x8xbf16>
    %100 = vector.extract_strided_slice %6 {offsets = [0, 0], sizes = [8, 32], strides = [1, 1]} : vector<32x32xbf16> to vector<8x32xbf16>
    %cst_97 = arith.constant dense<0.000000e+00> : vector<16x32xf32>
    %101 = tpu.matmul %99, %100, %cst_97 {dimension_numbers = #tpu.dot_dimension_numbers<[1], [0], [0], [1], [0, 0, 1, 1], [], []>} : vector<16x8xbf16>, vector<8x32xbf16>, vector<16x32xf32> -> vector<16x32xf32>
    %102 = arith.addf %78, %101 : vector<16x32xf32>
    %103 = vector.extract_strided_slice %75 {offsets = [0, 8], sizes = [16, 8], strides = [1, 1]} : vector<16x32xf32> to vector<16x8xf32>
    %104 = arith.truncf %103 : vector<16x8xf32> to vector<16x8xbf16>
    %105 = vector.extract_strided_slice %76 {offsets = [0, 8], sizes = [16, 8], strides = [1, 1]} : vector<16x32xf32> to vector<16x8xf32>
    %106 = arith.truncf %105 : vector<16x8xf32> to vector<16x8xbf16>
    %107 = vector.extract_strided_slice %77 {offsets = [0, 8], sizes = [16, 8], strides = [1, 1]} : vector<16x32xf32> to vector<16x8xf32>
    %108 = arith.truncf %107 : vector<16x8xf32> to vector<16x8xbf16>
    %109 = tpu.transpose %106, [1, 0] : vector<16x8xbf16> -> vector<8x16xbf16>
    %cst_98 = arith.constant dense<0.000000e+00> : vector<16x16xf32>
    %110 = tpu.matmul %104, %109, %cst_98 {dimension_numbers = #tpu.dot_dimension_numbers<[1], [0], [0], [1], [0, 0, 1, 1], [], []>} : vector<16x8xbf16>, vector<8x16xbf16>, vector<16x16xf32> -> vector<16x16xf32>
    %cst_99 = arith.constant dense<0xFF800000> : vector<16xf32>
    %111 = vector.multi_reduction <maximumf>, %110, %cst_99 [1] : vector<16x16xf32> to vector<16xf32>
    %112 = vector.shape_cast %111 : vector<16xf32> to vector<16x1xf32>
    %113 = vector.broadcast %112 : vector<16x1xf32> to vector<16x16xf32>
    %114 = arith.subf %110, %113 : vector<16x16xf32>
    %115 = math.exp %114 : vector<16x16xf32>
    %cst_100 = arith.constant dense<0.000000e+00> : vector<16xf32>
    %116 = vector.multi_reduction <add>, %115, %cst_100 [1] : vector<16x16xf32> to vector<16xf32>
    %117 = vector.shape_cast %116 : vector<16xf32> to vector<16x1xf32>
    %118 = tpu.reciprocal %117 {approx = true} : vector<16x1xf32> -> vector<16x1xf32>
    %119 = vector.broadcast %118 : vector<16x1xf32> to vector<16x16xf32>
    %120 = arith.mulf %115, %119 : vector<16x16xf32>
    %121 = arith.truncf %120 : vector<16x16xf32> to vector<16x16xbf16>
    %cst_101 = arith.constant dense<0.000000e+00> : vector<16x8xf32>
    %122 = tpu.matmul %121, %108, %cst_101 {dimension_numbers = #tpu.dot_dimension_numbers<[1], [0], [0], [1], [0, 0, 1, 1], [], []>} : vector<16x16xbf16>, vector<16x8xbf16>, vector<16x8xf32> -> vector<16x8xf32>
    %123 = arith.truncf %122 : vector<16x8xf32> to vector<16x8xbf16>
    %124 = vector.extract_strided_slice %6 {offsets = [8, 0], sizes = [8, 32], strides = [1, 1]} : vector<32x32xbf16> to vector<8x32xbf16>
    %cst_102 = arith.constant dense<0.000000e+00> : vector<16x32xf32>
    %125 = tpu.matmul %123, %124, %cst_102 {dimension_numbers = #tpu.dot_dimension_numbers<[1], [0], [0], [1], [0, 0, 1, 1], [], []>} : vector<16x8xbf16>, vector<8x32xbf16>, vector<16x32xf32> -> vector<16x32xf32>
    %126 = arith.addf %102, %125 : vector<16x32xf32>
    %127 = vector.extract_strided_slice %75 {offsets = [0, 16], sizes = [16, 8], strides = [1, 1]} : vector<16x32xf32> to vector<16x8xf32>
    %128 = arith.truncf %127 : vector<16x8xf32> to vector<16x8xbf16>
    %129 = vector.extract_strided_slice %76 {offsets = [0, 16], sizes = [16, 8], strides = [1, 1]} : vector<16x32xf32> to vector<16x8xf32>
    %130 = arith.truncf %129 : vector<16x8xf32> to vector<16x8xbf16>
    %131 = vector.extract_strided_slice %77 {offsets = [0, 16], sizes = [16, 8], strides = [1, 1]} : vector<16x32xf32> to vector<16x8xf32>
    %132 = arith.truncf %131 : vector<16x8xf32> to vector<16x8xbf16>
    %133 = tpu.transpose %130, [1, 0] : vector<16x8xbf16> -> vector<8x16xbf16>
    %cst_103 = arith.constant dense<0.000000e+00> : vector<16x16xf32>
    %134 = tpu.matmul %128, %133, %cst_103 {dimension_numbers = #tpu.dot_dimension_numbers<[1], [0], [0], [1], [0, 0, 1, 1], [], []>} : vector<16x8xbf16>, vector<8x16xbf16>, vector<16x16xf32> -> vector<16x16xf32>
    %cst_104 = arith.constant dense<0xFF800000> : vector<16xf32>
    %135 = vector.multi_reduction <maximumf>, %134, %cst_104 [1] : vector<16x16xf32> to vector<16xf32>
    %136 = vector.shape_cast %135 : vector<16xf32> to vector<16x1xf32>
    %137 = vector.broadcast %136 : vector<16x1xf32> to vector<16x16xf32>
    %138 = arith.subf %134, %137 : vector<16x16xf32>
    %139 = math.exp %138 : vector<16x16xf32>
    %cst_105 = arith.constant dense<0.000000e+00> : vector<16xf32>
    %140 = vector.multi_reduction <add>, %139, %cst_105 [1] : vector<16x16xf32> to vector<16xf32>
    %141 = vector.shape_cast %140 : vector<16xf32> to vector<16x1xf32>
    %142 = tpu.reciprocal %141 {approx = true} : vector<16x1xf32> -> vector<16x1xf32>
    %143 = vector.broadcast %142 : vector<16x1xf32> to vector<16x16xf32>
    %144 = arith.mulf %139, %143 : vector<16x16xf32>
    %145 = arith.truncf %144 : vector<16x16xf32> to vector<16x16xbf16>
    %cst_106 = arith.constant dense<0.000000e+00> : vector<16x8xf32>
    %146 = tpu.matmul %145, %132, %cst_106 {dimension_numbers = #tpu.dot_dimension_numbers<[1], [0], [0], [1], [0, 0, 1, 1], [], []>} : vector<16x16xbf16>, vector<16x8xbf16>, vector<16x8xf32> -> vector<16x8xf32>
    %147 = arith.truncf %146 : vector<16x8xf32> to vector<16x8xbf16>
    %148 = vector.extract_strided_slice %6 {offsets = [16, 0], sizes = [8, 32], strides = [1, 1]} : vector<32x32xbf16> to vector<8x32xbf16>
    %cst_107 = arith.constant dense<0.000000e+00> : vector<16x32xf32>
    %149 = tpu.matmul %147, %148, %cst_107 {dimension_numbers = #tpu.dot_dimension_numbers<[1], [0], [0], [1], [0, 0, 1, 1], [], []>} : vector<16x8xbf16>, vector<8x32xbf16>, vector<16x32xf32> -> vector<16x32xf32>
    %150 = arith.addf %126, %149 : vector<16x32xf32>
    %151 = vector.extract_strided_slice %75 {offsets = [0, 24], sizes = [16, 8], strides = [1, 1]} : vector<16x32xf32> to vector<16x8xf32>
    %152 = arith.truncf %151 : vector<16x8xf32> to vector<16x8xbf16>
    %153 = vector.extract_strided_slice %76 {offsets = [0, 24], sizes = [16, 8], strides = [1, 1]} : vector<16x32xf32> to vector<16x8xf32>
    %154 = arith.truncf %153 : vector<16x8xf32> to vector<16x8xbf16>
    %155 = vector.extract_strided_slice %77 {offsets = [0, 24], sizes = [16, 8], strides = [1, 1]} : vector<16x32xf32> to vector<16x8xf32>
    %156 = arith.truncf %155 : vector<16x8xf32> to vector<16x8xbf16>
    %157 = tpu.transpose %154, [1, 0] : vector<16x8xbf16> -> vector<8x16xbf16>
    %cst_108 = arith.constant dense<0.000000e+00> : vector<16x16xf32>
    %158 = tpu.matmul %152, %157, %cst_108 {dimension_numbers = #tpu.dot_dimension_numbers<[1], [0], [0], [1], [0, 0, 1, 1], [], []>} : vector<16x8xbf16>, vector<8x16xbf16>, vector<16x16xf32> -> vector<16x16xf32>
    %cst_109 = arith.constant dense<0xFF800000> : vector<16xf32>
    %159 = vector.multi_reduction <maximumf>, %158, %cst_109 [1] : vector<16x16xf32> to vector<16xf32>
    %160 = vector.shape_cast %159 : vector<16xf32> to vector<16x1xf32>
    %161 = vector.broadcast %160 : vector<16x1xf32> to vector<16x16xf32>
    %162 = arith.subf %158, %161 : vector<16x16xf32>
    %163 = math.exp %162 : vector<16x16xf32>
    %cst_110 = arith.constant dense<0.000000e+00> : vector<16xf32>
    %164 = vector.multi_reduction <add>, %163, %cst_110 [1] : vector<16x16xf32> to vector<16xf32>
    %165 = vector.shape_cast %164 : vector<16xf32> to vector<16x1xf32>
    %166 = tpu.reciprocal %165 {approx = true} : vector<16x1xf32> -> vector<16x1xf32>
    %167 = vector.broadcast %166 : vector<16x1xf32> to vector<16x16xf32>
    %168 = arith.mulf %163, %167 : vector<16x16xf32>
    %169 = arith.truncf %168 : vector<16x16xf32> to vector<16x16xbf16>
    %cst_111 = arith.constant dense<0.000000e+00> : vector<16x8xf32>
    %170 = tpu.matmul %169, %156, %cst_111 {dimension_numbers = #tpu.dot_dimension_numbers<[1], [0], [0], [1], [0, 0, 1, 1], [], []>} : vector<16x16xbf16>, vector<16x8xbf16>, vector<16x8xf32> -> vector<16x8xf32>
    %171 = arith.truncf %170 : vector<16x8xf32> to vector<16x8xbf16>
    %172 = vector.extract_strided_slice %6 {offsets = [24, 0], sizes = [8, 32], strides = [1, 1]} : vector<32x32xbf16> to vector<8x32xbf16>
    %cst_112 = arith.constant dense<0.000000e+00> : vector<16x32xf32>
    %173 = tpu.matmul %171, %172, %cst_112 {dimension_numbers = #tpu.dot_dimension_numbers<[1], [0], [0], [1], [0, 0, 1, 1], [], []>} : vector<16x8xbf16>, vector<8x32xbf16>, vector<16x32xf32> -> vector<16x32xf32>
    %174 = arith.addf %150, %173 : vector<16x32xf32>
    %175 = vector.broadcast %7 : vector<1x32xf32> to vector<16x32xf32>
    %176 = arith.addf %174, %175 : vector<16x32xf32>
    %177 = arith.addf %70, %176 : vector<16x32xf32>
    %cst_113 = arith.constant dense<0.000000e+00> : vector<16xf32>
    %178 = vector.multi_reduction <add>, %177, %cst_113 [1] : vector<16x32xf32> to vector<16xf32>
    %179 = vector.shape_cast %178 : vector<16xf32> to vector<16x1xf32>
    %cst_114 = arith.constant 3.200000e+01 : f32
    %180 = vector.broadcast %cst_114 : f32 to vector<16x1xf32>
    %181 = arith.divf %179, %180 : vector<16x1xf32>
    %182 = vector.broadcast %181 : vector<16x1xf32> to vector<16x32xf32>
    %183 = arith.subf %177, %182 : vector<16x32xf32>
    %184 = arith.mulf %183, %183 : vector<16x32xf32>
    %cst_115 = arith.constant dense<0.000000e+00> : vector<16xf32>
    %185 = vector.multi_reduction <add>, %184, %cst_115 [1] : vector<16x32xf32> to vector<16xf32>
    %186 = vector.shape_cast %185 : vector<16xf32> to vector<16x1xf32>
    %cst_116 = arith.constant 3.200000e+01 : f32
    %187 = vector.broadcast %cst_116 : f32 to vector<16x1xf32>
    %188 = arith.divf %186, %187 : vector<16x1xf32>
    %189 = vector.broadcast %181 : vector<16x1xf32> to vector<16x32xf32>
    %190 = arith.subf %177, %189 : vector<16x32xf32>
    %cst_117 = arith.constant 9.99999974E-6 : f32
    %191 = vector.broadcast %cst_117 : f32 to vector<16x1xf32>
    %192 = arith.addf %188, %191 : vector<16x1xf32>
    %193 = math.rsqrt %192 : vector<16x1xf32>
    %194 = vector.broadcast %193 : vector<16x1xf32> to vector<16x32xf32>
    %195 = arith.mulf %190, %194 : vector<16x32xf32>
    %196 = vector.broadcast %8 : vector<1x32xf32> to vector<16x32xf32>
    %197 = arith.mulf %195, %196 : vector<16x32xf32>
    %198 = vector.broadcast %9 : vector<1x32xf32> to vector<16x32xf32>
    %199 = arith.addf %197, %198 : vector<16x32xf32>
    %200 = arith.truncf %199 : vector<16x32xf32> to vector<16x32xbf16>
    %cst_118 = arith.constant dense<0.000000e+00> : vector<16x1024xf32>
    %201 = tpu.matmul %200, %10, %cst_118 {dimension_numbers = #tpu.dot_dimension_numbers<[1], [0], [0], [1], [0, 0, 1, 1], [], []>} : vector<16x32xbf16>, vector<32x1024xbf16>, vector<16x1024xf32> -> vector<16x1024xf32>
    %202 = vector.broadcast %11 : vector<1x1024xf32> to vector<16x1024xf32>
    %203 = arith.addf %201, %202 : vector<16x1024xf32>
    %cst_119 = arith.constant 5.000000e-01 : f32
    %204 = vector.broadcast %cst_119 : f32 to vector<16x1024xf32>
    %205 = arith.mulf %204, %203 : vector<16x1024xf32>
    %cst_120 = arith.constant 0.707106769 : f32
    %206 = vector.broadcast %cst_120 : f32 to vector<16x1024xf32>
    %207 = arith.mulf %203, %206 : vector<16x1024xf32>
    %208 = math.erf %207 : vector<16x1024xf32>
    %cst_121 = arith.constant 1.000000e+00 : f32
    %209 = vector.broadcast %cst_121 : f32 to vector<16x1024xf32>
    %210 = arith.addf %209, %208 : vector<16x1024xf32>
    %211 = arith.mulf %205, %210 : vector<16x1024xf32>
    %212 = arith.truncf %211 : vector<16x1024xf32> to vector<16x1024xbf16>
    %cst_122 = arith.constant dense<0.000000e+00> : vector<16x32xf32>
    %213 = tpu.matmul %212, %12, %cst_122 {dimension_numbers = #tpu.dot_dimension_numbers<[1], [0], [0], [1], [0, 0, 1, 1], [], []>} : vector<16x1024xbf16>, vector<1024x32xbf16>, vector<16x32xf32> -> vector<16x32xf32>
    %214 = vector.broadcast %13 : vector<1x32xf32> to vector<16x32xf32>
    %215 = arith.addf %213, %214 : vector<16x32xf32>
    %216 = arith.addf %199, %215 : vector<16x32xf32>
    %217 = arith.truncf %216 : vector<16x32xf32> to vector<16x32xbf16>
    %cst_123 = arith.constant dense<0.000000e+00> : vector<16x32xf32>
    %218 = tpu.matmul %217, %14, %cst_123 {dimension_numbers = #tpu.dot_dimension_numbers<[1], [0], [0], [1], [0, 0, 1, 1], [], []>} : vector<16x32xbf16>, vector<32x32xbf16>, vector<16x32xf32> -> vector<16x32xf32>
    %219 = vector.broadcast %15 : vector<1x32xf32> to vector<16x32xf32>
    %220 = arith.addf %218, %219 : vector<16x32xf32>
    %cst_124 = arith.constant dense<0.000000e+00> : vector<16xf32>
    %221 = vector.multi_reduction <add>, %220, %cst_124 [1] : vector<16x32xf32> to vector<16xf32>
    %222 = vector.shape_cast %221 : vector<16xf32> to vector<16x1xf32>
    %cst_125 = arith.constant 3.200000e+01 : f32
    %223 = vector.broadcast %cst_125 : f32 to vector<16x1xf32>
    %224 = arith.divf %222, %223 : vector<16x1xf32>
    %225 = vector.broadcast %224 : vector<16x1xf32> to vector<16x32xf32>
    %226 = arith.subf %220, %225 : vector<16x32xf32>
    %227 = arith.mulf %226, %226 : vector<16x32xf32>
    %cst_126 = arith.constant dense<0.000000e+00> : vector<16xf32>
    %228 = vector.multi_reduction <add>, %227, %cst_126 [1] : vector<16x32xf32> to vector<16xf32>
    %229 = vector.shape_cast %228 : vector<16xf32> to vector<16x1xf32>
    %cst_127 = arith.constant 3.200000e+01 : f32
    %230 = vector.broadcast %cst_127 : f32 to vector<16x1xf32>
    %231 = arith.divf %229, %230 : vector<16x1xf32>
    %232 = vector.broadcast %224 : vector<16x1xf32> to vector<16x32xf32>
    %233 = arith.subf %220, %232 : vector<16x32xf32>
    %cst_128 = arith.constant 9.99999974E-6 : f32
    %234 = vector.broadcast %cst_128 : f32 to vector<16x1xf32>
    %235 = arith.addf %231, %234 : vector<16x1xf32>
    %236 = math.rsqrt %235 : vector<16x1xf32>
    %237 = vector.broadcast %236 : vector<16x1xf32> to vector<16x32xf32>
    %238 = arith.mulf %233, %237 : vector<16x32xf32>
    %239 = vector.broadcast %16 : vector<1x32xf32> to vector<16x32xf32>
    %240 = arith.mulf %238, %239 : vector<16x32xf32>
    %241 = vector.broadcast %17 : vector<1x32xf32> to vector<16x32xf32>
    %242 = arith.addf %240, %241 : vector<16x32xf32>
    %243 = arith.truncf %242 : vector<16x32xf32> to vector<16x32xbf16>
    %cst_129 = arith.constant dense<0.000000e+00> : vector<16x96xf32>
    %244 = tpu.matmul %243, %18, %cst_129 {dimension_numbers = #tpu.dot_dimension_numbers<[1], [0], [0], [1], [0, 0, 1, 1], [], []>} : vector<16x32xbf16>, vector<32x96xbf16>, vector<16x96xf32> -> vector<16x96xf32>
    %245 = vector.broadcast %19 : vector<1x96xf32> to vector<16x96xf32>
    %246 = arith.addf %244, %245 : vector<16x96xf32>
    %247 = vector.extract_strided_slice %246 {offsets = [0, 0], sizes = [16, 32], strides = [1, 1]} : vector<16x96xf32> to vector<16x32xf32>
    %248 = vector.extract_strided_slice %246 {offsets = [0, 32], sizes = [16, 32], strides = [1, 1]} : vector<16x96xf32> to vector<16x32xf32>
    %249 = vector.extract_strided_slice %246 {offsets = [0, 64], sizes = [16, 32], strides = [1, 1]} : vector<16x96xf32> to vector<16x32xf32>
    %cst_130 = arith.constant 0.000000e+00 : f32
    %250 = vector.broadcast %cst_130 : f32 to vector<16x32xf32>
    %251 = vector.extract_strided_slice %247 {offsets = [0, 0], sizes = [16, 8], strides = [1, 1]} : vector<16x32xf32> to vector<16x8xf32>
    %252 = arith.truncf %251 : vector<16x8xf32> to vector<16x8xbf16>
    %253 = vector.extract_strided_slice %248 {offsets = [0, 0], sizes = [16, 8], strides = [1, 1]} : vector<16x32xf32> to vector<16x8xf32>
    %254 = arith.truncf %253 : vector<16x8xf32> to vector<16x8xbf16>
    %255 = vector.extract_strided_slice %249 {offsets = [0, 0], sizes = [16, 8], strides = [1, 1]} : vector<16x32xf32> to vector<16x8xf32>
    %256 = arith.truncf %255 : vector<16x8xf32> to vector<16x8xbf16>
    %257 = tpu.transpose %254, [1, 0] : vector<16x8xbf16> -> vector<8x16xbf16>
    %cst_131 = arith.constant dense<0.000000e+00> : vector<16x16xf32>
    %258 = tpu.matmul %252, %257, %cst_131 {dimension_numbers = #tpu.dot_dimension_numbers<[1], [0], [0], [1], [0, 0, 1, 1], [], []>} : vector<16x8xbf16>, vector<8x16xbf16>, vector<16x16xf32> -> vector<16x16xf32>
    %cst_132 = arith.constant dense<0xFF800000> : vector<16xf32>
    %259 = vector.multi_reduction <maximumf>, %258, %cst_132 [1] : vector<16x16xf32> to vector<16xf32>
    %260 = vector.shape_cast %259 : vector<16xf32> to vector<16x1xf32>
    %261 = vector.broadcast %260 : vector<16x1xf32> to vector<16x16xf32>
    %262 = arith.subf %258, %261 : vector<16x16xf32>
    %263 = math.exp %262 : vector<16x16xf32>
    %cst_133 = arith.constant dense<0.000000e+00> : vector<16xf32>
    %264 = vector.multi_reduction <add>, %263, %cst_133 [1] : vector<16x16xf32> to vector<16xf32>
    %265 = vector.shape_cast %264 : vector<16xf32> to vector<16x1xf32>
    %266 = tpu.reciprocal %265 {approx = true} : vector<16x1xf32> -> vector<16x1xf32>
    %267 = vector.broadcast %266 : vector<16x1xf32> to vector<16x16xf32>
    %268 = arith.mulf %263, %267 : vector<16x16xf32>
    %269 = arith.truncf %268 : vector<16x16xf32> to vector<16x16xbf16>
    %cst_134 = arith.constant dense<0.000000e+00> : vector<16x8xf32>
    %270 = tpu.matmul %269, %256, %cst_134 {dimension_numbers = #tpu.dot_dimension_numbers<[1], [0], [0], [1], [0, 0, 1, 1], [], []>} : vector<16x16xbf16>, vector<16x8xbf16>, vector<16x8xf32> -> vector<16x8xf32>
    %271 = arith.truncf %270 : vector<16x8xf32> to vector<16x8xbf16>
    %272 = vector.extract_strided_slice %20 {offsets = [0, 0], sizes = [8, 32], strides = [1, 1]} : vector<32x32xbf16> to vector<8x32xbf16>
    %cst_135 = arith.constant dense<0.000000e+00> : vector<16x32xf32>
    %273 = tpu.matmul %271, %272, %cst_135 {dimension_numbers = #tpu.dot_dimension_numbers<[1], [0], [0], [1], [0, 0, 1, 1], [], []>} : vector<16x8xbf16>, vector<8x32xbf16>, vector<16x32xf32> -> vector<16x32xf32>
    %274 = arith.addf %250, %273 : vector<16x32xf32>
    %275 = vector.extract_strided_slice %247 {offsets = [0, 8], sizes = [16, 8], strides = [1, 1]} : vector<16x32xf32> to vector<16x8xf32>
    %276 = arith.truncf %275 : vector<16x8xf32> to vector<16x8xbf16>
    %277 = vector.extract_strided_slice %248 {offsets = [0, 8], sizes = [16, 8], strides = [1, 1]} : vector<16x32xf32> to vector<16x8xf32>
    %278 = arith.truncf %277 : vector<16x8xf32> to vector<16x8xbf16>
    %279 = vector.extract_strided_slice %249 {offsets = [0, 8], sizes = [16, 8], strides = [1, 1]} : vector<16x32xf32> to vector<16x8xf32>
    %280 = arith.truncf %279 : vector<16x8xf32> to vector<16x8xbf16>
    %281 = tpu.transpose %278, [1, 0] : vector<16x8xbf16> -> vector<8x16xbf16>
    %cst_136 = arith.constant dense<0.000000e+00> : vector<16x16xf32>
    %282 = tpu.matmul %276, %281, %cst_136 {dimension_numbers = #tpu.dot_dimension_numbers<[1], [0], [0], [1], [0, 0, 1, 1], [], []>} : vector<16x8xbf16>, vector<8x16xbf16>, vector<16x16xf32> -> vector<16x16xf32>
    %cst_137 = arith.constant dense<0xFF800000> : vector<16xf32>
    %283 = vector.multi_reduction <maximumf>, %282, %cst_137 [1] : vector<16x16xf32> to vector<16xf32>
    %284 = vector.shape_cast %283 : vector<16xf32> to vector<16x1xf32>
    %285 = vector.broadcast %284 : vector<16x1xf32> to vector<16x16xf32>
    %286 = arith.subf %282, %285 : vector<16x16xf32>
    %287 = math.exp %286 : vector<16x16xf32>
    %cst_138 = arith.constant dense<0.000000e+00> : vector<16xf32>
    %288 = vector.multi_reduction <add>, %287, %cst_138 [1] : vector<16x16xf32> to vector<16xf32>
    %289 = vector.shape_cast %288 : vector<16xf32> to vector<16x1xf32>
    %290 = tpu.reciprocal %289 {approx = true} : vector<16x1xf32> -> vector<16x1xf32>
    %291 = vector.broadcast %290 : vector<16x1xf32> to vector<16x16xf32>
    %292 = arith.mulf %287, %291 : vector<16x16xf32>
    %293 = arith.truncf %292 : vector<16x16xf32> to vector<16x16xbf16>
    %cst_139 = arith.constant dense<0.000000e+00> : vector<16x8xf32>
    %294 = tpu.matmul %293, %280, %cst_139 {dimension_numbers = #tpu.dot_dimension_numbers<[1], [0], [0], [1], [0, 0, 1, 1], [], []>} : vector<16x16xbf16>, vector<16x8xbf16>, vector<16x8xf32> -> vector<16x8xf32>
    %295 = arith.truncf %294 : vector<16x8xf32> to vector<16x8xbf16>
    %296 = vector.extract_strided_slice %20 {offsets = [8, 0], sizes = [8, 32], strides = [1, 1]} : vector<32x32xbf16> to vector<8x32xbf16>
    %cst_140 = arith.constant dense<0.000000e+00> : vector<16x32xf32>
    %297 = tpu.matmul %295, %296, %cst_140 {dimension_numbers = #tpu.dot_dimension_numbers<[1], [0], [0], [1], [0, 0, 1, 1], [], []>} : vector<16x8xbf16>, vector<8x32xbf16>, vector<16x32xf32> -> vector<16x32xf32>
    %298 = arith.addf %274, %297 : vector<16x32xf32>
    %299 = vector.extract_strided_slice %247 {offsets = [0, 16], sizes = [16, 8], strides = [1, 1]} : vector<16x32xf32> to vector<16x8xf32>
    %300 = arith.truncf %299 : vector<16x8xf32> to vector<16x8xbf16>
    %301 = vector.extract_strided_slice %248 {offsets = [0, 16], sizes = [16, 8], strides = [1, 1]} : vector<16x32xf32> to vector<16x8xf32>
    %302 = arith.truncf %301 : vector<16x8xf32> to vector<16x8xbf16>
    %303 = vector.extract_strided_slice %249 {offsets = [0, 16], sizes = [16, 8], strides = [1, 1]} : vector<16x32xf32> to vector<16x8xf32>
    %304 = arith.truncf %303 : vector<16x8xf32> to vector<16x8xbf16>
    %305 = tpu.transpose %302, [1, 0] : vector<16x8xbf16> -> vector<8x16xbf16>
    %cst_141 = arith.constant dense<0.000000e+00> : vector<16x16xf32>
    %306 = tpu.matmul %300, %305, %cst_141 {dimension_numbers = #tpu.dot_dimension_numbers<[1], [0], [0], [1], [0, 0, 1, 1], [], []>} : vector<16x8xbf16>, vector<8x16xbf16>, vector<16x16xf32> -> vector<16x16xf32>
    %cst_142 = arith.constant dense<0xFF800000> : vector<16xf32>
    %307 = vector.multi_reduction <maximumf>, %306, %cst_142 [1] : vector<16x16xf32> to vector<16xf32>
    %308 = vector.shape_cast %307 : vector<16xf32> to vector<16x1xf32>
    %309 = vector.broadcast %308 : vector<16x1xf32> to vector<16x16xf32>
    %310 = arith.subf %306, %309 : vector<16x16xf32>
    %311 = math.exp %310 : vector<16x16xf32>
    %cst_143 = arith.constant dense<0.000000e+00> : vector<16xf32>
    %312 = vector.multi_reduction <add>, %311, %cst_143 [1] : vector<16x16xf32> to vector<16xf32>
    %313 = vector.shape_cast %312 : vector<16xf32> to vector<16x1xf32>
    %314 = tpu.reciprocal %313 {approx = true} : vector<16x1xf32> -> vector<16x1xf32>
    %315 = vector.broadcast %314 : vector<16x1xf32> to vector<16x16xf32>
    %316 = arith.mulf %311, %315 : vector<16x16xf32>
    %317 = arith.truncf %316 : vector<16x16xf32> to vector<16x16xbf16>
    %cst_144 = arith.constant dense<0.000000e+00> : vector<16x8xf32>
    %318 = tpu.matmul %317, %304, %cst_144 {dimension_numbers = #tpu.dot_dimension_numbers<[1], [0], [0], [1], [0, 0, 1, 1], [], []>} : vector<16x16xbf16>, vector<16x8xbf16>, vector<16x8xf32> -> vector<16x8xf32>
    %319 = arith.truncf %318 : vector<16x8xf32> to vector<16x8xbf16>
    %320 = vector.extract_strided_slice %20 {offsets = [16, 0], sizes = [8, 32], strides = [1, 1]} : vector<32x32xbf16> to vector<8x32xbf16>
    %cst_145 = arith.constant dense<0.000000e+00> : vector<16x32xf32>
    %321 = tpu.matmul %319, %320, %cst_145 {dimension_numbers = #tpu.dot_dimension_numbers<[1], [0], [0], [1], [0, 0, 1, 1], [], []>} : vector<16x8xbf16>, vector<8x32xbf16>, vector<16x32xf32> -> vector<16x32xf32>
    %322 = arith.addf %298, %321 : vector<16x32xf32>
    %323 = vector.extract_strided_slice %247 {offsets = [0, 24], sizes = [16, 8], strides = [1, 1]} : vector<16x32xf32> to vector<16x8xf32>
    %324 = arith.truncf %323 : vector<16x8xf32> to vector<16x8xbf16>
    %325 = vector.extract_strided_slice %248 {offsets = [0, 24], sizes = [16, 8], strides = [1, 1]} : vector<16x32xf32> to vector<16x8xf32>
    %326 = arith.truncf %325 : vector<16x8xf32> to vector<16x8xbf16>
    %327 = vector.extract_strided_slice %249 {offsets = [0, 24], sizes = [16, 8], strides = [1, 1]} : vector<16x32xf32> to vector<16x8xf32>
    %328 = arith.truncf %327 : vector<16x8xf32> to vector<16x8xbf16>
    %329 = tpu.transpose %326, [1, 0] : vector<16x8xbf16> -> vector<8x16xbf16>
    %cst_146 = arith.constant dense<0.000000e+00> : vector<16x16xf32>
    %330 = tpu.matmul %324, %329, %cst_146 {dimension_numbers = #tpu.dot_dimension_numbers<[1], [0], [0], [1], [0, 0, 1, 1], [], []>} : vector<16x8xbf16>, vector<8x16xbf16>, vector<16x16xf32> -> vector<16x16xf32>
    %cst_147 = arith.constant dense<0xFF800000> : vector<16xf32>
    %331 = vector.multi_reduction <maximumf>, %330, %cst_147 [1] : vector<16x16xf32> to vector<16xf32>
    %332 = vector.shape_cast %331 : vector<16xf32> to vector<16x1xf32>
    %333 = vector.broadcast %332 : vector<16x1xf32> to vector<16x16xf32>
    %334 = arith.subf %330, %333 : vector<16x16xf32>
    %335 = math.exp %334 : vector<16x16xf32>
    %cst_148 = arith.constant dense<0.000000e+00> : vector<16xf32>
    %336 = vector.multi_reduction <add>, %335, %cst_148 [1] : vector<16x16xf32> to vector<16xf32>
    %337 = vector.shape_cast %336 : vector<16xf32> to vector<16x1xf32>
    %338 = tpu.reciprocal %337 {approx = true} : vector<16x1xf32> -> vector<16x1xf32>
    %339 = vector.broadcast %338 : vector<16x1xf32> to vector<16x16xf32>
    %340 = arith.mulf %335, %339 : vector<16x16xf32>
    %341 = arith.truncf %340 : vector<16x16xf32> to vector<16x16xbf16>
    %cst_149 = arith.constant dense<0.000000e+00> : vector<16x8xf32>
    %342 = tpu.matmul %341, %328, %cst_149 {dimension_numbers = #tpu.dot_dimension_numbers<[1], [0], [0], [1], [0, 0, 1, 1], [], []>} : vector<16x16xbf16>, vector<16x8xbf16>, vector<16x8xf32> -> vector<16x8xf32>
    %343 = arith.truncf %342 : vector<16x8xf32> to vector<16x8xbf16>
    %344 = vector.extract_strided_slice %20 {offsets = [24, 0], sizes = [8, 32], strides = [1, 1]} : vector<32x32xbf16> to vector<8x32xbf16>
    %cst_150 = arith.constant dense<0.000000e+00> : vector<16x32xf32>
    %345 = tpu.matmul %343, %344, %cst_150 {dimension_numbers = #tpu.dot_dimension_numbers<[1], [0], [0], [1], [0, 0, 1, 1], [], []>} : vector<16x8xbf16>, vector<8x32xbf16>, vector<16x32xf32> -> vector<16x32xf32>
    %346 = arith.addf %322, %345 : vector<16x32xf32>
    %347 = vector.broadcast %21 : vector<1x32xf32> to vector<16x32xf32>
    %348 = arith.addf %346, %347 : vector<16x32xf32>
    %349 = arith.addf %242, %348 : vector<16x32xf32>
    %cst_151 = arith.constant dense<0.000000e+00> : vector<16xf32>
    %350 = vector.multi_reduction <add>, %349, %cst_151 [1] : vector<16x32xf32> to vector<16xf32>
    %351 = vector.shape_cast %350 : vector<16xf32> to vector<16x1xf32>
    %cst_152 = arith.constant 3.200000e+01 : f32
    %352 = vector.broadcast %cst_152 : f32 to vector<16x1xf32>
    %353 = arith.divf %351, %352 : vector<16x1xf32>
    %354 = vector.broadcast %353 : vector<16x1xf32> to vector<16x32xf32>
    %355 = arith.subf %349, %354 : vector<16x32xf32>
    %356 = arith.mulf %355, %355 : vector<16x32xf32>
    %cst_153 = arith.constant dense<0.000000e+00> : vector<16xf32>
    %357 = vector.multi_reduction <add>, %356, %cst_153 [1] : vector<16x32xf32> to vector<16xf32>
    %358 = vector.shape_cast %357 : vector<16xf32> to vector<16x1xf32>
    %cst_154 = arith.constant 3.200000e+01 : f32
    %359 = vector.broadcast %cst_154 : f32 to vector<16x1xf32>
    %360 = arith.divf %358, %359 : vector<16x1xf32>
    %361 = vector.broadcast %353 : vector<16x1xf32> to vector<16x32xf32>
    %362 = arith.subf %349, %361 : vector<16x32xf32>
    %cst_155 = arith.constant 9.99999974E-6 : f32
    %363 = vector.broadcast %cst_155 : f32 to vector<16x1xf32>
    %364 = arith.addf %360, %363 : vector<16x1xf32>
    %365 = math.rsqrt %364 : vector<16x1xf32>
    %366 = vector.broadcast %365 : vector<16x1xf32> to vector<16x32xf32>
    %367 = arith.mulf %362, %366 : vector<16x32xf32>
    %368 = vector.broadcast %22 : vector<1x32xf32> to vector<16x32xf32>
    %369 = arith.mulf %367, %368 : vector<16x32xf32>
    %370 = vector.broadcast %23 : vector<1x32xf32> to vector<16x32xf32>
    %371 = arith.addf %369, %370 : vector<16x32xf32>
    %372 = arith.truncf %371 : vector<16x32xf32> to vector<16x32xbf16>
    %cst_156 = arith.constant dense<0.000000e+00> : vector<16x1024xf32>
    %373 = tpu.matmul %372, %24, %cst_156 {dimension_numbers = #tpu.dot_dimension_numbers<[1], [0], [0], [1], [0, 0, 1, 1], [], []>} : vector<16x32xbf16>, vector<32x1024xbf16>, vector<16x1024xf32> -> vector<16x1024xf32>
    %374 = vector.broadcast %25 : vector<1x1024xf32> to vector<16x1024xf32>
    %375 = arith.addf %373, %374 : vector<16x1024xf32>
    %cst_157 = arith.constant 5.000000e-01 : f32
    %376 = vector.broadcast %cst_157 : f32 to vector<16x1024xf32>
    %377 = arith.mulf %376, %375 : vector<16x1024xf32>
    %cst_158 = arith.constant 0.707106769 : f32
    %378 = vector.broadcast %cst_158 : f32 to vector<16x1024xf32>
    %379 = arith.mulf %375, %378 : vector<16x1024xf32>
    %380 = math.erf %379 : vector<16x1024xf32>
    %cst_159 = arith.constant 1.000000e+00 : f32
    %381 = vector.broadcast %cst_159 : f32 to vector<16x1024xf32>
    %382 = arith.addf %381, %380 : vector<16x1024xf32>
    %383 = arith.mulf %377, %382 : vector<16x1024xf32>
    %384 = arith.truncf %383 : vector<16x1024xf32> to vector<16x1024xbf16>
    %cst_160 = arith.constant dense<0.000000e+00> : vector<16x32xf32>
    %385 = tpu.matmul %384, %26, %cst_160 {dimension_numbers = #tpu.dot_dimension_numbers<[1], [0], [0], [1], [0, 0, 1, 1], [], []>} : vector<16x1024xbf16>, vector<1024x32xbf16>, vector<16x32xf32> -> vector<16x32xf32>
    %386 = vector.broadcast %27 : vector<1x32xf32> to vector<16x32xf32>
    %387 = arith.addf %385, %386 : vector<16x32xf32>
    %388 = arith.addf %371, %387 : vector<16x32xf32>
    %389 = arith.truncf %388 : vector<16x32xf32> to vector<16x32xbf16>
    %cst_161 = arith.constant dense<0.000000e+00> : vector<16x32xf32>
    %390 = tpu.matmul %389, %28, %cst_161 {dimension_numbers = #tpu.dot_dimension_numbers<[1], [0], [0], [1], [0, 0, 1, 1], [], []>} : vector<16x32xbf16>, vector<32x32xbf16>, vector<16x32xf32> -> vector<16x32xf32>
    %391 = vector.broadcast %29 : vector<1x32xf32> to vector<16x32xf32>
    %392 = arith.addf %390, %391 : vector<16x32xf32>
    %cst_162 = arith.constant dense<0.000000e+00> : vector<16xf32>
    %393 = vector.multi_reduction <add>, %392, %cst_162 [1] : vector<16x32xf32> to vector<16xf32>
    %394 = vector.shape_cast %393 : vector<16xf32> to vector<16x1xf32>
    %cst_163 = arith.constant 3.200000e+01 : f32
    %395 = vector.broadcast %cst_163 : f32 to vector<16x1xf32>
    %396 = arith.divf %394, %395 : vector<16x1xf32>
    %397 = vector.broadcast %396 : vector<16x1xf32> to vector<16x32xf32>
    %398 = arith.subf %392, %397 : vector<16x32xf32>
    %399 = arith.mulf %398, %398 : vector<16x32xf32>
    %cst_164 = arith.constant dense<0.000000e+00> : vector<16xf32>
    %400 = vector.multi_reduction <add>, %399, %cst_164 [1] : vector<16x32xf32> to vector<16xf32>
    %401 = vector.shape_cast %400 : vector<16xf32> to vector<16x1xf32>
    %cst_165 = arith.constant 3.200000e+01 : f32
    %402 = vector.broadcast %cst_165 : f32 to vector<16x1xf32>
    %403 = arith.divf %401, %402 : vector<16x1xf32>
    %404 = vector.broadcast %396 : vector<16x1xf32> to vector<16x32xf32>
    %405 = arith.subf %392, %404 : vector<16x32xf32>
    %cst_166 = arith.constant 9.99999974E-6 : f32
    %406 = vector.broadcast %cst_166 : f32 to vector<16x1xf32>
    %407 = arith.addf %403, %406 : vector<16x1xf32>
    %408 = math.rsqrt %407 : vector<16x1xf32>
    %409 = vector.broadcast %408 : vector<16x1xf32> to vector<16x32xf32>
    %410 = arith.mulf %405, %409 : vector<16x32xf32>
    %411 = vector.broadcast %30 : vector<1x32xf32> to vector<16x32xf32>
    %412 = arith.mulf %410, %411 : vector<16x32xf32>
    %413 = vector.broadcast %31 : vector<1x32xf32> to vector<16x32xf32>
    %414 = arith.addf %412, %413 : vector<16x32xf32>
    %415 = arith.truncf %414 : vector<16x32xf32> to vector<16x32xbf16>
    %cst_167 = arith.constant dense<0.000000e+00> : vector<16x96xf32>
    %416 = tpu.matmul %415, %32, %cst_167 {dimension_numbers = #tpu.dot_dimension_numbers<[1], [0], [0], [1], [0, 0, 1, 1], [], []>} : vector<16x32xbf16>, vector<32x96xbf16>, vector<16x96xf32> -> vector<16x96xf32>
    %417 = vector.broadcast %33 : vector<1x96xf32> to vector<16x96xf32>
    %418 = arith.addf %416, %417 : vector<16x96xf32>
    %419 = vector.extract_strided_slice %418 {offsets = [0, 0], sizes = [16, 32], strides = [1, 1]} : vector<16x96xf32> to vector<16x32xf32>
    %420 = vector.extract_strided_slice %418 {offsets = [0, 32], sizes = [16, 32], strides = [1, 1]} : vector<16x96xf32> to vector<16x32xf32>
    %421 = vector.extract_strided_slice %418 {offsets = [0, 64], sizes = [16, 32], strides = [1, 1]} : vector<16x96xf32> to vector<16x32xf32>
    %cst_168 = arith.constant 0.000000e+00 : f32
    %422 = vector.broadcast %cst_168 : f32 to vector<16x32xf32>
    %423 = vector.extract_strided_slice %419 {offsets = [0, 0], sizes = [16, 8], strides = [1, 1]} : vector<16x32xf32> to vector<16x8xf32>
    %424 = arith.truncf %423 : vector<16x8xf32> to vector<16x8xbf16>
    %425 = vector.extract_strided_slice %420 {offsets = [0, 0], sizes = [16, 8], strides = [1, 1]} : vector<16x32xf32> to vector<16x8xf32>
    %426 = arith.truncf %425 : vector<16x8xf32> to vector<16x8xbf16>
    %427 = vector.extract_strided_slice %421 {offsets = [0, 0], sizes = [16, 8], strides = [1, 1]} : vector<16x32xf32> to vector<16x8xf32>
    %428 = arith.truncf %427 : vector<16x8xf32> to vector<16x8xbf16>
    %429 = tpu.transpose %426, [1, 0] : vector<16x8xbf16> -> vector<8x16xbf16>
    %cst_169 = arith.constant dense<0.000000e+00> : vector<16x16xf32>
    %430 = tpu.matmul %424, %429, %cst_169 {dimension_numbers = #tpu.dot_dimension_numbers<[1], [0], [0], [1], [0, 0, 1, 1], [], []>} : vector<16x8xbf16>, vector<8x16xbf16>, vector<16x16xf32> -> vector<16x16xf32>
    %cst_170 = arith.constant dense<0xFF800000> : vector<16xf32>
    %431 = vector.multi_reduction <maximumf>, %430, %cst_170 [1] : vector<16x16xf32> to vector<16xf32>
    %432 = vector.shape_cast %431 : vector<16xf32> to vector<16x1xf32>
    %433 = vector.broadcast %432 : vector<16x1xf32> to vector<16x16xf32>
    %434 = arith.subf %430, %433 : vector<16x16xf32>
    %435 = math.exp %434 : vector<16x16xf32>
    %cst_171 = arith.constant dense<0.000000e+00> : vector<16xf32>
    %436 = vector.multi_reduction <add>, %435, %cst_171 [1] : vector<16x16xf32> to vector<16xf32>
    %437 = vector.shape_cast %436 : vector<16xf32> to vector<16x1xf32>
    %438 = tpu.reciprocal %437 {approx = true} : vector<16x1xf32> -> vector<16x1xf32>
    %439 = vector.broadcast %438 : vector<16x1xf32> to vector<16x16xf32>
    %440 = arith.mulf %435, %439 : vector<16x16xf32>
    %441 = arith.truncf %440 : vector<16x16xf32> to vector<16x16xbf16>
    %cst_172 = arith.constant dense<0.000000e+00> : vector<16x8xf32>
    %442 = tpu.matmul %441, %428, %cst_172 {dimension_numbers = #tpu.dot_dimension_numbers<[1], [0], [0], [1], [0, 0, 1, 1], [], []>} : vector<16x16xbf16>, vector<16x8xbf16>, vector<16x8xf32> -> vector<16x8xf32>
    %443 = arith.truncf %442 : vector<16x8xf32> to vector<16x8xbf16>
    %444 = vector.extract_strided_slice %34 {offsets = [0, 0], sizes = [8, 32], strides = [1, 1]} : vector<32x32xbf16> to vector<8x32xbf16>
    %cst_173 = arith.constant dense<0.000000e+00> : vector<16x32xf32>
    %445 = tpu.matmul %443, %444, %cst_173 {dimension_numbers = #tpu.dot_dimension_numbers<[1], [0], [0], [1], [0, 0, 1, 1], [], []>} : vector<16x8xbf16>, vector<8x32xbf16>, vector<16x32xf32> -> vector<16x32xf32>
    %446 = arith.addf %422, %445 : vector<16x32xf32>
    %447 = vector.extract_strided_slice %419 {offsets = [0, 8], sizes = [16, 8], strides = [1, 1]} : vector<16x32xf32> to vector<16x8xf32>
    %448 = arith.truncf %447 : vector<16x8xf32> to vector<16x8xbf16>
    %449 = vector.extract_strided_slice %420 {offsets = [0, 8], sizes = [16, 8], strides = [1, 1]} : vector<16x32xf32> to vector<16x8xf32>
    %450 = arith.truncf %449 : vector<16x8xf32> to vector<16x8xbf16>
    %451 = vector.extract_strided_slice %421 {offsets = [0, 8], sizes = [16, 8], strides = [1, 1]} : vector<16x32xf32> to vector<16x8xf32>
    %452 = arith.truncf %451 : vector<16x8xf32> to vector<16x8xbf16>
    %453 = tpu.transpose %450, [1, 0] : vector<16x8xbf16> -> vector<8x16xbf16>
    %cst_174 = arith.constant dense<0.000000e+00> : vector<16x16xf32>
    %454 = tpu.matmul %448, %453, %cst_174 {dimension_numbers = #tpu.dot_dimension_numbers<[1], [0], [0], [1], [0, 0, 1, 1], [], []>} : vector<16x8xbf16>, vector<8x16xbf16>, vector<16x16xf32> -> vector<16x16xf32>
    %cst_175 = arith.constant dense<0xFF800000> : vector<16xf32>
    %455 = vector.multi_reduction <maximumf>, %454, %cst_175 [1] : vector<16x16xf32> to vector<16xf32>
    %456 = vector.shape_cast %455 : vector<16xf32> to vector<16x1xf32>
    %457 = vector.broadcast %456 : vector<16x1xf32> to vector<16x16xf32>
    %458 = arith.subf %454, %457 : vector<16x16xf32>
    %459 = math.exp %458 : vector<16x16xf32>
    %cst_176 = arith.constant dense<0.000000e+00> : vector<16xf32>
    %460 = vector.multi_reduction <add>, %459, %cst_176 [1] : vector<16x16xf32> to vector<16xf32>
    %461 = vector.shape_cast %460 : vector<16xf32> to vector<16x1xf32>
    %462 = tpu.reciprocal %461 {approx = true} : vector<16x1xf32> -> vector<16x1xf32>
    %463 = vector.broadcast %462 : vector<16x1xf32> to vector<16x16xf32>
    %464 = arith.mulf %459, %463 : vector<16x16xf32>
    %465 = arith.truncf %464 : vector<16x16xf32> to vector<16x16xbf16>
    %cst_177 = arith.constant dense<0.000000e+00> : vector<16x8xf32>
    %466 = tpu.matmul %465, %452, %cst_177 {dimension_numbers = #tpu.dot_dimension_numbers<[1], [0], [0], [1], [0, 0, 1, 1], [], []>} : vector<16x16xbf16>, vector<16x8xbf16>, vector<16x8xf32> -> vector<16x8xf32>
    %467 = arith.truncf %466 : vector<16x8xf32> to vector<16x8xbf16>
    %468 = vector.extract_strided_slice %34 {offsets = [8, 0], sizes = [8, 32], strides = [1, 1]} : vector<32x32xbf16> to vector<8x32xbf16>
    %cst_178 = arith.constant dense<0.000000e+00> : vector<16x32xf32>
    %469 = tpu.matmul %467, %468, %cst_178 {dimension_numbers = #tpu.dot_dimension_numbers<[1], [0], [0], [1], [0, 0, 1, 1], [], []>} : vector<16x8xbf16>, vector<8x32xbf16>, vector<16x32xf32> -> vector<16x32xf32>
    %470 = arith.addf %446, %469 : vector<16x32xf32>
    %471 = vector.extract_strided_slice %419 {offsets = [0, 16], sizes = [16, 8], strides = [1, 1]} : vector<16x32xf32> to vector<16x8xf32>
    %472 = arith.truncf %471 : vector<16x8xf32> to vector<16x8xbf16>
    %473 = vector.extract_strided_slice %420 {offsets = [0, 16], sizes = [16, 8], strides = [1, 1]} : vector<16x32xf32> to vector<16x8xf32>
    %474 = arith.truncf %473 : vector<16x8xf32> to vector<16x8xbf16>
    %475 = vector.extract_strided_slice %421 {offsets = [0, 16], sizes = [16, 8], strides = [1, 1]} : vector<16x32xf32> to vector<16x8xf32>
    %476 = arith.truncf %475 : vector<16x8xf32> to vector<16x8xbf16>
    %477 = tpu.transpose %474, [1, 0] : vector<16x8xbf16> -> vector<8x16xbf16>
    %cst_179 = arith.constant dense<0.000000e+00> : vector<16x16xf32>
    %478 = tpu.matmul %472, %477, %cst_179 {dimension_numbers = #tpu.dot_dimension_numbers<[1], [0], [0], [1], [0, 0, 1, 1], [], []>} : vector<16x8xbf16>, vector<8x16xbf16>, vector<16x16xf32> -> vector<16x16xf32>
    %cst_180 = arith.constant dense<0xFF800000> : vector<16xf32>
    %479 = vector.multi_reduction <maximumf>, %478, %cst_180 [1] : vector<16x16xf32> to vector<16xf32>
    %480 = vector.shape_cast %479 : vector<16xf32> to vector<16x1xf32>
    %481 = vector.broadcast %480 : vector<16x1xf32> to vector<16x16xf32>
    %482 = arith.subf %478, %481 : vector<16x16xf32>
    %483 = math.exp %482 : vector<16x16xf32>
    %cst_181 = arith.constant dense<0.000000e+00> : vector<16xf32>
    %484 = vector.multi_reduction <add>, %483, %cst_181 [1] : vector<16x16xf32> to vector<16xf32>
    %485 = vector.shape_cast %484 : vector<16xf32> to vector<16x1xf32>
    %486 = tpu.reciprocal %485 {approx = true} : vector<16x1xf32> -> vector<16x1xf32>
    %487 = vector.broadcast %486 : vector<16x1xf32> to vector<16x16xf32>
    %488 = arith.mulf %483, %487 : vector<16x16xf32>
    %489 = arith.truncf %488 : vector<16x16xf32> to vector<16x16xbf16>
    %cst_182 = arith.constant dense<0.000000e+00> : vector<16x8xf32>
    %490 = tpu.matmul %489, %476, %cst_182 {dimension_numbers = #tpu.dot_dimension_numbers<[1], [0], [0], [1], [0, 0, 1, 1], [], []>} : vector<16x16xbf16>, vector<16x8xbf16>, vector<16x8xf32> -> vector<16x8xf32>
    %491 = arith.truncf %490 : vector<16x8xf32> to vector<16x8xbf16>
    %492 = vector.extract_strided_slice %34 {offsets = [16, 0], sizes = [8, 32], strides = [1, 1]} : vector<32x32xbf16> to vector<8x32xbf16>
    %cst_183 = arith.constant dense<0.000000e+00> : vector<16x32xf32>
    %493 = tpu.matmul %491, %492, %cst_183 {dimension_numbers = #tpu.dot_dimension_numbers<[1], [0], [0], [1], [0, 0, 1, 1], [], []>} : vector<16x8xbf16>, vector<8x32xbf16>, vector<16x32xf32> -> vector<16x32xf32>
    %494 = arith.addf %470, %493 : vector<16x32xf32>
    %495 = vector.extract_strided_slice %419 {offsets = [0, 24], sizes = [16, 8], strides = [1, 1]} : vector<16x32xf32> to vector<16x8xf32>
    %496 = arith.truncf %495 : vector<16x8xf32> to vector<16x8xbf16>
    %497 = vector.extract_strided_slice %420 {offsets = [0, 24], sizes = [16, 8], strides = [1, 1]} : vector<16x32xf32> to vector<16x8xf32>
    %498 = arith.truncf %497 : vector<16x8xf32> to vector<16x8xbf16>
    %499 = vector.extract_strided_slice %421 {offsets = [0, 24], sizes = [16, 8], strides = [1, 1]} : vector<16x32xf32> to vector<16x8xf32>
    %500 = arith.truncf %499 : vector<16x8xf32> to vector<16x8xbf16>
    %501 = tpu.transpose %498, [1, 0] : vector<16x8xbf16> -> vector<8x16xbf16>
    %cst_184 = arith.constant dense<0.000000e+00> : vector<16x16xf32>
    %502 = tpu.matmul %496, %501, %cst_184 {dimension_numbers = #tpu.dot_dimension_numbers<[1], [0], [0], [1], [0, 0, 1, 1], [], []>} : vector<16x8xbf16>, vector<8x16xbf16>, vector<16x16xf32> -> vector<16x16xf32>
    %cst_185 = arith.constant dense<0xFF800000> : vector<16xf32>
    %503 = vector.multi_reduction <maximumf>, %502, %cst_185 [1] : vector<16x16xf32> to vector<16xf32>
    %504 = vector.shape_cast %503 : vector<16xf32> to vector<16x1xf32>
    %505 = vector.broadcast %504 : vector<16x1xf32> to vector<16x16xf32>
    %506 = arith.subf %502, %505 : vector<16x16xf32>
    %507 = math.exp %506 : vector<16x16xf32>
    %cst_186 = arith.constant dense<0.000000e+00> : vector<16xf32>
    %508 = vector.multi_reduction <add>, %507, %cst_186 [1] : vector<16x16xf32> to vector<16xf32>
    %509 = vector.shape_cast %508 : vector<16xf32> to vector<16x1xf32>
    %510 = tpu.reciprocal %509 {approx = true} : vector<16x1xf32> -> vector<16x1xf32>
    %511 = vector.broadcast %510 : vector<16x1xf32> to vector<16x16xf32>
    %512 = arith.mulf %507, %511 : vector<16x16xf32>
    %513 = arith.truncf %512 : vector<16x16xf32> to vector<16x16xbf16>
    %cst_187 = arith.constant dense<0.000000e+00> : vector<16x8xf32>
    %514 = tpu.matmul %513, %500, %cst_187 {dimension_numbers = #tpu.dot_dimension_numbers<[1], [0], [0], [1], [0, 0, 1, 1], [], []>} : vector<16x16xbf16>, vector<16x8xbf16>, vector<16x8xf32> -> vector<16x8xf32>
    %515 = arith.truncf %514 : vector<16x8xf32> to vector<16x8xbf16>
    %516 = vector.extract_strided_slice %34 {offsets = [24, 0], sizes = [8, 32], strides = [1, 1]} : vector<32x32xbf16> to vector<8x32xbf16>
    %cst_188 = arith.constant dense<0.000000e+00> : vector<16x32xf32>
    %517 = tpu.matmul %515, %516, %cst_188 {dimension_numbers = #tpu.dot_dimension_numbers<[1], [0], [0], [1], [0, 0, 1, 1], [], []>} : vector<16x8xbf16>, vector<8x32xbf16>, vector<16x32xf32> -> vector<16x32xf32>
    %518 = arith.addf %494, %517 : vector<16x32xf32>
    %519 = vector.broadcast %35 : vector<1x32xf32> to vector<16x32xf32>
    %520 = arith.addf %518, %519 : vector<16x32xf32>
    %521 = arith.addf %414, %520 : vector<16x32xf32>
    %cst_189 = arith.constant dense<0.000000e+00> : vector<16xf32>
    %522 = vector.multi_reduction <add>, %521, %cst_189 [1] : vector<16x32xf32> to vector<16xf32>
    %523 = vector.shape_cast %522 : vector<16xf32> to vector<16x1xf32>
    %cst_190 = arith.constant 3.200000e+01 : f32
    %524 = vector.broadcast %cst_190 : f32 to vector<16x1xf32>
    %525 = arith.divf %523, %524 : vector<16x1xf32>
    %526 = vector.broadcast %525 : vector<16x1xf32> to vector<16x32xf32>
    %527 = arith.subf %521, %526 : vector<16x32xf32>
    %528 = arith.mulf %527, %527 : vector<16x32xf32>
    %cst_191 = arith.constant dense<0.000000e+00> : vector<16xf32>
    %529 = vector.multi_reduction <add>, %528, %cst_191 [1] : vector<16x32xf32> to vector<16xf32>
    %530 = vector.shape_cast %529 : vector<16xf32> to vector<16x1xf32>
    %cst_192 = arith.constant 3.200000e+01 : f32
    %531 = vector.broadcast %cst_192 : f32 to vector<16x1xf32>
    %532 = arith.divf %530, %531 : vector<16x1xf32>
    %533 = vector.broadcast %525 : vector<16x1xf32> to vector<16x32xf32>
    %534 = arith.subf %521, %533 : vector<16x32xf32>
    %cst_193 = arith.constant 9.99999974E-6 : f32
    %535 = vector.broadcast %cst_193 : f32 to vector<16x1xf32>
    %536 = arith.addf %532, %535 : vector<16x1xf32>
    %537 = math.rsqrt %536 : vector<16x1xf32>
    %538 = vector.broadcast %537 : vector<16x1xf32> to vector<16x32xf32>
    %539 = arith.mulf %534, %538 : vector<16x32xf32>
    %540 = vector.broadcast %36 : vector<1x32xf32> to vector<16x32xf32>
    %541 = arith.mulf %539, %540 : vector<16x32xf32>
    %542 = vector.broadcast %37 : vector<1x32xf32> to vector<16x32xf32>
    %543 = arith.addf %541, %542 : vector<16x32xf32>
    %544 = arith.truncf %543 : vector<16x32xf32> to vector<16x32xbf16>
    %cst_194 = arith.constant dense<0.000000e+00> : vector<16x1024xf32>
    %545 = tpu.matmul %544, %38, %cst_194 {dimension_numbers = #tpu.dot_dimension_numbers<[1], [0], [0], [1], [0, 0, 1, 1], [], []>} : vector<16x32xbf16>, vector<32x1024xbf16>, vector<16x1024xf32> -> vector<16x1024xf32>
    %546 = vector.broadcast %39 : vector<1x1024xf32> to vector<16x1024xf32>
    %547 = arith.addf %545, %546 : vector<16x1024xf32>
    %cst_195 = arith.constant 5.000000e-01 : f32
    %548 = vector.broadcast %cst_195 : f32 to vector<16x1024xf32>
    %549 = arith.mulf %548, %547 : vector<16x1024xf32>
    %cst_196 = arith.constant 0.707106769 : f32
    %550 = vector.broadcast %cst_196 : f32 to vector<16x1024xf32>
    %551 = arith.mulf %547, %550 : vector<16x1024xf32>
    %552 = math.erf %551 : vector<16x1024xf32>
    %cst_197 = arith.constant 1.000000e+00 : f32
    %553 = vector.broadcast %cst_197 : f32 to vector<16x1024xf32>
    %554 = arith.addf %553, %552 : vector<16x1024xf32>
    %555 = arith.mulf %549, %554 : vector<16x1024xf32>
    %556 = arith.truncf %555 : vector<16x1024xf32> to vector<16x1024xbf16>
    %cst_198 = arith.constant dense<0.000000e+00> : vector<16x32xf32>
    %557 = tpu.matmul %556, %40, %cst_198 {dimension_numbers = #tpu.dot_dimension_numbers<[1], [0], [0], [1], [0, 0, 1, 1], [], []>} : vector<16x1024xbf16>, vector<1024x32xbf16>, vector<16x32xf32> -> vector<16x32xf32>
    %558 = vector.broadcast %41 : vector<1x32xf32> to vector<16x32xf32>
    %559 = arith.addf %557, %558 : vector<16x32xf32>
    %560 = arith.addf %543, %559 : vector<16x32xf32>
    %561 = tpu.transpose %560, [1, 0] : vector<16x32xf32> -> vector<32x16xf32>
    %cst_199 = arith.constant dense<0xFF800000> : vector<32xf32>
    %562 = vector.multi_reduction <maximumf>, %561, %cst_199 [1] : vector<32x16xf32> to vector<32xf32>
    %563 = vector.shape_cast %562 : vector<32xf32> to vector<32x1xf32>
    %564 = vector.broadcast %563 : vector<32x1xf32> to vector<32x16xf32>
    %565 = arith.subf %561, %564 : vector<32x16xf32>
    %566 = math.exp %565 : vector<32x16xf32>
    %cst_200 = arith.constant dense<0.000000e+00> : vector<32xf32>
    %567 = vector.multi_reduction <add>, %566, %cst_200 [1] : vector<32x16xf32> to vector<32xf32>
    %568 = vector.shape_cast %567 : vector<32xf32> to vector<32x1xf32>
    %569 = vector.broadcast %568 : vector<32x1xf32> to vector<32x16xf32>
    %570 = arith.divf %566, %569 : vector<32x16xf32>
    %c0_201 = arith.constant 0 : index
    %c0_202 = arith.constant 0 : index
    %c0_203 = arith.constant 0 : index
    %571 = vector.load %arg44[%c0_201, %c0_202, %c0_203] : memref<1x32x16xf32, #tpu.memory_space<vmem>>, vector<1x32x16xf32>
    %572 = vector.shape_cast %571 : vector<1x32x16xf32> to vector<32x16xf32>
    %573 = vector.shape_cast %570 : vector<32x16xf32> to vector<1x32x16xf32>
    tpu.vector_store %arg44[%c0_201, %c0_202, %c0_203], %573 {strides = array<i32>} : memref<1x32x16xf32, #tpu.memory_space<vmem>>, vector<1x32x16xf32>,
    return
  }
  func.func @transform_0(%arg0: i32) -> (i32, i32, i32) {
    %c0_i32 = arith.constant 0 : i32
    %c0_i32_0 = arith.constant 0 : i32
    %c0_i32_1 = arith.constant 0 : i32
    return %arg0, %c0_i32, %c0_i32_0 : i32, i32, i32
  }
  func.func @transform_1(%arg0: i32) -> (i32, i32) {
    %c0_i32 = arith.constant 0 : i32
    %c0_i32_0 = arith.constant 0 : i32
    %c0_i32_1 = arith.constant 0 : i32
    return %c0_i32, %c0_i32_0 : i32, i32
  }
  func.func @transform_2(%arg0: i32) -> (i32, i32) {
    %c0_i32 = arith.constant 0 : i32
    %c0_i32_0 = arith.constant 0 : i32
    %c0_i32_1 = arith.constant 0 : i32
    return %c0_i32, %c0_i32_0 : i32, i32
  }
  func.func @transform_3(%arg0: i32) -> (i32, i32) {
    %c0_i32 = arith.constant 0 : i32
    %c0_i32_0 = arith.constant 0 : i32
    %c0_i32_1 = arith.constant 0 : i32
    return %c0_i32, %c0_i32_0 : i32, i32
  }
  func.func @transform_4(%arg0: i32) -> (i32, i32) {
    %c0_i32 = arith.constant 0 : i32
    %c0_i32_0 = arith.constant 0 : i32
    %c0_i32_1 = arith.constant 0 : i32
    return %c0_i32, %c0_i32_0 : i32, i32
  }
  func.func @transform_5(%arg0: i32) -> (i32, i32) {
    %c0_i32 = arith.constant 0 : i32
    %c0_i32_0 = arith.constant 0 : i32
    %c0_i32_1 = arith.constant 0 : i32
    return %c0_i32, %c0_i32_0 : i32, i32
  }
  func.func @transform_6(%arg0: i32) -> (i32, i32) {
    %c0_i32 = arith.constant 0 : i32
    %c0_i32_0 = arith.constant 0 : i32
    %c0_i32_1 = arith.constant 0 : i32
    return %c0_i32, %c0_i32_0 : i32, i32
  }
  func.func @transform_7(%arg0: i32) -> (i32, i32) {
    %c0_i32 = arith.constant 0 : i32
    %c0_i32_0 = arith.constant 0 : i32
    %c0_i32_1 = arith.constant 0 : i32
    return %c0_i32, %c0_i32_0 : i32, i32
  }
  func.func @transform_8(%arg0: i32) -> (i32, i32) {
    %c0_i32 = arith.constant 0 : i32
    %c0_i32_0 = arith.constant 0 : i32
    %c0_i32_1 = arith.constant 0 : i32
    return %c0_i32, %c0_i32_0 : i32, i32
  }
  func.func @transform_9(%arg0: i32) -> (i32, i32) {
    %c0_i32 = arith.constant 0 : i32
    %c0_i32_0 = arith.constant 0 : i32
    %c0_i32_1 = arith.constant 0 : i32
    return %c0_i32, %c0_i32_0 : i32, i32
  }
  func.func @transform_10(%arg0: i32) -> (i32, i32) {
    %c0_i32 = arith.constant 0 : i32
    %c0_i32_0 = arith.constant 0 : i32
    %c0_i32_1 = arith.constant 0 : i32
    return %c0_i32, %c0_i32_0 : i32, i32
  }
  func.func @transform_11(%arg0: i32) -> (i32, i32) {
    %c0_i32 = arith.constant 0 : i32
    %c0_i32_0 = arith.constant 0 : i32
    %c0_i32_1 = arith.constant 0 : i32
    return %c0_i32, %c0_i32_0 : i32, i32
  }
  func.func @transform_12(%arg0: i32) -> (i32, i32) {
    %c0_i32 = arith.constant 0 : i32
    %c0_i32_0 = arith.constant 0 : i32
    %c0_i32_1 = arith.constant 0 : i32
    return %c0_i32, %c0_i32_0 : i32, i32
  }
  func.func @transform_13(%arg0: i32) -> (i32, i32) {
    %c0_i32 = arith.constant 0 : i32
    %c0_i32_0 = arith.constant 0 : i32
    %c0_i32_1 = arith.constant 0 : i32
    return %c0_i32, %c0_i32_0 : i32, i32
  }
  func.func @transform_14(%arg0: i32) -> (i32, i32) {
    %c0_i32 = arith.constant 0 : i32
    %c0_i32_0 = arith.constant 0 : i32
    %c0_i32_1 = arith.constant 0 : i32
    return %c0_i32, %c0_i32_0 : i32, i32
  }
  func.func @transform_15(%arg0: i32) -> (i32, i32) {
    %c0_i32 = arith.constant 0 : i32
    %c0_i32_0 = arith.constant 0 : i32
    %c0_i32_1 = arith.constant 0 : i32
    return %c0_i32, %c0_i32_0 : i32, i32
  }
  func.func @transform_16(%arg0: i32) -> (i32, i32) {
    %c0_i32 = arith.constant 0 : i32
    %c0_i32_0 = arith.constant 0 : i32
    %c0_i32_1 = arith.constant 0 : i32
    return %c0_i32, %c0_i32_0 : i32, i32
  }
  func.func @transform_17(%arg0: i32) -> (i32, i32) {
    %c0_i32 = arith.constant 0 : i32
    %c0_i32_0 = arith.constant 0 : i32
    %c0_i32_1 = arith.constant 0 : i32
    return %c0_i32, %c0_i32_0 : i32, i32
  }
  func.func @transform_18(%arg0: i32) -> (i32, i32) {
    %c0_i32 = arith.constant 0 : i32
    %c0_i32_0 = arith.constant 0 : i32
    %c0_i32_1 = arith.constant 0 : i32
    return %c0_i32, %c0_i32_0 : i32, i32
  }
  func.func @transform_19(%arg0: i32) -> (i32, i32) {
    %c0_i32 = arith.constant 0 : i32
    %c0_i32_0 = arith.constant 0 : i32
    %c0_i32_1 = arith.constant 0 : i32
    return %c0_i32, %c0_i32_0 : i32, i32
  }
  func.func @transform_20(%arg0: i32) -> (i32, i32) {
    %c0_i32 = arith.constant 0 : i32
    %c0_i32_0 = arith.constant 0 : i32
    %c0_i32_1 = arith.constant 0 : i32
    return %c0_i32, %c0_i32_0 : i32, i32
  }
  func.func @transform_21(%arg0: i32) -> (i32, i32) {
    %c0_i32 = arith.constant 0 : i32
    %c0_i32_0 = arith.constant 0 : i32
    %c0_i32_1 = arith.constant 0 : i32
    return %c0_i32, %c0_i32_0 : i32, i32
  }
  func.func @transform_22(%arg0: i32) -> (i32, i32) {
    %c0_i32 = arith.constant 0 : i32
    %c0_i32_0 = arith.constant 0 : i32
    %c0_i32_1 = arith.constant 0 : i32
    return %c0_i32, %c0_i32_0 : i32, i32
  }
  func.func @transform_23(%arg0: i32) -> (i32, i32) {
    %c0_i32 = arith.constant 0 : i32
    %c0_i32_0 = arith.constant 0 : i32
    %c0_i32_1 = arith.constant 0 : i32
    return %c0_i32, %c0_i32_0 : i32, i32
  }
  func.func @transform_24(%arg0: i32) -> (i32, i32) {
    %c0_i32 = arith.constant 0 : i32
    %c0_i32_0 = arith.constant 0 : i32
    %c0_i32_1 = arith.constant 0 : i32
    return %c0_i32, %c0_i32_0 : i32, i32
  }
  func.func @transform_25(%arg0: i32) -> (i32, i32) {
    %c0_i32 = arith.constant 0 : i32
    %c0_i32_0 = arith.constant 0 : i32
    %c0_i32_1 = arith.constant 0 : i32
    return %c0_i32, %c0_i32_0 : i32, i32
  }
  func.func @transform_26(%arg0: i32) -> (i32, i32) {
    %c0_i32 = arith.constant 0 : i32
    %c0_i32_0 = arith.constant 0 : i32
    %c0_i32_1 = arith.constant 0 : i32
    return %c0_i32, %c0_i32_0 : i32, i32
  }
  func.func @transform_27(%arg0: i32) -> (i32, i32) {
    %c0_i32 = arith.constant 0 : i32
    %c0_i32_0 = arith.constant 0 : i32
    %c0_i32_1 = arith.constant 0 : i32
    return %c0_i32, %c0_i32_0 : i32, i32
  }
  func.func @transform_28(%arg0: i32) -> (i32, i32) {
    %c0_i32 = arith.constant 0 : i32
    %c0_i32_0 = arith.constant 0 : i32
    %c0_i32_1 = arith.constant 0 : i32
    return %c0_i32, %c0_i32_0 : i32, i32
  }
  func.func @transform_29(%arg0: i32) -> (i32, i32) {
    %c0_i32 = arith.constant 0 : i32
    %c0_i32_0 = arith.constant 0 : i32
    %c0_i32_1 = arith.constant 0 : i32
    return %c0_i32, %c0_i32_0 : i32, i32
  }
  func.func @transform_30(%arg0: i32) -> (i32, i32) {
    %c0_i32 = arith.constant 0 : i32
    %c0_i32_0 = arith.constant 0 : i32
    %c0_i32_1 = arith.constant 0 : i32
    return %c0_i32, %c0_i32_0 : i32, i32
  }
  func.func @transform_31(%arg0: i32) -> (i32, i32) {
    %c0_i32 = arith.constant 0 : i32
    %c0_i32_0 = arith.constant 0 : i32
    %c0_i32_1 = arith.constant 0 : i32
    return %c0_i32, %c0_i32_0 : i32, i32
  }
  func.func @transform_32(%arg0: i32) -> (i32, i32) {
    %c0_i32 = arith.constant 0 : i32
    %c0_i32_0 = arith.constant 0 : i32
    %c0_i32_1 = arith.constant 0 : i32
    return %c0_i32, %c0_i32_0 : i32, i32
  }
  func.func @transform_33(%arg0: i32) -> (i32, i32) {
    %c0_i32 = arith.constant 0 : i32
    %c0_i32_0 = arith.constant 0 : i32
    %c0_i32_1 = arith.constant 0 : i32
    return %c0_i32, %c0_i32_0 : i32, i32
  }
  func.func @transform_34(%arg0: i32) -> (i32, i32) {
    %c0_i32 = arith.constant 0 : i32
    %c0_i32_0 = arith.constant 0 : i32
    %c0_i32_1 = arith.constant 0 : i32
    return %c0_i32, %c0_i32_0 : i32, i32
  }
  func.func @transform_35(%arg0: i32) -> (i32, i32) {
    %c0_i32 = arith.constant 0 : i32
    %c0_i32_0 = arith.constant 0 : i32
    %c0_i32_1 = arith.constant 0 : i32
    return %c0_i32, %c0_i32_0 : i32, i32
  }
  func.func @transform_36(%arg0: i32) -> (i32, i32) {
    %c0_i32 = arith.constant 0 : i32
    %c0_i32_0 = arith.constant 0 : i32
    %c0_i32_1 = arith.constant 0 : i32
    return %c0_i32, %c0_i32_0 : i32, i32
  }
  func.func @transform_37(%arg0: i32) -> (i32, i32) {
    %c0_i32 = arith.constant 0 : i32
    %c0_i32_0 = arith.constant 0 : i32
    %c0_i32_1 = arith.constant 0 : i32
    return %c0_i32, %c0_i32_0 : i32, i32
  }
  func.func @transform_38(%arg0: i32) -> (i32, i32) {
    %c0_i32 = arith.constant 0 : i32
    %c0_i32_0 = arith.constant 0 : i32
    %c0_i32_1 = arith.constant 0 : i32
    return %c0_i32, %c0_i32_0 : i32, i32
  }
  func.func @transform_39(%arg0: i32) -> (i32, i32) {
    %c0_i32 = arith.constant 0 : i32
    %c0_i32_0 = arith.constant 0 : i32
    %c0_i32_1 = arith.constant 0 : i32
    return %c0_i32, %c0_i32_0 : i32, i32
  }
  func.func @transform_40(%arg0: i32) -> (i32, i32) {
    %c0_i32 = arith.constant 0 : i32
    %c0_i32_0 = arith.constant 0 : i32
    %c0_i32_1 = arith.constant 0 : i32
    return %c0_i32, %c0_i32_0 : i32, i32
  }
  func.func @transform_41(%arg0: i32) -> (i32, i32) {
    %c0_i32 = arith.constant 0 : i32
    %c0_i32_0 = arith.constant 0 : i32
    %c0_i32_1 = arith.constant 0 : i32
    return %c0_i32, %c0_i32_0 : i32, i32
  }
  func.func @transform_42(%arg0: i32) -> (i32, i32) {
    %c0_i32 = arith.constant 0 : i32
    %c0_i32_0 = arith.constant 0 : i32
    %c0_i32_1 = arith.constant 0 : i32
    return %c0_i32, %c0_i32_0 : i32, i32
  }
  func.func @transform_43(%arg0: i32) -> (i32, i32, i32) {
    %c0_i32 = arith.constant 0 : i32
    %c0_i32_0 = arith.constant 0 : i32
    %c0_i32_1 = arith.constant 0 : i32
    return %arg0, %c0_i32, %c0_i32_0 : i32, i32, i32
  }
}

</mosaic_0001>

<bundles_post_ra>
// kernel: tpu_custom_call.1
= control target key start
LH: loop header
LB: loop body
LE: loop exit
PB: predicated region body
PF: predicated region fallthrough
CT: control target
= control target key end

     0   :  { %s9121_s6 = smov 1   ;;  %s9122_s10 = smov 2   ;;  %s10415_s0 = inlined_call_operand.smem [shape: u32[44], index: -1, kind: input, shape index: {}] }
   0x1   :  { %s9188_s5 = sld [smem:[%s10415_s0]]   ;;  %s9123_s14 = smov 3  }
   0x2   :  { %s9193_s9 = sld [smem:[%s10415_s0 + %s9121_s6]]   ;;  %s9124_s18 = smov 4  }
   0x3   :  { %s9198_s13 = sld [smem:[%s10415_s0 + %s9122_s10]]   ;;  %s9125_s22 = smov 5  }
   0x4   :  { %s9203_s17 = sld [smem:[%s10415_s0 + %s9123_s14]]   ;;  %s9126_s26 = smov 6  }
   0x5   :  { %s9208_s21 = sld [smem:[%s10415_s0 + %s9124_s18]]   ;;  %s9127_s30 = smov 7  }
   0x6   :  { %s9213_s25 = sld [smem:[%s10415_s0 + %s9125_s22]]   ;;  %s9128_s4 = smov 8  }
   0x7   :  { %10447 = sst [smem:[#allocation8_spill]] %s9188_s5  ;;  %s9129_s10 = smov 9  }
   0x8   :  { %s9218_s29 = sld [smem:[%s10415_s0 + %s9126_s26]]   ;;  %s9130_s15 = smov 10  }
   0x9   :  { %s9223_s3 = sld [smem:[%s10415_s0 + %s9127_s30]]   ;;  %s9131_s20 = smov 11  }
   0xa   :  { %s9228_s8 = sld [smem:[%s10415_s0 + %s9128_s4]]   ;;  %s9132_s26 = smov 12  }
   0xb   :  { %s9233_s14 = sld [smem:[%s10415_s0 + %s9129_s10]]   ;;  %s9133_s1 = smov 13  }
   0xc   :  { %s9238_s19 = sld [smem:[%s10415_s0 + %s9130_s15]]   ;;  %s9134_s7 = smov 14  }
   0xd   :  { %s9243_s24 = sld [smem:[%s10415_s0 + %s9131_s20]]   ;;  %s9135_s15 = smov 15  }
   0xe   :  { %s9248_s30 = sld [smem:[%s10415_s0 + %s9132_s26]]   ;;  %s9136_s22 = smov 16  }
   0xf   :  { %10448 = sst [smem:[#allocation9_spill]] %s9223_s3  ;;  %s9137_s28 = smov 17  }
  0x10   :  { %s9253_s6 = sld [smem:[%s10415_s0 + %s9133_s1]]  }
  0x11   :  { %s9258_s12 = sld [smem:[%s10415_s0 + %s9134_s7]]   ;;  %s9138_s7 = smov 18  }
  0x12   :  { %s9263_s20 = sld [smem:[%s10415_s0 + %s9135_s15]]   ;;  %s9139_s15 = smov 19  }
  0x13   :  { %s9268_s27 = sld [smem:[%s10415_s0 + %s9136_s22]]   ;;  %s9140_s22 = smov 20  }
  0x14   :  { %10449 = sst [smem:[#allocation10_spill]] %s9248_s30 }
  0x15   :  { %s9273_s4 = sld [smem:[%s10415_s0 + %s9137_s28]]   ;;  %s9141_s28 = smov 21  }
  0x17   :  { %10450 = sst [smem:[#allocation11_spill]] %s9258_s12 }
  0x18   :  { %10451 = sst [smem:[#allocation12_spill]] %s9263_s20 }
  0x19   :  { %10452 = sst [smem:[#allocation13_spill]] %s9268_s27 }
  0x1a   :  { %s9278_s12 = sld [smem:[%s10415_s0 + %s9138_s7]]   ;;  %s9142_s7 = smov 22  }
  0x1b   :  { %10453 = sst [smem:[#allocation14_spill]] %s9273_s4 }
  0x1c   :  { %s9283_s20 = sld [smem:[%s10415_s0 + %s9139_s15]]   ;;  %s9143_s15 = smov 23  }
  0x1d   :  { %s9288_s27 = sld [smem:[%s10415_s0 + %s9140_s22]]   ;;  %s9144_s22 = smov 24  }
  0x1e   :  { %s9293_s4 = sld [smem:[%s10415_s0 + %s9141_s28]]   ;;  %s9145_s28 = smov 25  }
  0x20   :  { %10454 = sst [smem:[#allocation15_spill]] %s9278_s12 }
  0x21   :  { %s9298_s12 = sld [smem:[%s10415_s0 + %s9142_s7]]   ;;  %s9146_s7 = smov 26  }
  0x22   :  { %10455 = sst [smem:[#allocation16_spill]] %s9283_s20 }
  0x23   :  { %10456 = sst [smem:[#allocation17_spill]] %s9288_s27 }
  0x24   :  { %10457 = sst [smem:[#allocation18_spill]] %s9293_s4 }
  0x25   :  { %s9303_s20 = sld [smem:[%s10415_s0 + %s9143_s15]]   ;;  %s9147_s15 = smov 27  }
  0x26   :  { %s9308_s27 = sld [smem:[%s10415_s0 + %s9144_s22]]   ;;  %s9148_s22 = smov 28  }
  0x27   :  { %10458 = sst [smem:[#allocation19_spill]] %s9298_s12 }
  0x28   :  { %s9313_s4 = sld [smem:[%s10415_s0 + %s9145_s28]]   ;;  %s9149_s28 = smov 29  }
  0x29   :  { %s9318_s12 = sld [smem:[%s10415_s0 + %s9146_s7]]   ;;  %s9150_s7 = smov 30  }
  0x2b   :  { %10459 = sst [smem:[#allocation20_spill]] %s9303_s20 }
  0x2c   :  { %10460 = sst [smem:[#allocation21_spill]] %s9308_s27 }
  0x2d   :  { %s9323_s20 = sld [smem:[%s10415_s0 + %s9147_s15]]   ;;  %s9151_s15 = smov 31  }
  0x2e   :  { %10461 = sst [smem:[#allocation22_spill]] %s9313_s4 }
  0x2f   :  { %10462 = sst [smem:[#allocation23_spill]] %s9318_s12 }
  0x30   :  { %s9328_s27 = sld [smem:[%s10415_s0 + %s9148_s22]]   ;;  %s9152_s22 = smov 32  }
  0x31   :  { %s9333_s4 = sld [smem:[%s10415_s0 + %s9149_s28]]   ;;  %s9153_s28 = smov 33  }
  0x32   :  { %s9338_s12 = sld [smem:[%s10415_s0 + %s9150_s7]]   ;;  %s9154_s7 = smov 34  }
  0x33   :  { %10463 = sst [smem:[#allocation24_spill]] %s9323_s20 }
  0x34   :  { %s9343_s20 = sld [smem:[%s10415_s0 + %s9151_s15]]   ;;  %s9155_s15 = smov 35  }
  0x36   :  { %10464 = sst [smem:[#allocation25_spill]] %s9328_s27 }
  0x37   :  { %10465 = sst [smem:[#allocation26_spill]] %s9333_s4 }
  0x38   :  { %10466 = sst [smem:[#allocation27_spill]] %s9338_s12 }
  0x39   :  { %s9348_s27 = sld [smem:[%s10415_s0 + %s9152_s22]]   ;;  %s9156_s22 = smov 36  }
  0x3a   :  { %10467 = sst [smem:[#allocation28_spill]] %s9343_s20 }
  0x3b   :  { %s9353_s4 = sld [smem:[%s10415_s0 + %s9153_s28]]   ;;  %s9157_s28 = smov 37  }
  0x3c   :  { %s9358_s12 = sld [smem:[%s10415_s0 + %s9154_s7]]   ;;  %s9158_s7 = smov 38  }
  0x3d   :  { %s9363_s20 = sld [smem:[%s10415_s0 + %s9155_s15]]   ;;  %s9159_s15 = smov 39  }
  0x3f   :  { %10468 = sst [smem:[#allocation29_spill]] %s9348_s27 }
  0x40   :  { %s9368_s27 = sld [smem:[%s10415_s0 + %s9156_s22]]   ;;  %s9160_s22 = smov 40  }
  0x41   :  { %10469 = sst [smem:[#allocation30_spill]] %s9353_s4 }
  0x42   :  { %10470 = sst [smem:[#allocation31_spill]] %s9358_s12 }
  0x43   :  { %10471 = sst [smem:[#allocation32_spill]] %s9363_s20 }
  0x44   :  { %s9373_s4 = sld [smem:[%s10415_s0 + %s9157_s28]]   ;;  %s9161_s28 = smov 41  }
  0x45   :  { %s9378_s12 = sld [smem:[%s10415_s0 + %s9158_s7]]   ;;  %s9162_s7 = smov 42  }
  0x46   :  { %10472 = sst [smem:[#allocation33_spill]] %s9368_s27 }
  0x47   :  { %s9383_s20 = sld [smem:[%s10415_s0 + %s9159_s15]]   ;;  %s9163_s15 = smov 43  }
  0x48   :  { %s9388_s27 = sld [smem:[%s10415_s0 + %s9160_s22]]  }
  0x49   :  { %s9398_s30 = sld [smem:[%s10415_s0 + %s9162_s7]]  }
  0x4a   :  { %10473 = sst [smem:[#allocation34_spill]] %s9373_s4 }
  0x4b   :  { %s9393_s4 = sld [smem:[%s10415_s0 + %s9161_s28]]  }
  0x4d   :  { %10474 = sst [smem:[#allocation35_spill]] %s9383_s20 }
  0x4e   :  { %s9403_s20 = sld [smem:[%s10415_s0 + %s9163_s15]]  }
  0x4f   :  { %92 = vsyncpa [#allocation3], 0 }
  0x50   :  { %93 = vsyncpa [#allocation5], 0  ;;  %s9405_s22 = smov 0  }
  0x51 LB: > { %s10475_s3 = sld [smem:[#allocation9_spill]]  ;;  %s9411_s23 = sadd.s32 4294967295, %s9119_s22   ;;  %s9119_s22 = sphi %s9405_s22, %s99_s22  }
  0x52   : > { %p7573_p0 = scmp.ge.s32.totalorder %s9119_s22, 1  ;;  %p1038_p1 = scmp.lt.s32.totalorder %s9119_s22, 3 }
  0x53   : > { %p10425_p2 = scmp.eq.s32.totalorder %s9411_s23, 0  ;;  %s9164_s26 = smov [#allocation2]  }
  0x54   : > { %p9416_p3 = pnand %p7573_p0, %p1038_p1  ;;  %s1162_s28 = sshll.u32 %s9164_s26, 4  ;;  %s1163_s28 = int_to_ptr.vmem [resolvable:$true] %s1162_s28 }
  0x55   : > { %s9165_s1 = smov [#allocation4]   ;;  %s9064_s10 = scalar_lea.vmem %s1163_s28, 16 }
  0x56   : > { %s10476_s0 = scalar_select %p9416_p3, 1, 0 }
  0x57   : > { %p8540_p4 = pneg %p9416_p3  ;;  %s1182_s2 = sshll.u32 %s9165_s1, 4  ;;  %s1183_s2 = int_to_ptr.vmem [resolvable:$true] %s1182_s2 }
  0x58   : > { %p9065_p7 = scmp.ne.s32.totalorder %s1163_s28, %s9064_s10  ;;  %s9071_s11 = scalar_lea.vmem %s1163_s28, 32 }
  0x59   : > { %p9424_p5 = pnand %p10425_p2, %p8540_p4  ;;  %p9072_p10 = scmp.lt.s32.totalorder %s1163_s28, %s1163_s28 }
  0x5a   : > { %p9073_p11 = scmp.lt.s32.totalorder %s9071_s11, %s9064_s10 }
  0x5b   : > { %p9055_p6 = pneg %p9424_p5 }
  0x5c   : > { %p9074_p12 = por %p9073_p11, %p9072_p10 }
  0x5d   : > { %p9067_p8 = pnand %p9065_p7, %p9055_p6 }
  0x5f   : > { %p9068_p9 = pneg %p9067_p8 }
  0x61   : > { %p9075_p13 = pnand %p9074_p12, %p9068_p9 }
  0x63   : > { %9078 = shalt.err (!%p9075_p13)
}
  0x64   : > { %8543 = dma.hbm_to_vmem [thread:$0]  (!%p9424_p5), %s9378_s12, 16, %s1163_s28, [#allocation3]  }
  0x65   : > { %s9090_s15 = scalar_lea.vmem %s1183_s2, 16  ;;  %s9097_s16 = scalar_lea.vmem %s1183_s2, 32 }
  0x66   : > { %p9091_p0 = scmp.ne.s32.totalorder %s1183_s2, %s9090_s15  ;;  %p9098_p7 = scmp.lt.s32.totalorder %s1183_s2, %s1183_s2 }
  0x67   : > { %p9099_p8 = scmp.lt.s32.totalorder %s9097_s16, %s9090_s15 }
  0x68   : > { %p9093_p1 = pnand %p9091_p0, %p9055_p6 }
  0x69   : > { %p9100_p2 = por %p9099_p8, %p9098_p7 }
  0x6a   : > { %p9094_p4 = pneg %p9093_p1 }
  0x6c   : > { %p9101_p3 = pnand %p9100_p2, %p9094_p4 }
  0x6e   : > { %9104 = shalt.err (!%p9101_p3)
}
  0x6f   : > { %8546 = dma.hbm_to_vmem [thread:$0]  (!%p9424_p5), %s9398_s30, 16, %s1183_s2, [#allocation5]  }
  0x70   : > { %p10478_p9 = scmp.ne.s32.totalorder %s10476_s0, 0 }
  0x71   : > { %p10479_p10 = scmp.eq.s32.totalorder (!%p10478_p9), %s9411_s23, 0 }
  0x72   : > { %1203 = sbr.rel (%p10478_p9) target bundleno = 12004 (0x2ee4), region = 192 }
  0x77   : > { %9110 = dma.done.wait (%p10479_p10), [#allocation3], 16   ;;  %p10480_p11 = pmov %p10479_p10 }
  0x78   : > { %p10481_p6 = pmov %p10479_p10 }
  0x79   : > { %9112 = vsyncadd (%p10480_p11), [#allocation3], 4294967280 }
  0x7a   : > { %9114 = dma.done.wait (%p10481_p6), [#allocation5], 16   ;;  %p10482_p12 = pmov %p10481_p6 }
  0x7b   : > { %s10483_s5 = sld [smem:[#allocation8_spill]]  ;;  %p1311_p2 = scmp.lt.s32.totalorder %s9411_s23, 1  ;;  %v9166_v0 = vmov 0.0   ;;  %v8618_v2 = vld [vmem:[%s9193_s9] sm:$0xff]   ;;  %vm9167_vm0 = vmmov 0   ;;  %vm1862_vm1 = vcmask 130048  }
  0x7c   : > { %9116 = vsyncadd (%p10482_p12), [#allocation5], 4294967280  ;;  %8270 = vmatprep.subr.bf16.mxu0 %v9166_v0  ;;  %8276 = vmatprep.subr.bf16.mxu1 %v9166_v0  ;;  %v7584_v7 = vld [vmem:[%s9198_s13] ss:$0 sm:$0xff]  ;;  %vm1907_vm2 = vcmask 261120   ;;  %v8619_v26 = vld [vmem:[%s9213_s25 + $0x8] sm:$0xff]  }
  0x7d   : > { %s10522_s23 = smov (!%p1311_p2, %s9411_s23), 1  ;;  %8271 = vmatpush3.bf16.msra.mxu0 %v8618_v2  ;;  %8272 = vmatprep.mubr.msk.bf16.mxu0 %vm9167_vm0, %v9166_v0  ;;  %v8620_v27 = vld [vmem:[%s9213_s25] sm:$0xff]   ;;  %s10441_s26 = smov 96   ;;  %vm2018_vm3 = vcmask 64512   ;;  %vm2262_vm4 = vcmask 1043456  }
  0x7e   : > { %s7915_s18 = sshll.u32 %s10522_s23, 4  ;;  %8280 = vmatprep.mubr.msk.bf16.mxu1 %vm9167_vm0, %v9166_v0  ;;  %8284 = vmatprep.subr.bf16.mxu0 %v9166_v0  ;;  %v7587_v36 = vld [vmem:[%s9203_s17] ss:$0 sm:$0xff]  ;;  %s10440_s28 = smov 88  }
  0x7f   : > { %8277 = vmatpush3.bf16.msra.mxu1 %v8619_v26  ;;  %v7588_v40 = vld [vmem:[%s9208_s21] ss:$0 sm:$0xff]  ;;  %s10442_s1 = smov 120   ;;  %s10439_s2 = smov 56  }
  0x80   : > { %8278 = vmatprep.subr.bf16.mxu1 %v9166_v0  ;;  %v7589_v46 = vld [vmem:[%s9218_s29] ss:$0 sm:$0xff]  ;;  %s10438_s7 = smov 64   ;;  %s10437_s10 = smov 80  }
  0x81   : > { %s1315_s0 = scalar_lea.vmem %s10483_s5, %s7915_s18  ;;  %s10435_s11 = smov 112  }
  0x82   : > { %v1815_v1 = vld [vmem:[%s1315_s0] sm:$0xff]  ;;  %v1816_v3 = vld [vmem:[%s1315_s0 + $0x8] sm:$0xff]  ;;  %s10433_s15 = smov 72   ;;  %s10429_s16 = smov 104  }
  0x83   : > { %1817 = vxpose.xlu0.b32.start [1/2] (short) (narrow) %v1815_v1, 16  ;;  %8279 = vmatpush3.bf16.msra.mxu1 %v8620_v27  ;;  %s10431_s18 = smov 48   ;;  %s10427_s0 = smov 40  }
  0x84   : > { %8290 = vmatprep.subr.bf16.mxu1 %v9166_v0  ;;  %s10510_s5 = sld [smem:[#allocation31_spill]] }
  0x87   : > { %1818 = vxpose.xlu0.b32.end [2/2] (short) (narrow) %v1816_v3, 16 }
  0xff   : > { %v1833_v4 = vpop.trf.xlu0 }
 0x103   : > { %v1834_v5 = vpop.trf.xlu0 }
 0x104   : > { %v1849_v6 = vpack.c.bf16 %v1834_v5, %v1833_v4 }
 0x106   : > { %8273 = vmatmul.mubr.msk.bf16.vlgmr.msra.gmra.mxu0 %vm1862_vm1, %v1849_v6 }
 0x107   : > { %8286 = vmatprep.mubr.msk.bf16.mxu0 %vm9167_vm0, %v9166_v0 }
 0x1c6   : > { %v1900_v8 = vpop.f32.mrf.mxu0 }
 0x1c7   : > { %v1901_v9 = vadd.f32 %v7584_v7, %v1900_v8 }
 0x1c8   : > { %v8274_v10 = vpop.f32.mrf.mxu0 }
 0x1c9   : > { %v1908_v11 = vsel %vm1907_vm2, %v1901_v9, 0.0 }
 0x1ca   : > { %1909 = vadd.xlane.f32.xlu1 %v1908_v11  ;;  %v1903_v12 = vpop.f32.mrf.mxu0 }
 0x1cb   : > { %v1904_v13 = vadd.f32 %v7584_v7, %v1903_v12 }
 0x1cc   : > { %v8275_v14 = vpop.f32.mrf.mxu0 }
 0x1cd   : > { %v1911_v15 = vsel %vm1907_vm2, %v1904_v13, 0.0 }
 0x1ce   : > { %1912 = vadd.xlane.f32.xlu1 %v1911_v15 }
 0x253   : > { %v1910_v16 = vpop.xlane.xlu1 %1909 }
 0x254   : > { %v1915_v17 = vmul.f32 0.03125, %v1910_v16 }
 0x256   : > { %v1917_v18 = vsub.f32 %v1901_v9, %v1915_v17 }
 0x257   : > { %v1913_v19 = vpop.xlane.xlu1 %1912 }
 0x258   : > { %v1916_v20 = vmul.f32 0.03125, %v1913_v19  ;;  %v1919_v21 = vmul.f32 %v1917_v18, %v1917_v18 }
 0x25a   : > { %v1918_v22 = vsub.f32 %v1904_v13, %v1916_v20  ;;  %v1921_v23 = vsel %vm1907_vm2, %v1919_v21, 0.0 }
 0x25b   : > { %1922 = vadd.xlane.f32.xlu0 %v1921_v23 }
 0x25c   : > { %v1920_v24 = vmul.f32 %v1918_v22, %v1918_v22 }
 0x25e   : > { %v1924_v25 = vsel %vm1907_vm2, %v1920_v24, 0.0 }
 0x25f   : > { %1925 = vadd.xlane.f32.xlu1 %v1924_v25 }
 0x2e4   : > { %v1923_v28 = vpop.xlane.xlu0 %1922 }
 0x2e5   : > { %v1927_v29 = vmul.f32 0.03125, %v1923_v28 }
 0x2e7   : > { %v1929_v30 = vadd.f32 1e-05, %v1927_v29 }
 0x2e8   : > { %v1926_v31 = vpop.xlane.xlu1 %1925 }
 0x2e9   : > { %8821 = vrsqrt.f32 %v1929_v30  ;;  %v1928_v32 = vmul.f32 0.03125, %v1926_v31 }
 0x2eb   : > { %v1930_v33 = vadd.f32 1e-05, %v1928_v32 }
 0x2ed   : > { %8823 = vrsqrt.f32 %v1930_v33 }
 0x2f6   : > { %v8822_v34 = vpop.eup %8821 }
 0x2f7   : > { %v1933_v35 = vmul.f32 %v8822_v34, %v1917_v18 }
 0x2f9   : > { %v1941_v39 = vmul.f32 %v7587_v36, %v1933_v35 }
 0x2fa   : > { %v8824_v37 = vpop.eup %8823 }
 0x2fb   : > { %v1934_v38 = vmul.f32 %v8824_v37, %v1918_v22  ;;  %v9480_v42 = vadd.f32 %v7588_v40, %v1941_v39 }
 0x2fd   : > { %v1942_v41 = vmul.f32 %v7587_v36, %v1934_v38 }
 0x2ff   : > { %v9482_v43 = vadd.f32 %v7588_v40, %v1942_v41 }
 0x301   : > { %v1951_v44 = vpack.c.bf16 %v9482_v43, %v9480_v42 }
 0x303   : > { %8281 = vmatmul.mubr.msk.bf16.vlgmr.msra.gmra.mxu1 %vm1907_vm2, %v1951_v44 }
 0x304   : > { %8292 = vmatprep.mubr.msk.bf16.mxu1 %vm9167_vm0, %v9166_v0 }
 0x3c3   : > { %v2007_v45 = vpop.f32.mrf.mxu1 }
 0x3c4   : > { %v2008_v49 = vadd.f32 %v7589_v46, %v2007_v45  ;;  %v1332_v45 = vld [vmem:[%s10475_s3] sm:$0xf] }
 0x3c5   : > { %v8282_v47 = vpop.f32.mrf.mxu1 }
 0x3c6   : > { %v1333_v47 = vld [vmem:[%s10475_s3 + $0x4] sm:$0xf] }
 0x3c7   : > { %v2010_v48 = vpop.f32.mrf.mxu1 }
 0x3c8   : > { %v2011_v50 = vadd.f32 %v7589_v46, %v2010_v48  ;;  %v2311_v46 = vsel %vm2262_vm4, %v1332_v45, 0  ;;  %v2264_v48 = vsel %vm2262_vm4, %v1333_v47, 0 }
 0x3c9   : > { %v8283_v51 = vpop.f32.mrf.mxu1 }
 0x3ca   : > { %v9490_v52 = vpack.c.bf16 %v2011_v50, %v2008_v49 }
 0x3cc   : > { %2016 = vrot.lane.b32.xlu1 %v9490_v52, %s10441_s26 }
 0x3d0   : > { %2139 = vrot.lane.b32.xlu1 %v9490_v52, %s10440_s28 }
 0x3d4   : > { %2137 = vrot.lane.b32.xlu1 %v9490_v52, %s10442_s1 }
 0x43e   : > { %v2017_v53 = vpop.permute.xlu1 %2016 }
 0x43f   : > { %v2023_v54 = vsel %vm2018_vm3, %v2017_v53, 0 }
 0x440   : > { %8285 = vmatpush3.bf16.xpose.msra.mxu0 %v2023_v54 }
 0x441   : > { %8296 = vmatprep.subr.bf16.mxu0 %v9166_v0 }
 0x442   : > { %v2140_v55 = vpop.permute.xlu1 %2139 }
 0x443   : > { %v2145_v56 = vsel %vm2018_vm3, %v2140_v55, 0 }
 0x446   : > { %v2138_v57 = vpop.permute.xlu1 %2137 }
 0x447   : > { %8287 = vmatmul.mubr.msk.bf16.vlgmr.msra.gmra.mxu0 %vm2018_vm3, %v9490_v52 }
 0x448   : > { %8297 = vmatpush3.bf16.xpose.msra.mxu0 %v2145_v56  ;;  %8298 = vmatprep.mubr.msk.bf16.mxu0 %vm9167_vm0, %v9166_v0 }
 0x449   : > { %8308 = vmatprep.subr.bf16.mxu0 %v9166_v0 }
 0x44f   : > { %8299 = vmatmul.mubr.msk.bf16.vlgmr.msra.gmra.mxu0 %vm2018_vm3, %v2138_v57 }
 0x450   : > { %8310 = vmatprep.mubr.msk.bf16.mxu0 %vm9167_vm0, %v9166_v0  ;;  %8309 = vmatpush3.bf16.msra.mxu0 %v2264_v48 }
 0x451   : > { %8320 = vmatprep.subr.bf16.mxu0 %v9166_v0 }
 0x507   : > { %v2059_v58 = vpop.f32.mrf.mxu0 }
 0x508   : > { %v2066_v59 = vsel %vm1862_vm1, %v2059_v58, -inf }
 0x509   : > { %2067 = vmax.xlane.f32.xlu1 %v2066_v59  ;;  %v8288_v60 = vpop.f32.mrf.mxu0 }
 0x50b   : > { %v2062_v61 = vpop.f32.mrf.mxu0 }
 0x50c   : > { %v2069_v62 = vsel %vm1862_vm1, %v2062_v61, -inf }
 0x50d   : > { %2070 = vmax.xlane.f32.xlu0 %v2069_v62  ;;  %v8289_v63 = vpop.f32.mrf.mxu0 }
 0x50f   : > { %v2181_v1 = vpop.f32.mrf.mxu0 }
 0x510   : > { %v2188_v2 = vsel %vm1862_vm1, %v2181_v1, -inf }
 0x511   : > { %2189 = vmax.xlane.f32.xlu0 %v2188_v2  ;;  %v8300_v3 = vpop.f32.mrf.mxu0 }
 0x513   : > { %v2184_v4 = vpop.f32.mrf.mxu0 }
 0x514   : > { %v2191_v5 = vsel %vm1862_vm1, %v2184_v4, -inf }
 0x515   : > { %2192 = vmax.xlane.f32.xlu0 %v2191_v5  ;;  %v8301_v6 = vpop.f32.mrf.mxu0 }
 0x592   : > { %v2068_v7 = vpop.xlane.xlu1 %2067 }
 0x593   : > { %v2072_v8 = vsub.f32 %v2059_v58, %v2068_v7 }
 0x595   : > { %v2074_v9 = vmul.f32 1.442695, %v2072_v8 }
 0x596   : > { %v2071_v10 = vpop.xlane.xlu0 %2070 }
 0x597   : > { %8825 = vpow2.f32 %v2074_v9  ;;  %v2073_v11 = vsub.f32 %v2062_v61, %v2071_v10 }
 0x599   : > { %v2076_v12 = vmul.f32 1.442695, %v2073_v11 }
 0x59a   : > { %v2190_v13 = vpop.xlane.xlu0 %2189 }
 0x59b   : > { %8827 = vpow2.f32 %v2076_v12  ;;  %v2194_v14 = vsub.f32 %v2181_v1, %v2190_v13 }
 0x59d   : > { %v2196_v15 = vmul.f32 1.442695, %v2194_v14 }
 0x59e   : > { %v2193_v16 = vpop.xlane.xlu0 %2192 }
 0x59f   : > { %8829 = vpow2.f32 %v2196_v15  ;;  %v2195_v17 = vsub.f32 %v2184_v4, %v2193_v16 }
 0x5a1   : > { %v2198_v18 = vmul.f32 1.442695, %v2195_v17 }
 0x5a3   : > { %8831 = vpow2.f32 %v2198_v18 }
 0x5a4   : > { %v8826_v19 = vpop.eup %8825 }
 0x5a5   : > { %v2078_v20 = vsel %vm1862_vm1, %v8826_v19, 0.0 }
 0x5a6   : > { %2079 = vadd.xlane.f32.xlu0 %v2078_v20 }
 0x5a8   : > { %v8828_v21 = vpop.eup %8827 }
 0x5a9   : > { %v2081_v22 = vsel %vm1862_vm1, %v8828_v21, 0.0 }
 0x5aa   : > { %2082 = vadd.xlane.f32.xlu0 %v2081_v22 }
 0x5ac   : > { %v8830_v23 = vpop.eup %8829 }
 0x5ad   : > { %v2200_v24 = vsel %vm1862_vm1, %v8830_v23, 0.0 }
 0x5ae   : > { %2201 = vadd.xlane.f32.xlu0 %v2200_v24 }
 0x5b0   : > { %v8832_v25 = vpop.eup %8831 }
 0x5b1   : > { %v2203_v26 = vsel %vm1862_vm1, %v8832_v25, 0.0 }
 0x5b2   : > { %2204 = vadd.xlane.f32.xlu1 %v2203_v26 }
 0x5c3   : > { %2211 = vrot.lane.b32.xlu1 %v9490_v52, %s10439_s2 }
 0x5c4   : > { %2089 = vrot.lane.b32.xlu0 %v9490_v52, %s10438_s7 }
 0x5c7   : > { %2356 = vrot.lane.b32.xlu1 %v9490_v52, %s10437_s10 }
 0x5cb   : > { %2354 = vrot.lane.b32.xlu1 %v9490_v52, %s10435_s11  ;;  %s10491_s11 = sld [smem:[#allocation17_spill]] }
 0x62f   : > { %v2080_v27 = vpop.xlane.xlu0 %2079 }
 0x630   : > { %8833 = vrcp.f32 %v2080_v27 }
 0x633   : > { %v2083_v28 = vpop.xlane.xlu0 %2082 }
 0x634   : > { %8835 = vrcp.f32 %v2083_v28 }
 0x637   : > { %v2202_v29 = vpop.xlane.xlu0 %2201 }
 0x638   : > { %8837 = vrcp.f32 %v2202_v29 }
 0x63b   : > { %v2205_v30 = vpop.xlane.xlu1 %2204  ;;  %v2090_v31 = vpop.permute.xlu0 %2089 }
 0x63c   : > { %8839 = vrcp.f32 %v2205_v30  ;;  %8291 = vmatpush3.bf16.msra.mxu1 %v2090_v31 }
 0x63d   : > { %8302 = vmatprep.subr.bf16.mxu1 %v9166_v0  ;;  %v8834_v32 = vpop.eup %8833 }
 0x63e   : > { %v2086_v34 = vmul.f32 %v8834_v32, %v8826_v19 }
 0x63f   : > { %v2212_v37 = vpop.permute.xlu1 %2211 }
 0x641   : > { %v8836_v33 = vpop.eup %8835 }
 0x642   : > { %v2087_v35 = vmul.f32 %v8836_v33, %v8828_v21 }
 0x643   : > { %v2357_v57 = vpop.permute.xlu1 %2356 }
 0x644   : > { %v2088_v36 = vpack.c.bf16 %v2087_v35, %v2086_v34  ;;  %v2362_v61 = vsel %vm2018_vm3, %v2357_v57, 0 }
 0x645   : > { %v8838_v38 = vpop.eup %8837 }
 0x646   : > { %8293 = vmatmul.mubr.msk.bf16.vlgmr.msra.gmra.mxu1 %vm1862_vm1, %v2088_v36  ;;  %v2208_v40 = vmul.f32 %v8838_v38, %v8830_v23 }
 0x647   : > { %8303 = vmatpush3.bf16.msra.mxu1 %v2212_v37  ;;  %8304 = vmatprep.mubr.msk.bf16.mxu1 %vm9167_vm0, %v9166_v0  ;;  %v2355_v62 = vpop.permute.xlu1 %2354  ;;  %v1334_v37 = vld [vmem:[%s10475_s3 + $0x8] sm:$0xf] }
 0x648   : > { %8314 = vmatprep.subr.bf16.mxu1 %v9166_v0  ;;  %v2480_v38 = vsel %vm2262_vm4, %v1334_v37, 0 }
 0x649   : > { %v8840_v39 = vpop.eup %8839 }
 0x64a   : > { %v2209_v41 = vmul.f32 %v8840_v39, %v8832_v25 }
 0x64c   : > { %v2210_v44 = vpack.c.bf16 %v2209_v41, %v2208_v40 }
 0x64e   : > { %8305 = vmatmul.mubr.msk.bf16.vlgmr.msra.gmra.mxu1 %vm1862_vm1, %v2210_v44 }
 0x64f   : > { %8316 = vmatprep.mubr.msk.bf16.mxu1 %vm9167_vm0, %v9166_v0  ;;  %8315 = vmatpush3.bf16.msra.mxu1 %v2311_v46 }
 0x650   : > { %8326 = vmatprep.subr.bf16.mxu1 %v9166_v0 }
 0x706   : > { %v2129_v49 = vpop.f32.mrf.mxu1 }
 0x708   : > { %v8294_v50 = vpop.f32.mrf.mxu1 }
 0x70a   : > { %v2132_v51 = vpop.f32.mrf.mxu1 }
 0x70b   : > { %v2136_v53 = vpack.c.bf16 %v2132_v51, %v2129_v49 }
 0x70c   : > { %v8295_v54 = vpop.f32.mrf.mxu1 }
 0x70d   : > { %8317 = vmatmul.mubr.msk.bf16.vlgmr.msra.gmra.mxu1 %vm2018_vm3, %v2136_v53 }
 0x70e   : > { %v2251_v55 = vpop.f32.mrf.mxu1  ;;  %8328 = vmatprep.mubr.msk.bf16.mxu1 %vm9167_vm0, %v9166_v0 }
 0x710   : > { %v8306_v56 = vpop.f32.mrf.mxu1 }
 0x712   : > { %v2254_v58 = vpop.f32.mrf.mxu1 }
 0x713   : > { %v2258_v59 = vpack.c.bf16 %v2254_v58, %v2251_v55 }
 0x714   : > { %v8307_v60 = vpop.f32.mrf.mxu1 }
 0x715   : > { %8311 = vmatmul.mubr.msk.bf16.vlgmr.msra.gmra.mxu0 %vm2018_vm3, %v2258_v59 }
 0x716   : > { %8321 = vmatpush3.bf16.xpose.msra.mxu0 %v2362_v61  ;;  %8322 = vmatprep.mubr.msk.bf16.mxu0 %vm9167_vm0, %v9166_v0 }
 0x717   : > { %8332 = vmatprep.subr.bf16.mxu0 %v9166_v0 }
 0x71d   : > { %8323 = vmatmul.mubr.msk.bf16.vlgmr.msra.gmra.mxu0 %vm2018_vm3, %v2355_v62 }
 0x71e   : > { %8334 = vmatprep.mubr.msk.bf16.mxu0 %vm9167_vm0, %v9166_v0  ;;  %8333 = vmatpush3.bf16.msra.mxu0 %v2480_v38 }
 0x71f   : > { %8344 = vmatprep.subr.bf16.mxu0 %v9166_v0 }
 0x7cd   : > { %v2347_v63 = vpop.f32.mrf.mxu1 }
 0x7cf   : > { %v8318_v1 = vpop.f32.mrf.mxu1 }
 0x7d1   : > { %v2350_v2 = vpop.f32.mrf.mxu1 }
 0x7d3   : > { %v8319_v3 = vpop.f32.mrf.mxu1 }
 0x7d5   : > { %v2300_v4 = vpop.f32.mrf.mxu0 }
 0x7d6   : > { %v9550_v5 = vadd.f32 %v2347_v63, %v2300_v4 }
 0x7d7   : > { %v8312_v6 = vpop.f32.mrf.mxu0 }
 0x7d9   : > { %v2303_v7 = vpop.f32.mrf.mxu0 }
 0x7da   : > { %v9552_v8 = vadd.f32 %v2350_v2, %v2303_v7 }
 0x7db   : > { %v8313_v9 = vpop.f32.mrf.mxu0 }
 0x7dd   : > { %v2398_v10 = vpop.f32.mrf.mxu0 }
 0x7de   : > { %v2405_v11 = vsel %vm1862_vm1, %v2398_v10, -inf }
 0x7df   : > { %2406 = vmax.xlane.f32.xlu0 %v2405_v11  ;;  %v8324_v12 = vpop.f32.mrf.mxu0 }
 0x7e1   : > { %v2401_v13 = vpop.f32.mrf.mxu0 }
 0x7e2   : > { %v2408_v14 = vsel %vm1862_vm1, %v2401_v13, -inf }
 0x7e3   : > { %2409 = vmax.xlane.f32.xlu1 %v2408_v14  ;;  %v8325_v15 = vpop.f32.mrf.mxu0 }
 0x7e4   : > { %v1335_v15 = vld [vmem:[%s10475_s3 + $0xc] sm:$0xf]  ;;  %s10509_s3 = sld [smem:[#allocation29_spill]] }
 0x7f4   : > { %2527 = vrot.lane.b32.xlu1 %v9490_v52, %s10433_s15  ;;  %s10490_s15 = sld [smem:[#allocation15_spill]] }
 0x7f8   : > { %2525 = vrot.lane.b32.xlu1 %v9490_v52, %s10429_s16  ;;  %s10486_s16 = sld [smem:[#allocation11_spill]] }
 0x868   : > { %v2407_v16 = vpop.xlane.xlu0 %2406 }
 0x869   : > { %v2411_v17 = vsub.f32 %v2398_v10, %v2407_v16 }
 0x86b   : > { %v2413_v18 = vmul.f32 1.442695, %v2411_v17 }
 0x86c   : > { %v2410_v19 = vpop.xlane.xlu1 %2409 }
 0x86d   : > { %8841 = vpow2.f32 %v2413_v18  ;;  %v2412_v20 = vsub.f32 %v2401_v13, %v2410_v19 }
 0x86f   : > { %v2415_v21 = vmul.f32 1.442695, %v2412_v20  ;;  %v7605_v20 = vld [vmem:[%s9228_s8] ss:$0 sm:$0xff] }
 0x870   : > { %v2528_v33 = vpop.permute.xlu1 %2527 }
 0x871   : > { %8843 = vpow2.f32 %v2415_v21  ;;  %v2533_v35 = vsel %vm2018_vm3, %v2528_v33, 0 }
 0x874   : > { %v2526_v36 = vpop.permute.xlu1 %2525 }
 0x87a   : > { %v8842_v22 = vpop.eup %8841 }
 0x87b   : > { %v2417_v23 = vsel %vm1862_vm1, %v8842_v22, 0.0 }
 0x87c   : > { %2418 = vadd.xlane.f32.xlu0 %v2417_v23 }
 0x87e   : > { %v8844_v24 = vpop.eup %8843 }
 0x87f   : > { %v2420_v25 = vsel %vm1862_vm1, %v8844_v24, 0.0 }
 0x880   : > { %2421 = vadd.xlane.f32.xlu0 %v2420_v25 }
 0x896   : > { %2428 = vrot.lane.b32.xlu0 %v9490_v52, %s10431_s18  ;;  %s10487_s18 = sld [smem:[#allocation13_spill]] }
 0x905   : > { %v2419_v26 = vpop.xlane.xlu0 %2418 }
 0x906   : > { %8845 = vrcp.f32 %v2419_v26 }
 0x909   : > { %v2422_v27 = vpop.xlane.xlu0 %2421 }
 0x90a   : > { %8847 = vrcp.f32 %v2422_v27 }
 0x90d   : > { %v2429_v28 = vpop.permute.xlu0 %2428 }
 0x90e   : > { %8327 = vmatpush3.bf16.msra.mxu1 %v2429_v28 }
 0x90f   : > { %8338 = vmatprep.subr.bf16.mxu1 %v9166_v0 }
 0x913   : > { %v8846_v29 = vpop.eup %8845 }
 0x914   : > { %v2425_v31 = vmul.f32 %v8846_v29, %v8842_v22 }
 0x917   : > { %v8848_v30 = vpop.eup %8847 }
 0x918   : > { %v2426_v32 = vmul.f32 %v8848_v30, %v8844_v24 }
 0x91a   : > { %v2427_v34 = vpack.c.bf16 %v2426_v32, %v2425_v31 }
 0x91c   : > { %8329 = vmatmul.mubr.msk.bf16.vlgmr.msra.gmra.mxu1 %vm1862_vm1, %v2427_v34 }
 0x91d   : > { %8339 = vmatpush3.bf16.xpose.msra.mxu1 %v2533_v35  ;;  %8340 = vmatprep.mubr.msk.bf16.mxu1 %vm9167_vm0, %v9166_v0 }
 0x91e   : > { %8350 = vmatprep.subr.bf16.mxu1 %v9166_v0 }
 0x924   : > { %8341 = vmatmul.mubr.msk.bf16.vlgmr.msra.gmra.mxu1 %vm2018_vm3, %v2526_v36 }
 0x925   : > { %8352 = vmatprep.mubr.msk.bf16.mxu1 %vm9167_vm0, %v9166_v0 }
 0x9dc   : > { %v2468_v39 = vpop.f32.mrf.mxu1 }
 0x9de   : > { %v8330_v40 = vpop.f32.mrf.mxu1 }
 0x9e0   : > { %v2471_v41 = vpop.f32.mrf.mxu1 }
 0x9e1   : > { %v2475_v44 = vpack.c.bf16 %v2471_v41, %v2468_v39  ;;  %v1347_v41 = vld [vmem:[%s9243_s24 + $0x40] sm:$0xff] }
 0x9e2   : > { %v8331_v45 = vpop.f32.mrf.mxu1 }
 0x9e3   : > { %8335 = vmatmul.mubr.msk.bf16.vlgmr.msra.gmra.mxu0 %vm2018_vm3, %v2475_v44  ;;  %v1351_v44 = vld [vmem:[%s9243_s24 + $0x60] sm:$0xff]  ;;  %v1348_v45 = vld [vmem:[%s9243_s24 + $0x48] sm:$0xff] }
 0x9e4   : > { %v2569_v46 = vpop.f32.mrf.mxu1  ;;  %8346 = vmatprep.mubr.msk.bf16.mxu0 %vm9167_vm0, %v9166_v0 }
 0x9e5   : > { %v2576_v47 = vsel %vm1862_vm1, %v2569_v46, -inf }
 0x9e6   : > { %2577 = vmax.xlane.f32.xlu1 %v2576_v47  ;;  %v8342_v48 = vpop.f32.mrf.mxu1  ;;  %v1352_v47 = vld [vmem:[%s9243_s24 + $0x68] sm:$0xff] }
 0x9e7   : > { %v7616_v48 = vcombine.low %v1347_v41, %v1351_v44 }
 0x9e8   : > { %v2572_v49 = vpop.f32.mrf.mxu1 }
 0x9e9   : > { %v2579_v50 = vsel %vm1862_vm1, %v2572_v49, -inf }
 0x9ea   : > { %2580 = vmax.xlane.f32.xlu0 %v2579_v50  ;;  %v8343_v51 = vpop.f32.mrf.mxu1  ;;  %v7619_v50 = vcombine.high %v1348_v45, %v1352_v47 }
 0x9eb   : > { %v1339_v51 = vld [vmem:[%s9243_s24] sm:$0xff] }
 0x9f7   : > { %2599 = vrot.lane.b32.xlu1 %v9490_v52, %s10427_s0  ;;  %s10484_s0 = sld [smem:[#allocation10_spill]] }
 0xa6f   : > { %v2578_v53 = vpop.xlane.xlu1 %2577 }
 0xa70   : > { %v2582_v54 = vsub.f32 %v2569_v46, %v2578_v53  ;;  %v7617_v46 = vcombine.high %v1347_v41, %v1351_v44  ;;  %v1343_v53 = vld [vmem:[%s9243_s24 + $0x20] sm:$0xff] }
 0xa71   : > { %v8634_v41 = vld [vmem:[%s9253_s6 + $0xe0] sm:$0xff]  }
 0xa72   : > { %v2584_v55 = vmul.f32 1.442695, %v2582_v54  ;;  %v1340_v54 = vld [vmem:[%s9243_s24 + $0x8] sm:$0xff]  ;;  %v8635_v44 = vld [vmem:[%s9253_s6 + $0x20] sm:$0xff]  }
 0xa73   : > { %v2600_v56 = vpop.permute.xlu1 %2599  ;;  %v2581_v57 = vpop.xlane.xlu0 %2580 }
 0xa74   : > { %8849 = vpow2.f32 %v2584_v55  ;;  %v2583_v58 = vsub.f32 %v2572_v49, %v2581_v57  ;;  %8345 = vmatpush3.bf16.msra.mxu0 %v2600_v56  ;;  %v7618_v49 = vcombine.low %v1348_v45, %v1352_v47  ;;  %v7609_v55 = vcombine.high %v1339_v51, %v1343_v53  ;;  %v1344_v56 = vld [vmem:[%s9243_s24 + $0x28] sm:$0xff]  ;;  %v8636_v45 = vld [vmem:[%s9253_s6 + $0xa0] sm:$0xff]   ;;  %v8638_v47 = vld [vmem:[%s9253_s6 + $0xd8] sm:$0xff]  }
 0xa75   : > { %2885 = vmatprep.subr.bf16.mxu0 %v7617_v46  ;;  %v9179_v57 = vmov 0   ;;  %v8637_v46 = vld [vmem:[%s9253_s6 + $0x58] sm:$0xff]  }
 0xa76   : > { %v2586_v59 = vmul.f32 1.442695, %v2583_v58  ;;  %v7608_v58 = vcombine.low %v1339_v51, %v1343_v53  ;;  %v8642_v51 = vld [vmem:[%s9253_s6 + $0xd0] sm:$0xff]  }
 0xa77   : > { %v8643_v53 = vld [vmem:[%s9253_s6 + $0x10] sm:$0xff]  }
 0xa78   : > { %8851 = vpow2.f32 %v2586_v59  ;;  %v7611_v59 = vcombine.high %v1340_v54, %v1344_v56 }
 0xa81   : > { %v8850_v60 = vpop.eup %8849 }
 0xa82   : > { %v2588_v61 = vsel %vm1862_vm1, %v8850_v60, 0.0 }
 0xa83   : > { %2589 = vadd.xlane.f32.xlu0 %v2588_v61  ;;  %v1349_v61 = vld [vmem:[%s9243_s24 + $0x50] sm:$0xff] }
 0xa85   : > { %v8852_v62 = vpop.eup %8851 }
 0xa86   : > { %v2591_v63 = vsel %vm1862_vm1, %v8852_v62, 0.0 }
 0xa87   : > { %2592 = vadd.xlane.f32.xlu0 %v2591_v63  ;;  %v1350_v63 = vld [vmem:[%s9243_s24 + $0x58] sm:$0xff] }
 0xaa3   : > { %v2516_v1 = vpop.f32.mrf.mxu0 }
 0xaa4   : > { %v2523_v52 = vadd.f32 %v2516_v1, %v9550_v5  ;;  %v2651_v5 = vsel %vm2262_vm4, %v1335_v15, 0  ;;  %v7606_v15 = vld [vmem:[%s9233_s14] ss:$0 sm:$0xff] }
 0xaa5   : > { %v8336_v2 = vpop.f32.mrf.mxu0  ;;  %8351 = vmatpush3.bf16.msra.mxu1 %v2651_v5 }
 0xaa6   : > { %2928 = vmatprep.subr.bf16.mxu1 %v7619_v50  ;;  %v8641_v50 = vld [vmem:[%s9253_s6 + $0x50] sm:$0xff]  }
 0xaa7   : > { %v2519_v3 = vpop.f32.mrf.mxu0 }
 0xaa8   : > { %v2524_v4 = vadd.f32 %v2519_v3, %v9552_v8 }
 0xaa9   : > { %v8337_v6 = vpop.f32.mrf.mxu0 }
 0xb0c   : > { %v2590_v7 = vpop.xlane.xlu0 %2589 }
 0xb0d   : > { %8853 = vrcp.f32 %v2590_v7 }
 0xb10   : > { %v2593_v9 = vpop.xlane.xlu0 %2592 }
 0xb11   : > { %8855 = vrcp.f32 %v2593_v9 }
 0xb1a   : > { %v8854_v10 = vpop.eup %8853 }
 0xb1b   : > { %v2596_v12 = vmul.f32 %v8854_v10, %v8850_v60  ;;  %v7610_v60 = vcombine.low %v1340_v54, %v1344_v56  ;;  %v8644_v54 = vld [vmem:[%s9253_s6 + $0x90] sm:$0xff]   ;;  %v8646_v56 = vld [vmem:[%s9253_s6 + $0xc8] sm:$0xff]  }
 0xb1e   : > { %v8856_v11 = vpop.eup %8855 }
 0xb1f   : > { %v2597_v13 = vmul.f32 %v8856_v11, %v8852_v62  ;;  %v1353_v62 = vld [vmem:[%s9243_s24 + $0x70] sm:$0xff] }
 0xb20   : > { %v7621_v1 = vcombine.high %v1349_v61, %v1353_v62  ;;  %v7620_v2 = vcombine.low %v1349_v61, %v1353_v62  ;;  %v8650_v61 = vld [vmem:[%s9253_s6 + $0xc0] sm:$0xff]  }
 0xb21   : > { %v2598_v14 = vpack.c.bf16 %v2597_v13, %v2596_v12  ;;  %v8651_v62 = vld [vmem:[%s9253_s6] sm:$0xff]  }
 0xb23   : > { %8347 = vmatmul.mubr.msk.bf16.vlgmr.msra.gmra.mxu0 %vm1862_vm1, %v2598_v14 }
 0xb24   : > { %2905 = vmatprep.mubr.bf16.mxu0 %v9179_v57  ;;  %2886 = vmatpush1.bf16.msra.mxu0 %v7616_v48  ;;  %v8639_v48 = vld [vmem:[%s9253_s6 + $0x18] sm:$0xff]  }
 0xb25   : > { %2887 = vmatprep.subr.bf16.mxu0 %v7609_v55  ;;  %v8645_v55 = vld [vmem:[%s9253_s6 + $0x48] sm:$0xff]  }
 0xb28   : > { %2888 = vmatpush1.bf16.msra.mxu0 %v7608_v58  ;;  %v8647_v58 = vld [vmem:[%s9253_s6 + $0x8] sm:$0xff]  }
 0xb29   : > { %2971 = vmatprep.subr.bf16.mxu0 %v7621_v1  ;;  %v8653_v1 = vld [vmem:[%s9253_s6 + $0x178] sm:$0xff]  }
 0xbe3   : > { %v2639_v16 = vpop.f32.mrf.mxu0 }
 0xbe5   : > { %v8348_v17 = vpop.f32.mrf.mxu0 }
 0xbe7   : > { %v2642_v8 = vpop.f32.mrf.mxu0 }
 0xbe8   : > { %v2646_v18 = vpack.c.bf16 %v2642_v8, %v2639_v16  ;;  %v7607_v8 = vld [vmem:[%s9238_s19] ss:$0 sm:$0xff] }
 0xbe9   : > { %v8349_v19 = vpop.f32.mrf.mxu0 }
 0xbea   : > { %8353 = vmatmul.mubr.msk.bf16.vlgmr.msra.gmra.mxu1 %vm2018_vm3, %v2646_v18  ;;  %v1341_v19 = vld [vmem:[%s9243_s24 + $0x10] sm:$0xff] }
 0xbeb   : > { %2929 = vmatpush1.bf16.msra.mxu1 %v7618_v49  ;;  %2948 = vmatprep.mubr.bf16.mxu1 %v9179_v57  ;;  %v8640_v49 = vld [vmem:[%s9253_s6 + $0x98] sm:$0xff]  }
 0xbec   : > { %2930 = vmatprep.subr.bf16.mxu1 %v7611_v59  ;;  %v8648_v59 = vld [vmem:[%s9253_s6 + $0x88] sm:$0xff]  }
 0xbef   : > { %2931 = vmatpush1.bf16.msra.mxu1 %v7610_v60  ;;  %v8649_v60 = vld [vmem:[%s9253_s6 + $0x40] sm:$0xff]  }
 0xcaa   : > { %v2687_v21 = vpop.f32.mrf.mxu1 }
 0xcab   : > { %v2694_v22 = vadd.f32 %v2687_v21, %v2523_v52  ;;  %v1354_v52 = vld [vmem:[%s9243_s24 + $0x78] sm:$0xff] }
 0xcac   : > { %v8354_v23 = vpop.f32.mrf.mxu1  ;;  %v7622_v3 = vcombine.low %v1350_v63, %v1354_v52  ;;  %v1342_v21 = vld [vmem:[%s9243_s24 + $0x18] sm:$0xff] }
 0xcad   : > { %v2702_v24 = vadd.f32 %v7605_v20, %v2694_v22  ;;  %v1346_v22 = vld [vmem:[%s9243_s24 + $0x38] sm:$0xff] }
 0xcae   : > { %v2690_v25 = vpop.f32.mrf.mxu1 }
 0xcaf   : > { %v2695_v26 = vadd.f32 %v2690_v25, %v2524_v4  ;;  %v2704_v27 = vadd.f32 %v2702_v24, %v9480_v42  ;;  %v7623_v4 = vcombine.high %v1350_v63, %v1354_v52  ;;  %v8652_v63 = vld [vmem:[%s9253_s6 + $0x80] sm:$0xff]   ;;  %v8654_v52 = vld [vmem:[%s9253_s6 + $0x1f8] sm:$0xff]  }
 0xcb0   : > { %v8355_v28 = vpop.f32.mrf.mxu1 }
 0xcb1   : > { %v2703_v29 = vadd.f32 %v7605_v20, %v2695_v26  ;;  %v2706_v30 = vsel %vm1907_vm2, %v2704_v27, 0.0  ;;  %3014 = vmatprep.subr.bf16.mxu1 %v7623_v4  ;;  %v1345_v20 = vld [vmem:[%s9243_s24 + $0x30] sm:$0xff] }
 0xcb2   : > { %2707 = vadd.xlane.f32.xlu0 %v2706_v30  ;;  %v7613_v26 = vcombine.high %v1341_v19, %v1345_v20  ;;  %v7612_v28 = vcombine.low %v1341_v19, %v1345_v20  ;;  %v8621_v30 = vld [vmem:[%s9253_s6 + $0x78] sm:$0xff]  }
 0xcb3   : > { %v2705_v31 = vadd.f32 %v2703_v29, %v9482_v43  ;;  %v7614_v29 = vcombine.low %v1342_v21, %v1346_v22 }
 0xcb5   : > { %v2709_v32 = vsel %vm1907_vm2, %v2705_v31, 0.0 }
 0xcb6   : > { %2710 = vadd.xlane.f32.xlu0 %v2709_v32  ;;  %v8623_v32 = vld [vmem:[%s9253_s6 + $0x38] sm:$0xff]  }
 0xd3b   : > { %v2708_v33 = vpop.xlane.xlu0 %2707 }
 0xd3c   : > { %v2712_v34 = vmul.f32 0.03125, %v2708_v33  ;;  %v8624_v33 = vld [vmem:[%s9253_s6 + $0xb8] sm:$0xff]  }
 0xd3e   : > { %v2714_v35 = vsub.f32 %v2704_v27, %v2712_v34  ;;  %v7615_v27 = vcombine.high %v1342_v21, %v1346_v22  ;;  %v8625_v34 = vld [vmem:[%s9253_s6 + $0x70] sm:$0xff]  }
 0xd3f   : > { %v2711_v36 = vpop.xlane.xlu0 %2710 }
 0xd40   : > { %v2713_v37 = vmul.f32 0.03125, %v2711_v36  ;;  %v2716_v42 = vmul.f32 %v2714_v35, %v2714_v35  ;;  %v8627_v36 = vld [vmem:[%s9253_s6 + $0x30] sm:$0xff]  }
 0xd42   : > { %v2715_v38 = vsub.f32 %v2705_v31, %v2713_v37  ;;  %v2718_v39 = vsel %vm1907_vm2, %v2716_v42, 0.0  ;;  %v8622_v31 = vld [vmem:[%s9253_s6 + $0xf8] sm:$0xff]   ;;  %v8628_v37 = vld [vmem:[%s9253_s6 + $0xb0] sm:$0xff]   ;;  %v8629_v42 = vld [vmem:[%s9253_s6 + $0x68] sm:$0xff]  }
 0xd43   : > { %2719 = vadd.xlane.f32.xlu0 %v2718_v39  ;;  %v8631_v39 = vld [vmem:[%s9253_s6 + $0x28] sm:$0xff]  }
 0xd44   : > { %v2717_v43 = vmul.f32 %v2715_v38, %v2715_v38 }
 0xd46   : > { %v2721_v40 = vsel %vm1907_vm2, %v2717_v43, 0.0  ;;  %v8632_v43 = vld [vmem:[%s9253_s6 + $0xa8] sm:$0xff]  }
 0xd47   : > { %2722 = vadd.xlane.f32.xlu0 %v2721_v40  ;;  %v8633_v40 = vld [vmem:[%s9253_s6 + $0x60] sm:$0xff]  }
 0xdcc   : > { %v2720_v6 = vpop.xlane.xlu0 %2719 }
 0xdcd   : > { %v2724_v7 = vmul.f32 0.03125, %v2720_v6 }
 0xdcf   : > { %v2726_v9 = vadd.f32 1e-05, %v2724_v7  ;;  %v9673_v7 = vld [vmem:[%s10484_s0] sm:$0xff]  ;;  %s10485_s0 = sld [smem:[#allocation12_spill]] }
 0xdd0   : > { %v2723_v10 = vpop.xlane.xlu0 %2722 }
 0xdd1   : > { %8857 = vrsqrt.f32 %v2726_v9  ;;  %v2725_v11 = vmul.f32 0.03125, %v2723_v10 }
 0xdd3   : > { %v2727_v12 = vadd.f32 1e-05, %v2725_v11 }
 0xdd5   : > { %8859 = vrsqrt.f32 %v2727_v12 }
 0xdde   : > { %v8858_v13 = vpop.eup %8857 }
 0xddf   : > { %v2730_v14 = vmul.f32 %v8858_v13, %v2714_v35  ;;  %v8626_v35 = vld [vmem:[%s9253_s6 + $0xf0] sm:$0xff]  }
 0xde1   : > { %v2738_v17 = vmul.f32 %v7606_v15, %v2730_v14 }
 0xde2   : > { %v8860_v5 = vpop.eup %8859 }
 0xde3   : > { %v2731_v16 = vmul.f32 %v8860_v5, %v2715_v38  ;;  %v9618_v23 = vadd.f32 %v7607_v8, %v2738_v17  ;;  %v8630_v38 = vld [vmem:[%s9253_s6 + $0xe8] sm:$0xff]  }
 0xde5   : > { %v2739_v18 = vmul.f32 %v7606_v15, %v2731_v16 }
 0xde7   : > { %v9620_v24 = vadd.f32 %v7607_v8, %v2739_v18 }
 0xde9   : > { %v2748_v25 = vpack.c.bf16 %v9620_v24, %v9618_v23 }
 0xdeb   : > { %7624 = vmatmul.mubr.msk.bf16.vlgmr.msra.gmra.mxu0 %vm1907_vm2, %v2748_v25  ;;  %7625 = vmatmul.mubr.msk.bf16.vlgmr.msra.gmra.mxu1 %vm1907_vm2, %v2748_v25 }
 0xdec   : > { %2972 = vmatpush1.bf16.msra.mxu0 %v7620_v2  ;;  %3015 = vmatpush1.bf16.msra.mxu1 %v7622_v3  ;;  %v2750_v2 = vlaneseq }
 0xded   : > { %2973 = vmatprep.subr.bf16.mxu0 %v7613_v26  ;;  %3016 = vmatprep.subr.bf16.mxu1 %v7615_v27 }
 0xdee   : > { %2991 = vmatprep.mubr.bf16.mxu0 %v9179_v57  ;;  %3034 = vmatprep.mubr.bf16.mxu1 %v9179_v57  ;;  %v9664_v3 = vshrl.u32 %v2750_v2, 7 }
 0xdf0   : > { %2974 = vmatpush1.bf16.msra.mxu0 %v7612_v28  ;;  %3017 = vmatpush1.bf16.msra.mxu1 %v7614_v29  ;;  %v9667_v4 = vsub.s32 0, %v9664_v3  ;;  %v9670_v6 = vsub.s32 2, %v9664_v3  ;;  %v9676_v9 = vsub.s32 1, %v9664_v3  ;;  %v9679_v10 = vsub.s32 3, %v9664_v3 }
 0xdf1   : > { %7946 = vmatprep.subr.bf16.mxu0 %v8621_v30  ;;  %7968 = vmatprep.subr.bf16.mxu1 %v8622_v31  ;;  %v9693_v21 = vsub.s32 5, %v9664_v3  ;;  %v9698_v30 = vsub.s32 7, %v9664_v3  ;;  %v9722_v2 = vsub.s32 4, %v9664_v3 }
 0xdf2   : > { %v2753_v11 = vrot.slane %v9673_v7, %v9667_v4  ;;  %v2761_v12 = vrot.slane %v9673_v7, %v9670_v6  ;;  %v2757_v15 = vrot.slane %v9673_v7, %v9676_v9  ;;  %v2765_v5 = vrot.slane %v9673_v7, %v9679_v10 }
 0xdf3   : > { %7626 = vmatmul.mubr.msk.bf16.vlgmr.msra.gmra.mxu0 %vm1907_vm2, %v2748_v25  ;;  %7627 = vmatmul.mubr.msk.bf16.vlgmr.msra.gmra.mxu1 %vm1907_vm2, %v2748_v25 }
 0xdf4   : > { %7947 = vmatpush3.bf16.msra.mxu0 %v8623_v32  ;;  %7969 = vmatpush3.bf16.msra.mxu1 %v8624_v33 }
 0xdf5   : > { %7948 = vmatprep.subr.bf16.mxu0 %v8625_v34  ;;  %7970 = vmatprep.subr.bf16.mxu1 %v8626_v35 }
 0xdf8   : > { %7949 = vmatpush3.bf16.msra.mxu0 %v8627_v36  ;;  %7971 = vmatpush3.bf16.msra.mxu1 %v8628_v37  ;;  %v2773_v36 = vrot.slane %v9673_v7, %v9693_v21 }
 0xdf9   : > { %7950 = vmatprep.subr.bf16.mxu0 %v8629_v42  ;;  %7972 = vmatprep.subr.bf16.mxu1 %v8630_v38 }
 0xdfc   : > { %7951 = vmatpush3.bf16.msra.mxu0 %v8631_v39  ;;  %7973 = vmatpush3.bf16.msra.mxu1 %v8632_v43 }
 0xdfd   : > { %7952 = vmatprep.subr.bf16.mxu0 %v8633_v40  ;;  %7974 = vmatprep.subr.bf16.mxu1 %v8634_v41  ;;  %v2781_v40 = vrot.slane %v9673_v7, %v9698_v30 }
 0xe00   : > { %7953 = vmatpush3.bf16.msra.mxu0 %v8635_v44  ;;  %7975 = vmatpush3.bf16.msra.mxu1 %v8636_v45 }
 0xe01   : > { %7954 = vmatprep.subr.bf16.mxu0 %v8637_v46  ;;  %7976 = vmatprep.subr.bf16.mxu1 %v8638_v47 }
 0xe04   : > { %7955 = vmatpush3.bf16.msra.mxu0 %v8639_v48  ;;  %7977 = vmatpush3.bf16.msra.mxu1 %v8640_v49 }
 0xe05   : > { %7956 = vmatprep.subr.bf16.mxu0 %v8641_v50  ;;  %7978 = vmatprep.subr.bf16.mxu1 %v8642_v51 }
 0xe08   : > { %7957 = vmatpush3.bf16.msra.mxu0 %v8643_v53  ;;  %7979 = vmatpush3.bf16.msra.mxu1 %v8644_v54 }
 0xe09   : > { %7958 = vmatprep.subr.bf16.mxu0 %v8645_v55  ;;  %7980 = vmatprep.subr.bf16.mxu1 %v8646_v56 }
 0xe0c   : > { %7959 = vmatpush3.bf16.msra.mxu0 %v8647_v58  ;;  %7981 = vmatpush3.bf16.msra.mxu1 %v8648_v59 }
 0xe0d   : > { %7960 = vmatprep.subr.bf16.mxu0 %v8649_v60  ;;  %7982 = vmatprep.subr.bf16.mxu1 %v8650_v61 }
 0xe10   : > { %7961 = vmatpush3.bf16.msra.mxu0 %v8651_v62  ;;  %7983 = vmatpush3.bf16.msra.mxu1 %v8652_v63 }
 0xe11   : > { %7990 = vmatprep.subr.bf16.mxu0 %v8653_v1  ;;  %8012 = vmatprep.subr.bf16.mxu1 %v8654_v52 }
 0xeab   : > { %v2907_v13 = vpop.f32.mrf.mxu0  ;;  %v2950_v14 = vpop.f32.mrf.mxu1 }
 0xeac   : > { %v2908_v16 = vadd.f32 %v2907_v13, %v2753_v11  ;;  %v9689_v17 = vadd.f32 %v2950_v14, %v2761_v12 }
 0xead   : > { %v2909_v8 = vpop.f32.mrf.mxu0  ;;  %v2952_v18 = vpop.f32.mrf.mxu1 }
 0xeae   : > { %v3061_v19 = vmul.f32 0.70710677, %v2908_v16  ;;  %v3063_v20 = vmul.f32 0.70710677, %v9689_v17  ;;  %v2910_v22 = vadd.f32 %v2909_v8, %v2757_v15  ;;  %v9695_v25 = vadd.f32 %v2952_v18, %v2765_v5 }
 0xeaf   : > { %v2911_v26 = vpop.f32.mrf.mxu0  ;;  %v2954_v27 = vpop.f32.mrf.mxu1  ;;  %v3045_v13 = vmul.f32 0.5, %v2908_v16  ;;  %v3047_v16 = vmul.f32 0.5, %v9689_v17 }
 0xeb0   : > { %v2912_v28 = vadd.f32 %v2911_v26, %v2753_v11  ;;  %v2955_v29 = vadd.f32 %v2954_v27, %v2761_v12  ;;  %8861 = verf.f32 %v3061_v19  ;;  %v3062_v31 = vmul.f32 0.70710677, %v2910_v22 }
 0xeb1   : > { %v2913_v32 = vpop.f32.mrf.mxu0  ;;  %v2956_v33 = vpop.f32.mrf.mxu1  ;;  %8863 = verf.f32 %v3063_v20  ;;  %v3064_v34 = vmul.f32 0.70710677, %v9695_v25  ;;  %v9725_v11 = vsub.s32 6, %v9664_v3  ;;  %v3046_v14 = vmul.f32 0.5, %v2910_v22 }
 0xeb2   : > { %v3069_v35 = vmul.f32 0.70710677, %v2912_v28  ;;  %8865 = verf.f32 %v3062_v31  ;;  %v3071_v37 = vmul.f32 0.70710677, %v2955_v29  ;;  %v2914_v42 = vadd.f32 %v2913_v32, %v2757_v15 }
 0xeb3   : > { %v2957_v38 = vadd.f32 %v2956_v33, %v2765_v5  ;;  %v9703_v39 = vpop.f32.mrf.mxu0  ;;  %v9705_v43 = vpop.f32.mrf.mxu1  ;;  %8867 = verf.f32 %v3064_v34  ;;  %v3053_v20 = vmul.f32 0.5, %v2912_v28  ;;  %v3055_v32 = vmul.f32 0.5, %v2955_v29 }
 0xeb4   : > { %8869 = verf.f32 %v3069_v35  ;;  %v3070_v41 = vmul.f32 0.70710677, %v2914_v42  ;;  %v3054_v33 = vmul.f32 0.5, %v2914_v42  ;;  %v3048_v35 = vmul.f32 0.5, %v9695_v25 }
 0xeb5   : > { %v2995_v44 = vpop.f32.mrf.mxu0  ;;  %v3038_v45 = vpop.f32.mrf.mxu1  ;;  %8871 = verf.f32 %v3071_v37  ;;  %v3072_v46 = vmul.f32 0.70710677, %v2957_v38  ;;  %v2769_v29 = vrot.slane %v9673_v7, %v9722_v2 }
 0xeb6   : > { %8873 = verf.f32 %v3070_v41  ;;  %v9709_v47 = vadd.f32 %v2995_v44, %v2773_v36  ;;  %v9711_v50 = vadd.f32 %v3038_v45, %v2781_v40 }
 0xeb7   : > { %v2997_v48 = vpop.f32.mrf.mxu0  ;;  %v3040_v49 = vpop.f32.mrf.mxu1  ;;  %8875 = verf.f32 %v3072_v46 }
 0xeb8   : > { %v3066_v51 = vmul.f32 0.70710677, %v9709_v47  ;;  %v3068_v55 = vmul.f32 0.70710677, %v9711_v50 }
 0xeb9   : > { %v2999_v53 = vpop.f32.mrf.mxu0  ;;  %v3042_v54 = vpop.f32.mrf.mxu1 }
 0xeba   : > { %8877 = verf.f32 %v3066_v51  ;;  %v9715_v56 = vadd.f32 %v2999_v53, %v2773_v36  ;;  %v9717_v58 = vadd.f32 %v3042_v54, %v2781_v40  ;;  %v3056_v36 = vmul.f32 0.5, %v2957_v38  ;;  %v8655_v51 = vld [vmem:[%s9253_s6 + $0x138] sm:$0xff]  }
 0xebb   : > { %8879 = verf.f32 %v3068_v55  ;;  %v2777_v38 = vrot.slane %v9673_v7, %v9725_v11  ;;  %v9734_v54 = vadd.f32 %v2997_v48, %v2769_v29 }
 0xebc   : > { %v3074_v60 = vmul.f32 0.70710677, %v9715_v56  ;;  %v3076_v62 = vmul.f32 0.70710677, %v9717_v58 }
 0xebd   : > { %v8862_v59 = vpop.eup %8861  ;;  %v9745_v48 = vadd.f32 %v9705_v43, %v2777_v38  ;;  %v3052_v43 = vmul.f32 0.5, %v9711_v50  ;;  %v8663_v50 = vld [vmem:[%s9253_s6 + $0x128] sm:$0xff]  }
 0xebe   : > { %v8864_v61 = vpop.eup %8863  ;;  %8881 = verf.f32 %v3074_v60  ;;  %v3093_v18 = vadd.f32 1.0, %v8862_v59  ;;  %v8656_v59 = vld [vmem:[%s9253_s6 + $0x1b8] sm:$0xff]   ;;  %v8657_v60 = vld [vmem:[%s9253_s6 + $0x170] sm:$0xff]  }
 0xebf   : > { %v8866_v63 = vpop.eup %8865  ;;  %8883 = verf.f32 %v3076_v62  ;;  %v3095_v31 = vadd.f32 1.0, %v8864_v61  ;;  %v9738_v62 = vadd.f32 %v3040_v49, %v2777_v38  ;;  %v8660_v49 = vld [vmem:[%s9253_s6 + $0x1b0] sm:$0xff]   ;;  %v8677_v38 = vld [vmem:[%s9253_s6 + $0x148] sm:$0xff]  }
 0xec0   : > { %v8868_v1 = vpop.eup %8867  ;;  %v3094_v15 = vadd.f32 1.0, %v8866_v63  ;;  %v3109_v28 = vmul.f32 %v3093_v18, %v3045_v13  ;;  %v8658_v63 = vld [vmem:[%s9253_s6 + $0x1f0] sm:$0xff]   ;;  %v8661_v18 = vld [vmem:[%s9253_s6 + $0x168] sm:$0xff]  }
 0xec1   : > { %v8870_v52 = vpop.eup %8869  ;;  %v3096_v19 = vadd.f32 1.0, %v8868_v1  ;;  %v3111_v25 = vmul.f32 %v3095_v31, %v3047_v16  ;;  %v9742_v1 = vadd.f32 %v9703_v39, %v2769_v29  ;;  %v8659_v13 = vld [vmem:[%s9253_s6 + $0x130] sm:$0xff]   ;;  %v3073_v39 = vmul.f32 0.70710677, %v9734_v54  ;;  %v8667_v16 = vld [vmem:[%s9253_s6 + $0x120] sm:$0xff]  }
 0xec2   : > { %v8872_v12 = vpop.eup %8871  ;;  %v3101_v5 = vadd.f32 1.0, %v8870_v52  ;;  %v3110_v22 = vmul.f32 %v3094_v15, %v3046_v14  ;;  %v3050_v15 = vmul.f32 0.5, %v9709_v47  ;;  %v8662_v47 = vld [vmem:[%s9253_s6 + $0x1e8] sm:$0xff]   ;;  %v8674_v29 = vld [vmem:[%s9253_s6 + $0x1d0] sm:$0xff]  }
 0xec3   : > { %v8874_v8 = vpop.eup %8873  ;;  %v3103_v26 = vadd.f32 1.0, %v8872_v12  ;;  %v3112_v44 = vmul.f32 %v3096_v19, %v3048_v35  ;;  %v3075_v19 = vmul.f32 0.70710677, %v9738_v62  ;;  %8885 = verf.f32 %v3073_v39  ;;  %v8664_v35 = vld [vmem:[%s9253_s6 + $0x1a8] sm:$0xff]  }
 0xec4   : > { %v8876_v27 = vpop.eup %8875  ;;  %v3102_v34 = vadd.f32 1.0, %v8874_v8  ;;  %v3117_v3 = vmul.f32 %v3101_v5, %v3053_v20  ;;  %v3058_v5 = vmul.f32 0.5, %v9715_v56  ;;  %v3060_v20 = vmul.f32 0.5, %v9717_v58 }
 0xec5   : > { %v3104_v37 = vadd.f32 1.0, %v8876_v27  ;;  %v3119_v40 = vmul.f32 %v3103_v26, %v3055_v32  ;;  %v3065_v27 = vmul.f32 0.70710677, %v9742_v1  ;;  %v3067_v32 = vmul.f32 0.70710677, %v9745_v48 }
 0xec6   : > { %v3118_v41 = vmul.f32 %v3102_v34, %v3054_v33  ;;  %v3125_v53 = vpack.c.bf16 %v3117_v3, %v3109_v28  ;;  %v8665_v3 = vld [vmem:[%s9253_s6 + $0x160] sm:$0xff]   ;;  %8887 = verf.f32 %v3075_v19  ;;  %v8671_v28 = vld [vmem:[%s9253_s6 + $0x118] sm:$0xff]   ;;  %v3049_v39 = vmul.f32 0.5, %v9742_v1  ;;  %v8685_v1 = vld [vmem:[%s10485_s0 + $0x8] sm:$0xff]  }
 0xec7   : > { %v3120_v45 = vmul.f32 %v3104_v37, %v3056_v36  ;;  %v8878_v42 = vpop.eup %8877  ;;  %v3127_v61 = vpack.c.bf16 %v3119_v40, %v3111_v25  ;;  %v8666_v37 = vld [vmem:[%s9253_s6 + $0x1e0] sm:$0xff]   ;;  %8889 = verf.f32 %v3065_v27  ;;  %v8669_v40 = vld [vmem:[%s9253_s6 + $0x158] sm:$0xff]   ;;  %v8676_v25 = vld [vmem:[%s9253_s6 + $0x190] sm:$0xff]  }
 0xec8   : > { %v3126_v46 = vpack.c.bf16 %v3118_v41, %v3110_v22  ;;  %v8880_v17 = vpop.eup %8879  ;;  %v3098_v7 = vadd.f32 1.0, %v8878_v42  ;;  %8891 = verf.f32 %v3067_v32  ;;  %v8668_v22 = vld [vmem:[%s9253_s6 + $0x1a0] sm:$0xff]   ;;  %v8670_v41 = vld [vmem:[%s9253_s6 + $0x1d8] sm:$0xff]   ;;  %v8675_v42 = vld [vmem:[%s9253_s6 + $0x110] sm:$0xff]  }
 0xec9   : > { %v3128_v55 = vpack.c.bf16 %v3120_v45, %v3112_v44  ;;  %v3100_v12 = vadd.f32 1.0, %v8880_v17  ;;  %v8672_v44 = vld [vmem:[%s9253_s6 + $0x198] sm:$0xff]   ;;  %v8673_v45 = vld [vmem:[%s9253_s6 + $0x150] sm:$0xff]  }
 0xeca   : > { %3555 = vmatprep.mubr.bf16.mxu0 %v3126_v46  ;;  %v3114_v31 = vmul.f32 %v3098_v7, %v3050_v15  ;;  %v8683_v15 = vld [vmem:[%s9253_s6 + $0x100] sm:$0xff]  }
 0xecb   : > { %3596 = vmatprep.mubr.bf16.mxu1 %v3128_v55  ;;  %3556 = vmatmul.mubr.bf16.vlgmr.msra.gmra.mxu0 %v3125_v53  ;;  %v8882_v52 = vpop.eup %8881  ;;  %v3116_v33 = vmul.f32 %v3100_v12, %v3052_v43  ;;  %v8679_v55 = vld [vmem:[%s9253_s6 + $0x108] sm:$0xff]  }
 0xecc   : > { %3597 = vmatmul.mubr.bf16.vlgmr.msra.gmra.mxu1 %v3127_v61  ;;  %7991 = vmatpush3.bf16.msra.mxu0 %v8655_v51  ;;  %v8884_v14 = vpop.eup %8883  ;;  %v3106_v8 = vadd.f32 1.0, %v8882_v52  ;;  %v8678_v51 = vld [vmem:[%s9253_s6 + $0x1c8] sm:$0xff]   ;;  %v8682_v52 = vld [vmem:[%s9253_s6 + $0x1c0] sm:$0xff]  }
 0xecd   : > { %8013 = vmatpush3.bf16.msra.mxu1 %v8656_v59  ;;  %7992 = vmatprep.subr.bf16.mxu0 %v8657_v60  ;;  %v3108_v26 = vadd.f32 1.0, %v8884_v14  ;;  %v8680_v61 = vld [vmem:[%s9253_s6 + $0x188] sm:$0xff]   ;;  %v3059_v14 = vmul.f32 0.5, %v9738_v62 }
 0xece   : > { %8014 = vmatprep.subr.bf16.mxu1 %v8658_v63  ;;  %v3122_v56 = vmul.f32 %v3106_v8, %v3058_v5  ;;  %v8681_v63 = vld [vmem:[%s9253_s6 + $0x140] sm:$0xff]  }
 0xecf   : > { %v3124_v34 = vmul.f32 %v3108_v26, %v3060_v20  ;;  %v8684_v8 = vld [vmem:[%s9253_s6 + $0x180] sm:$0xff]  }
 0xed0   : > { %7993 = vmatpush3.bf16.msra.mxu0 %v8659_v13  ;;  %v3130_v58 = vpack.c.bf16 %v3122_v56, %v3114_v31  ;;  %v8886_v46 = vpop.eup %8885  ;;  %v3057_v13 = vmul.f32 0.5, %v9734_v54 }
 0xed1   : > { %8015 = vmatpush3.bf16.msra.mxu1 %v8660_v49  ;;  %7994 = vmatprep.subr.bf16.mxu0 %v8661_v18  ;;  %v3132_v36 = vpack.c.bf16 %v3124_v34, %v3116_v33  ;;  %v3105_v60 = vadd.f32 1.0, %v8886_v46  ;;  %v3051_v18 = vmul.f32 0.5, %v9745_v48  ;;  %v8686_v48 = vld [vmem:[%s10485_s0] sm:$0xff]   ;;  %s10502_s0 = sld [smem:[#allocation24_spill]] }
 0xed2   : > { %8016 = vmatprep.subr.bf16.mxu1 %v8662_v47  ;;  %3637 = vmatprep.mubr.bf16.mxu0 %v3130_v58  ;;  %v7628_v34 = vld [vmem:[%s10486_s16] ss:$0 sm:$0xff]  ;;  %s10488_s16 = sld [smem:[#allocation16_spill]] }
 0xed3   : > { %3678 = vmatprep.mubr.bf16.mxu1 %v3132_v36  ;;  %v8888_v17 = vpop.eup %8887  ;;  %v3121_v5 = vmul.f32 %v3105_v60, %v3057_v13 }
 0xed4   : > { %7995 = vmatpush3.bf16.msra.mxu0 %v8663_v50  ;;  %v8890_v53 = vpop.eup %8889  ;;  %v3107_v7 = vadd.f32 1.0, %v8888_v17 }
 0xed5   : > { %8017 = vmatpush3.bf16.msra.mxu1 %v8664_v35  ;;  %7996 = vmatprep.subr.bf16.mxu0 %v8665_v3  ;;  %v8892_v59 = vpop.eup %8891  ;;  %v3097_v12 = vadd.f32 1.0, %v8890_v53 }
 0xed6   : > { %8018 = vmatprep.subr.bf16.mxu1 %v8666_v37  ;;  %v3099_v49 = vadd.f32 1.0, %v8892_v59  ;;  %v3123_v43 = vmul.f32 %v3107_v7, %v3059_v14 }
 0xed7   : > { %v3113_v19 = vmul.f32 %v3097_v12, %v3049_v39  ;;  %v7693_v12 = vld [vmem:[%s10487_s18] ss:$0 sm:$0xff]  ;;  %s10489_s18 = sld [smem:[#allocation14_spill]] }
 0xed8   : > { %7997 = vmatpush3.bf16.msra.mxu0 %v8667_v16  ;;  %v3115_v20 = vmul.f32 %v3099_v49, %v3051_v18 }
 0xed9   : > { %8019 = vmatpush3.bf16.msra.mxu1 %v8668_v22  ;;  %7998 = vmatprep.subr.bf16.mxu0 %v8669_v40  ;;  %v3129_v54 = vpack.c.bf16 %v3121_v5, %v3113_v19 }
 0xeda   : > { %8020 = vmatprep.subr.bf16.mxu1 %v8670_v41  ;;  %v3131_v62 = vpack.c.bf16 %v3123_v43, %v3115_v20 }
 0xedc   : > { %7999 = vmatpush3.bf16.msra.mxu0 %v8671_v28 }
 0xedd   : > { %8021 = vmatpush3.bf16.msra.mxu1 %v8672_v44  ;;  %8000 = vmatprep.subr.bf16.mxu0 %v8673_v45 }
 0xede   : > { %8022 = vmatprep.subr.bf16.mxu1 %v8674_v29 }
 0xee0   : > { %8001 = vmatpush3.bf16.msra.mxu0 %v8675_v42 }
 0xee1   : > { %8023 = vmatpush3.bf16.msra.mxu1 %v8676_v25  ;;  %8002 = vmatprep.subr.bf16.mxu0 %v8677_v38 }
 0xee2   : > { %8024 = vmatprep.subr.bf16.mxu1 %v8678_v51 }
 0xee4   : > { %8003 = vmatpush3.bf16.msra.mxu0 %v8679_v55 }
 0xee5   : > { %8025 = vmatpush3.bf16.msra.mxu1 %v8680_v61  ;;  %8004 = vmatprep.subr.bf16.mxu0 %v8681_v63 }
 0xee6   : > { %8026 = vmatprep.subr.bf16.mxu1 %v8682_v52 }
 0xee8   : > { %8005 = vmatpush3.bf16.msra.mxu0 %v8683_v15 }
 0xee9   : > { %8027 = vmatpush3.bf16.msra.mxu1 %v8684_v8  ;;  %8356 = vmatprep.subr.bf16.mxu0 %v9166_v0 }
 0xeea   : > { %8364 = vmatprep.subr.bf16.mxu1 %v9166_v0 }
 0xeeb   : > { %3638 = vmatmul.mubr.bf16.vlgmr.msra.gmra.mxu0 %v3129_v54 }
 0xeec   : > { %3679 = vmatmul.mubr.bf16.vlgmr.msra.gmra.mxu1 %v3131_v62  ;;  %8360 = vmatprep.mubr.msk.bf16.mxu0 %vm9167_vm0, %v9166_v0 }
 0xeed   : > { %8368 = vmatprep.mubr.msk.bf16.mxu1 %vm9167_vm0, %v9166_v0  ;;  %8357 = vmatpush3.bf16.msra.mxu0 %v8685_v1 }
 0xeee   : > { %8358 = vmatprep.subr.bf16.mxu0 %v9166_v0 }
 0xef1   : > { %8359 = vmatpush3.bf16.msra.mxu0 %v8686_v48 }
 0xef2   : > { %8372 = vmatprep.subr.bf16.mxu0 %v9166_v0 }
 0xf8b   : > { %v7962_v26 = vpop.f32.mrf.mxu0 }
 0xf8c   : > { %v7984_v47 = vpop.f32.mrf.mxu1 }
 0xf8d   : > { %v7963_v27 = vpop.f32.mrf.mxu0 }
 0xf8e   : > { %v7985_v31 = vpop.f32.mrf.mxu1  ;;  %v7964_v32 = vadd.f32 %v7963_v27, %v7962_v26  ;;  %v8688_v27 = vld [vmem:[%s10488_s16] sm:$0xff]  }
 0xf8f   : > { %v7965_v56 = vpop.f32.mrf.mxu0  ;;  %v7986_v37 = vadd.f32 %v7985_v31, %v7984_v47  ;;  %v8687_v47 = vld [vmem:[%s10488_s16 + $0x8] sm:$0xff]  }
 0xf90   : > { %v7987_v33 = vpop.f32.mrf.mxu1  ;;  %v3558_v58 = vadd.f32 %v7964_v32, %v7628_v34  ;;  %8365 = vmatpush3.bf16.msra.mxu1 %v8687_v47 }
 0xf91   : > { %v7966_v50 = vpop.f32.mrf.mxu0  ;;  %8366 = vmatprep.subr.bf16.mxu1 %v9166_v0 }
 0xf92   : > { %v7967_v35 = vadd.f32 %v7966_v50, %v7965_v56  ;;  %v7988_v3 = vpop.f32.mrf.mxu1  ;;  %v3599_v40 = vadd.f32 %v7986_v37, %v3558_v58 }
 0xf93   : > { %v7989_v29 = vadd.f32 %v7988_v3, %v7987_v33  ;;  %v7697_v3 = vld [vmem:[%s10489_s18] ss:$0 sm:$0xff]  ;;  %s10494_s18 = smov 72  }
 0xf94   : > { %v3561_v41 = vadd.f32 %v7967_v35, %v7628_v34  ;;  %8367 = vmatpush3.bf16.msra.mxu1 %v8688_v27 }
 0xf95   : > { %8378 = vmatprep.subr.bf16.mxu1 %v9166_v0 }
 0xf96   : > { %v3602_v46 = vadd.f32 %v7989_v29, %v3561_v41  ;;  %v7699_v29 = vld [vmem:[%s10491_s11] ss:$0 sm:$0xff]  ;;  %s10492_s11 = smov 112  }
 0xfab   : > { %v8006_v36 = vpop.f32.mrf.mxu0 }
 0xfac   : > { %v8028_v16 = vpop.f32.mrf.mxu1 }
 0xfad   : > { %v8007_v22 = vpop.f32.mrf.mxu0 }
 0xfae   : > { %v8008_v28 = vadd.f32 %v8007_v22, %v8006_v36  ;;  %v8029_v44 = vpop.f32.mrf.mxu1  ;;  %v7698_v22 = vld [vmem:[%s10490_s15] ss:$0 sm:$0xff]  ;;  %s10493_s15 = sld [smem:[#allocation18_spill]] }
 0xfaf   : > { %v8009_v45 = vpop.f32.mrf.mxu0  ;;  %v8030_v51 = vadd.f32 %v8029_v44, %v8028_v16 }
 0xfb0   : > { %v3640_v42 = vadd.f32 %v8008_v28, %v3599_v40  ;;  %v8031_v25 = vpop.f32.mrf.mxu1 }
 0xfb1   : > { %v8010_v38 = vpop.f32.mrf.mxu0 }
 0xfb2   : > { %v8011_v17 = vadd.f32 %v8010_v38, %v8009_v45  ;;  %v8032_v53 = vpop.f32.mrf.mxu1  ;;  %v3681_v55 = vadd.f32 %v8030_v51, %v3640_v42 }
 0xfb3   : > { %v8033_v60 = vadd.f32 %v8032_v53, %v8031_v25 }
 0xfb4   : > { %v3643_v59 = vadd.f32 %v8011_v17, %v3602_v46  ;;  %v3687_v63 = vadd.f32 %v3681_v55, %v9618_v23 }
 0xfb6   : > { %v3684_v61 = vadd.f32 %v8033_v60, %v3643_v59 }
 0xfb8   : > { %v3688_v7 = vadd.f32 %v3684_v61, %v9620_v24 }
 0xfba   : > { %v3689_v52 = vpack.c.bf16 %v3688_v7, %v3687_v63 }
 0xfbc   : > { %8361 = vmatmul.mubr.msk.bf16.vlgmr.msra.gmra.mxu0 %vm1907_vm2, %v3689_v52 }
 0xfbd   : > { %8374 = vmatprep.mubr.msk.bf16.mxu0 %vm9167_vm0, %v9166_v0 }
0x107c   : > { %v3745_v13 = vpop.f32.mrf.mxu0 }
0x107d   : > { %v3746_v49 = vadd.f32 %v7693_v12, %v3745_v13 }
0x107e   : > { %v8362_v14 = vpop.f32.mrf.mxu0 }
0x107f   : > { %v3752_v15 = vsel %vm1907_vm2, %v3746_v49, 0.0 }
0x1080   : > { %3753 = vadd.xlane.f32.xlu1 %v3752_v15  ;;  %v3748_v39 = vpop.f32.mrf.mxu0 }
0x1081   : > { %v3749_v5 = vadd.f32 %v7693_v12, %v3748_v39 }
0x1082   : > { %v8363_v8 = vpop.f32.mrf.mxu0 }
0x1083   : > { %v3755_v23 = vsel %vm1907_vm2, %v3749_v5, 0.0 }
0x1084   : > { %3756 = vadd.xlane.f32.xlu0 %v3755_v23 }
0x1109   : > { %v3754_v24 = vpop.xlane.xlu1 %3753 }
0x110a   : > { %v3758_v18 = vmul.f32 0.03125, %v3754_v24 }
0x110c   : > { %v3760_v43 = vsub.f32 %v3746_v49, %v3758_v18 }
0x110d   : > { %v3757_v19 = vpop.xlane.xlu0 %3756 }
0x110e   : > { %v3759_v20 = vmul.f32 0.03125, %v3757_v19  ;;  %v3762_v54 = vmul.f32 %v3760_v43, %v3760_v43 }
0x1110   : > { %v3761_v62 = vsub.f32 %v3749_v5, %v3759_v20  ;;  %v3764_v1 = vsel %vm1907_vm2, %v3762_v54, 0.0 }
0x1111   : > { %3765 = vadd.xlane.f32.xlu0 %v3764_v1 }
0x1112   : > { %v3763_v48 = vmul.f32 %v3761_v62, %v3761_v62 }
0x1114   : > { %v3767_v26 = vsel %vm1907_vm2, %v3763_v48, 0.0 }
0x1115   : > { %3768 = vadd.xlane.f32.xlu0 %v3767_v26 }
0x119a   : > { %v3766_v31 = vpop.xlane.xlu0 %3765 }
0x119b   : > { %v3770_v56 = vmul.f32 0.03125, %v3766_v31 }
0x119d   : > { %v3772_v32 = vadd.f32 1e-05, %v3770_v56 }
0x119e   : > { %v3769_v33 = vpop.xlane.xlu0 %3768 }
0x119f   : > { %8893 = vrsqrt.f32 %v3772_v32  ;;  %v3771_v34 = vmul.f32 0.03125, %v3769_v33 }
0x11a1   : > { %v3773_v50 = vadd.f32 1e-05, %v3771_v34 }
0x11a3   : > { %8895 = vrsqrt.f32 %v3773_v50 }
0x11ac   : > { %v8894_v58 = vpop.eup %8893 }
0x11ad   : > { %v3776_v35 = vmul.f32 %v8894_v58, %v3760_v43 }
0x11af   : > { %v3784_v16 = vmul.f32 %v7697_v3, %v3776_v35 }
0x11b0   : > { %v8896_v36 = vpop.eup %8895 }
0x11b1   : > { %v3777_v37 = vmul.f32 %v8896_v36, %v3761_v62  ;;  %v9812_v41 = vadd.f32 %v7698_v22, %v3784_v16 }
0x11b3   : > { %v3785_v40 = vmul.f32 %v7697_v3, %v3777_v37 }
0x11b5   : > { %v9814_v28 = vadd.f32 %v7698_v22, %v3785_v40 }
0x11b7   : > { %v3794_v44 = vpack.c.bf16 %v9814_v28, %v9812_v41 }
0x11b9   : > { %8369 = vmatmul.mubr.msk.bf16.vlgmr.msra.gmra.mxu1 %vm1907_vm2, %v3794_v44 }
0x11ba   : > { %8380 = vmatprep.mubr.msk.bf16.mxu1 %vm9167_vm0, %v9166_v0 }
0x1279   : > { %v3850_v45 = vpop.f32.mrf.mxu1 }
0x127a   : > { %v3851_v38 = vadd.f32 %v7699_v29, %v3850_v45 }
0x127b   : > { %v8370_v42 = vpop.f32.mrf.mxu1 }
0x127d   : > { %v3853_v25 = vpop.f32.mrf.mxu1 }
0x127e   : > { %v3854_v46 = vadd.f32 %v7699_v29, %v3853_v25 }
0x127f   : > { %v8371_v51 = vpop.f32.mrf.mxu1 }
0x1280   : > { %v9822_v17 = vpack.c.bf16 %v3854_v46, %v3851_v38 }
0x1282   : > { %3981 = vrot.lane.b32.xlu1 %v9822_v17, %s10440_s28  ;;  %3859 = vrot.lane.b32.xlu0 %v9822_v17, %s10441_s26  ;;  %s10498_s28 = sld [smem:[#allocation19_spill]] }
0x1283   : > { %s10499_s26 = sld [smem:[#allocation22_spill]] }
0x1286   : > { %3979 = vrot.lane.b32.xlu0 %v9822_v17, %s10442_s1  ;;  %s10501_s1 = sld [smem:[#allocation21_spill]] }
0x12f4   : > { %v3860_v53 = vpop.permute.xlu0 %3859  ;;  %v3982_v59 = vpop.permute.xlu1 %3981 }
0x12f5   : > { %v3865_v55 = vsel %vm2018_vm3, %v3860_v53, 0  ;;  %v3987_v60 = vsel %vm2018_vm3, %v3982_v59, 0  ;;  %v1497_v59 = vld [vmem:[%s10493_s15] sm:$0xf] }
0x12f6   : > { %8373 = vmatpush3.bf16.xpose.msra.mxu0 %v3865_v55 }
0x12f7   : > { %8384 = vmatprep.subr.bf16.mxu0 %v9166_v0 }
0x12f8   : > { %v3980_v61 = vpop.permute.xlu0 %3979 }
0x12fd   : > { %8375 = vmatmul.mubr.msk.bf16.vlgmr.msra.gmra.mxu0 %vm2018_vm3, %v9822_v17 }
0x12fe   : > { %8385 = vmatpush3.bf16.xpose.msra.mxu0 %v3987_v60  ;;  %8386 = vmatprep.mubr.msk.bf16.mxu0 %vm9167_vm0, %v9166_v0  ;;  %v4152_v60 = vsel %vm2262_vm4, %v1497_v59, 0 }
0x12ff   : > { %8396 = vmatprep.subr.bf16.mxu0 %v9166_v0 }
0x1305   : > { %8387 = vmatmul.mubr.msk.bf16.vlgmr.msra.gmra.mxu0 %vm2018_vm3, %v3980_v61  ;;  %v1498_v61 = vld [vmem:[%s10493_s15 + $0x4] sm:$0xf] }
0x1306   : > { %8398 = vmatprep.mubr.msk.bf16.mxu0 %vm9167_vm0, %v9166_v0 }
0x13bd   : > { %v3901_v63 = vpop.f32.mrf.mxu0 }
0x13be   : > { %v3908_v7 = vsel %vm1862_vm1, %v3901_v63, -inf }
0x13bf   : > { %3909 = vmax.xlane.f32.xlu0 %v3908_v7  ;;  %v8376_v52 = vpop.f32.mrf.mxu0 }
0x13c1   : > { %v3904_v12 = vpop.f32.mrf.mxu0 }
0x13c2   : > { %v3911_v13 = vsel %vm1862_vm1, %v3904_v12, -inf }
0x13c3   : > { %3912 = vmax.xlane.f32.xlu1 %v3911_v13  ;;  %v8377_v49 = vpop.f32.mrf.mxu0 }
0x13c5   : > { %v4023_v14 = vpop.f32.mrf.mxu0 }
0x13c6   : > { %v4030_v15 = vsel %vm1862_vm1, %v4023_v14, -inf }
0x13c7   : > { %4031 = vmax.xlane.f32.xlu0 %v4030_v15  ;;  %v8388_v39 = vpop.f32.mrf.mxu0 }
0x13c9   : > { %v4026_v5 = vpop.f32.mrf.mxu0 }
0x13ca   : > { %v4033_v8 = vsel %vm1862_vm1, %v4026_v5, -inf }
0x13cb   : > { %4034 = vmax.xlane.f32.xlu0 %v4033_v8  ;;  %v8389_v23 = vpop.f32.mrf.mxu0 }
0x1448   : > { %v3910_v24 = vpop.xlane.xlu0 %3909 }
0x1449   : > { %v3914_v18 = vsub.f32 %v3901_v63, %v3910_v24  ;;  %v4105_v63 = vsel %vm2262_vm4, %v1498_v61, 0 }
0x144a   : > { %8397 = vmatpush3.bf16.msra.mxu0 %v4105_v63  ;;  %v1499_v63 = vld [vmem:[%s10493_s15 + $0x8] sm:$0xf] }
0x144b   : > { %v3916_v43 = vmul.f32 1.442695, %v3914_v18  ;;  %8408 = vmatprep.subr.bf16.mxu0 %v9166_v0 }
0x144c   : > { %v3913_v19 = vpop.xlane.xlu1 %3912 }
0x144d   : > { %8897 = vpow2.f32 %v3916_v43  ;;  %v3915_v20 = vsub.f32 %v3904_v12, %v3913_v19 }
0x144f   : > { %v3918_v54 = vmul.f32 1.442695, %v3915_v20 }
0x1450   : > { %v4032_v62 = vpop.xlane.xlu0 %4031 }
0x1451   : > { %8899 = vpow2.f32 %v3918_v54  ;;  %v4036_v1 = vsub.f32 %v4023_v14, %v4032_v62 }
0x1453   : > { %v4038_v48 = vmul.f32 1.442695, %v4036_v1 }
0x1454   : > { %v4035_v26 = vpop.xlane.xlu0 %4034 }
0x1455   : > { %8901 = vpow2.f32 %v4038_v48  ;;  %v4037_v47 = vsub.f32 %v4026_v5, %v4035_v26 }
0x1457   : > { %v4040_v27 = vmul.f32 1.442695, %v4037_v47 }
0x1459   : > { %8903 = vpow2.f32 %v4040_v27 }
0x145a   : > { %v8898_v31 = vpop.eup %8897 }
0x145b   : > { %v3920_v56 = vsel %vm1862_vm1, %v8898_v31, 0.0 }
0x145c   : > { %3921 = vadd.xlane.f32.xlu0 %v3920_v56 }
0x145e   : > { %v8900_v32 = vpop.eup %8899 }
0x145f   : > { %v3923_v33 = vsel %vm1862_vm1, %v8900_v32, 0.0 }
0x1460   : > { %3924 = vadd.xlane.f32.xlu0 %v3923_v33 }
0x1462   : > { %v8902_v34 = vpop.eup %8901 }
0x1463   : > { %v4042_v50 = vsel %vm1862_vm1, %v8902_v34, 0.0 }
0x1464   : > { %4043 = vadd.xlane.f32.xlu0 %v4042_v50 }
0x1466   : > { %v8904_v58 = vpop.eup %8903 }
0x1467   : > { %v4045_v35 = vsel %vm1862_vm1, %v8904_v58, 0.0 }
0x1468   : > { %4046 = vadd.xlane.f32.xlu1 %v4045_v35 }
0x1479   : > { %4053 = vrot.lane.b32.xlu1 %v9822_v17, %s10439_s2  ;;  %s10497_s2 = smov 40  }
0x147a   : > { %3931 = vrot.lane.b32.xlu0 %v9822_v17, %s10438_s7  ;;  %s10496_s7 = smov 104  }
0x147d   : > { %4197 = vrot.lane.b32.xlu1 %v9822_v17, %s10437_s10  ;;  %s10495_s10 = smov 48  }
0x147e   : > { %4195 = vrot.lane.b32.xlu0 %v9822_v17, %s10492_s11 }
0x14e5   : > { %v3922_v3 = vpop.xlane.xlu0 %3921 }
0x14e6   : > { %8905 = vrcp.f32 %v3922_v3 }
0x14e9   : > { %v3925_v36 = vpop.xlane.xlu0 %3924 }
0x14ea   : > { %8907 = vrcp.f32 %v3925_v36 }
0x14ed   : > { %v4044_v37 = vpop.xlane.xlu0 %4043 }
0x14ee   : > { %8909 = vrcp.f32 %v4044_v37 }
0x14f1   : > { %v4047_v16 = vpop.xlane.xlu1 %4046  ;;  %v3932_v22 = vpop.permute.xlu0 %3931 }
0x14f2   : > { %8911 = vrcp.f32 %v4047_v16  ;;  %8379 = vmatpush3.bf16.msra.mxu1 %v3932_v22 }
0x14f3   : > { %8390 = vmatprep.subr.bf16.mxu1 %v9166_v0  ;;  %v8906_v40 = vpop.eup %8905 }
0x14f4   : > { %v3928_v45 = vmul.f32 %v8906_v40, %v8898_v31 }
0x14f5   : > { %v4054_v25 = vpop.permute.xlu1 %4053  ;;  %v4196_v18 = vpop.permute.xlu0 %4195 }
0x14f7   : > { %v8908_v44 = vpop.eup %8907 }
0x14f8   : > { %v3929_v29 = vmul.f32 %v8908_v44, %v8900_v32 }
0x14f9   : > { %v4198_v39 = vpop.permute.xlu1 %4197 }
0x14fa   : > { %v3930_v42 = vpack.c.bf16 %v3929_v29, %v3928_v45  ;;  %v4203_v24 = vsel %vm2018_vm3, %v4198_v39, 0 }
0x14fb   : > { %v8910_v38 = vpop.eup %8909 }
0x14fc   : > { %8381 = vmatmul.mubr.msk.bf16.vlgmr.msra.gmra.mxu1 %vm1862_vm1, %v3930_v42  ;;  %v4050_v51 = vmul.f32 %v8910_v38, %v8902_v34 }
0x14fd   : > { %8391 = vmatpush3.bf16.msra.mxu1 %v4054_v25  ;;  %8392 = vmatprep.mubr.msk.bf16.mxu1 %vm9167_vm0, %v9166_v0 }
0x14fe   : > { %8402 = vmatprep.subr.bf16.mxu1 %v9166_v0 }
0x14ff   : > { %v8912_v46 = vpop.eup %8911 }
0x1500   : > { %v4051_v53 = vmul.f32 %v8912_v46, %v8904_v58 }
0x1502   : > { %v4052_v55 = vpack.c.bf16 %v4051_v53, %v4050_v51 }
0x1504   : > { %8393 = vmatmul.mubr.msk.bf16.vlgmr.msra.gmra.mxu1 %vm1862_vm1, %v4052_v55 }
0x1505   : > { %8404 = vmatprep.mubr.msk.bf16.mxu1 %vm9167_vm0, %v9166_v0  ;;  %8403 = vmatpush3.bf16.msra.mxu1 %v4152_v60 }
0x1506   : > { %8414 = vmatprep.subr.bf16.mxu1 %v9166_v0 }
0x15bc   : > { %v3971_v7 = vpop.f32.mrf.mxu1 }
0x15be   : > { %v8382_v52 = vpop.f32.mrf.mxu1 }
0x15c0   : > { %v3974_v12 = vpop.f32.mrf.mxu1 }
0x15c1   : > { %v3978_v13 = vpack.c.bf16 %v3974_v12, %v3971_v7  ;;  %v4321_v7 = vsel %vm2262_vm4, %v1499_v63, 0 }
0x15c2   : > { %v8383_v49 = vpop.f32.mrf.mxu1 }
0x15c3   : > { %8405 = vmatmul.mubr.msk.bf16.vlgmr.msra.gmra.mxu1 %vm2018_vm3, %v3978_v13 }
0x15c4   : > { %v4093_v14 = vpop.f32.mrf.mxu1  ;;  %8416 = vmatprep.mubr.msk.bf16.mxu1 %vm9167_vm0, %v9166_v0 }
0x15c6   : > { %v8394_v15 = vpop.f32.mrf.mxu1 }
0x15c8   : > { %v4096_v5 = vpop.f32.mrf.mxu1 }
0x15c9   : > { %v4100_v8 = vpack.c.bf16 %v4096_v5, %v4093_v14 }
0x15ca   : > { %v8395_v23 = vpop.f32.mrf.mxu1 }
0x15cb   : > { %8399 = vmatmul.mubr.msk.bf16.vlgmr.msra.gmra.mxu0 %vm2018_vm3, %v4100_v8 }
0x15cc   : > { %8409 = vmatpush3.bf16.xpose.msra.mxu0 %v4203_v24  ;;  %8410 = vmatprep.mubr.msk.bf16.mxu0 %vm9167_vm0, %v9166_v0 }
0x15cd   : > { %8420 = vmatprep.subr.bf16.mxu0 %v9166_v0 }
0x15d3   : > { %8411 = vmatmul.mubr.msk.bf16.vlgmr.msra.gmra.mxu0 %vm2018_vm3, %v4196_v18 }
0x15d4   : > { %8422 = vmatprep.mubr.msk.bf16.mxu0 %vm9167_vm0, %v9166_v0  ;;  %8421 = vmatpush3.bf16.msra.mxu0 %v4321_v7 }
0x15d5   : > { %8432 = vmatprep.subr.bf16.mxu0 %v9166_v0 }
0x1683   : > { %v4188_v43 = vpop.f32.mrf.mxu1 }
0x1685   : > { %v8406_v19 = vpop.f32.mrf.mxu1 }
0x1687   : > { %v4191_v20 = vpop.f32.mrf.mxu1 }
0x1689   : > { %v8407_v54 = vpop.f32.mrf.mxu1 }
0x168b   : > { %v4141_v62 = vpop.f32.mrf.mxu0 }
0x168c   : > { %v9882_v1 = vadd.f32 %v4188_v43, %v4141_v62 }
0x168d   : > { %v8400_v48 = vpop.f32.mrf.mxu0 }
0x168f   : > { %v4144_v26 = vpop.f32.mrf.mxu0 }
0x1690   : > { %v9884_v47 = vadd.f32 %v4191_v20, %v4144_v26 }
0x1691   : > { %v8401_v27 = vpop.f32.mrf.mxu0 }
0x1693   : > { %v4239_v31 = vpop.f32.mrf.mxu0 }
0x1694   : > { %v4246_v56 = vsel %vm1862_vm1, %v4239_v31, -inf }
0x1695   : > { %4247 = vmax.xlane.f32.xlu1 %v4246_v56  ;;  %v8412_v32 = vpop.f32.mrf.mxu0 }
0x1697   : > { %v4242_v33 = vpop.f32.mrf.mxu0 }
0x1698   : > { %v4249_v34 = vsel %vm1862_vm1, %v4242_v33, -inf }
0x1699   : > { %4250 = vmax.xlane.f32.xlu0 %v4249_v34  ;;  %v8413_v50 = vpop.f32.mrf.mxu0 }
0x171e   : > { %v4248_v58 = vpop.xlane.xlu1 %4247 }
0x171f   : > { %v4252_v35 = vsub.f32 %v4239_v31, %v4248_v58 }
0x1721   : > { %v4254_v3 = vmul.f32 1.442695, %v4252_v35 }
0x1722   : > { %v4251_v36 = vpop.xlane.xlu0 %4250 }
0x1723   : > { %8913 = vpow2.f32 %v4254_v3  ;;  %v4253_v37 = vsub.f32 %v4242_v33, %v4251_v36 }
0x1725   : > { %v4256_v16 = vmul.f32 1.442695, %v4253_v37 }
0x1727   : > { %8915 = vpow2.f32 %v4256_v16 }
0x1730   : > { %v8914_v22 = vpop.eup %8913 }
0x1731   : > { %v4258_v40 = vsel %vm1862_vm1, %v8914_v22, 0.0 }
0x1732   : > { %4259 = vadd.xlane.f32.xlu0 %v4258_v40 }
0x1734   : > { %v8916_v44 = vpop.eup %8915 }
0x1735   : > { %v4261_v45 = vsel %vm1862_vm1, %v8916_v44, 0.0 }
0x1736   : > { %4262 = vadd.xlane.f32.xlu1 %v4261_v45 }
0x1747   : > { %4368 = vrot.lane.b32.xlu1 %v9822_v17, %s10494_s18 }
0x1748   : > { %4269 = vrot.lane.b32.xlu0 %v9822_v17, %s10495_s10 }
0x174b   : > { %4366 = vrot.lane.b32.xlu1 %v9822_v17, %s10496_s7 }
0x17bb   : > { %v4260_v29 = vpop.xlane.xlu0 %4259 }
0x17bc   : > { %8917 = vrcp.f32 %v4260_v29 }
0x17bf   : > { %v4263_v42 = vpop.xlane.xlu1 %4262  ;;  %v4270_v25 = vpop.permute.xlu0 %4269 }
0x17c0   : > { %8919 = vrcp.f32 %v4263_v42  ;;  %8415 = vmatpush3.bf16.msra.mxu1 %v4270_v25 }
0x17c1   : > { %8426 = vmatprep.subr.bf16.mxu1 %v9166_v0 }
0x17c3   : > { %v4369_v55 = vpop.permute.xlu1 %4368 }
0x17c4   : > { %v4374_v60 = vsel %vm2018_vm3, %v4369_v55, 0 }
0x17c7   : > { %v4367_v61 = vpop.permute.xlu1 %4366 }
0x17c9   : > { %v8918_v38 = vpop.eup %8917 }
0x17ca   : > { %v4266_v51 = vmul.f32 %v8918_v38, %v8914_v22  ;;  %v7715_v38 = vld [vmem:[%s10498_s28] ss:$0 sm:$0xff]  ;;  %s10500_s28 = sld [smem:[#allocation20_spill]] }
0x17cd   : > { %v8920_v46 = vpop.eup %8919 }
0x17ce   : > { %v4267_v53 = vmul.f32 %v8920_v46, %v8916_v44 }
0x17d0   : > { %v4268_v59 = vpack.c.bf16 %v4267_v53, %v4266_v51 }
0x17d2   : > { %8417 = vmatmul.mubr.msk.bf16.vlgmr.msra.gmra.mxu1 %vm1862_vm1, %v4268_v59 }
0x17d3   : > { %8427 = vmatpush3.bf16.xpose.msra.mxu1 %v4374_v60  ;;  %8428 = vmatprep.mubr.msk.bf16.mxu1 %vm9167_vm0, %v9166_v0 }
0x17d4   : > { %8438 = vmatprep.subr.bf16.mxu1 %v9166_v0 }
0x17da   : > { %8429 = vmatmul.mubr.msk.bf16.vlgmr.msra.gmra.mxu1 %vm2018_vm3, %v4367_v61 }
0x17db   : > { %8440 = vmatprep.mubr.msk.bf16.mxu1 %vm9167_vm0, %v9166_v0 }
0x1892   : > { %v4309_v52 = vpop.f32.mrf.mxu1 }
0x1894   : > { %v8418_v12 = vpop.f32.mrf.mxu1 }
0x1896   : > { %v4312_v13 = vpop.f32.mrf.mxu1 }
0x1897   : > { %v4316_v49 = vpack.c.bf16 %v4312_v13, %v4309_v52 }
0x1898   : > { %v8419_v14 = vpop.f32.mrf.mxu1 }
0x1899   : > { %8423 = vmatmul.mubr.msk.bf16.vlgmr.msra.gmra.mxu0 %vm2018_vm3, %v4316_v49 }
0x189a   : > { %v4410_v15 = vpop.f32.mrf.mxu1  ;;  %8434 = vmatprep.mubr.msk.bf16.mxu0 %vm9167_vm0, %v9166_v0 }
0x189b   : > { %v4417_v39 = vsel %vm1862_vm1, %v4410_v15, -inf }
0x189c   : > { %4418 = vmax.xlane.f32.xlu0 %v4417_v39  ;;  %v8430_v5 = vpop.f32.mrf.mxu1 }
0x189e   : > { %v4413_v8 = vpop.f32.mrf.mxu1 }
0x189f   : > { %v4420_v23 = vsel %vm1862_vm1, %v4413_v8, -inf }
0x18a0   : > { %4421 = vmax.xlane.f32.xlu1 %v4420_v23  ;;  %v8431_v24 = vpop.f32.mrf.mxu1 }
0x18b1   : > { %4440 = vrot.lane.b32.xlu1 %v9822_v17, %s10497_s2 }
0x1925   : > { %v4419_v18 = vpop.xlane.xlu0 %4418 }
0x1926   : > { %v4423_v43 = vsub.f32 %v4410_v15, %v4419_v18  ;;  %v1512_v18 = vld [vmem:[%s10499_s26 + $0x40] sm:$0xff] }
0x1928   : > { %v4425_v19 = vmul.f32 1.442695, %v4423_v43  ;;  %v1516_v43 = vld [vmem:[%s10499_s26 + $0x60] sm:$0xff] }
0x1929   : > { %v4422_v20 = vpop.xlane.xlu1 %4421 }
0x192a   : > { %8921 = vpow2.f32 %v4425_v19  ;;  %v4424_v54 = vsub.f32 %v4413_v8, %v4422_v20  ;;  %v1513_v19 = vld [vmem:[%s10499_s26 + $0x48] sm:$0xff]  ;;  %v7727_v20 = vcombine.high %v1512_v18, %v1516_v43 }
0x192c   : > { %v4427_v62 = vmul.f32 1.442695, %v4424_v54  ;;  %v1517_v54 = vld [vmem:[%s10499_s26 + $0x68] sm:$0xff] }
0x192d   : > { %v4441_v48 = vpop.permute.xlu1 %4440 }
0x192e   : > { %8923 = vpow2.f32 %v4427_v62  ;;  %8433 = vmatpush3.bf16.msra.mxu0 %v4441_v48  ;;  %v7726_v62 = vcombine.low %v1512_v18, %v1516_v43  ;;  %v7728_v48 = vcombine.low %v1513_v19, %v1517_v54  ;;  %v8694_v18 = vld [vmem:[%s10502_s0 + $0xf0] sm:$0xff]  }
0x192f   : > { %4726 = vmatprep.subr.bf16.mxu0 %v7727_v20  ;;  %v8695_v43 = vld [vmem:[%s10502_s0 + $0x30] sm:$0xff]   ;;  %v8697_v20 = vld [vmem:[%s10502_s0 + $0x68] sm:$0xff]  }
0x1937   : > { %v8922_v26 = vpop.eup %8921 }
0x1938   : > { %v4429_v27 = vsel %vm1862_vm1, %v8922_v26, 0.0 }
0x1939   : > { %4430 = vadd.xlane.f32.xlu0 %v4429_v27  ;;  %v1504_v27 = vld [vmem:[%s10499_s26] sm:$0xff] }
0x193b   : > { %v8924_v31 = vpop.eup %8923 }
0x193c   : > { %v4432_v56 = vsel %vm1862_vm1, %v8924_v31, 0.0 }
0x193d   : > { %4433 = vadd.xlane.f32.xlu0 %v4432_v56  ;;  %v1505_v56 = vld [vmem:[%s10499_s26 + $0x8] sm:$0xff] }
0x1959   : > { %v4357_v32 = vpop.f32.mrf.mxu0 }
0x195a   : > { %v4364_v17 = vadd.f32 %v4357_v32, %v9882_v1  ;;  %v1500_v1 = vld [vmem:[%s10493_s15 + $0xc] sm:$0xf] }
0x195b   : > { %v8424_v33 = vpop.f32.mrf.mxu0  ;;  %v4492_v44 = vsel %vm2262_vm4, %v1500_v1, 0 }
0x195c   : > { %8439 = vmatpush3.bf16.msra.mxu1 %v4492_v44 }
0x195d   : > { %v4360_v34 = vpop.f32.mrf.mxu0 }
0x195e   : > { %v4365_v50 = vadd.f32 %v4360_v34, %v9884_v47 }
0x195f   : > { %v8425_v58 = vpop.f32.mrf.mxu0 }
0x1960   : > { %v1514_v58 = vld [vmem:[%s10499_s26 + $0x50] sm:$0xff] }
0x19c2   : > { %v4431_v35 = vpop.xlane.xlu0 %4430 }
0x19c3   : > { %8925 = vrcp.f32 %v4431_v35  ;;  %v1518_v35 = vld [vmem:[%s10499_s26 + $0x70] sm:$0xff] }
0x19c6   : > { %v4434_v3 = vpop.xlane.xlu0 %4433 }
0x19c7   : > { %8927 = vrcp.f32 %v4434_v3  ;;  %v1515_v3 = vld [vmem:[%s10499_s26 + $0x58] sm:$0xff] }
0x19d0   : > { %v8926_v36 = vpop.eup %8925 }
0x19d1   : > { %v4437_v16 = vmul.f32 %v8926_v36, %v8922_v26  ;;  %v7729_v26 = vcombine.high %v1513_v19, %v1517_v54  ;;  %v7731_v36 = vcombine.high %v1514_v58, %v1518_v35  ;;  %v8696_v19 = vld [vmem:[%s10502_s0 + $0xb0] sm:$0xff]   ;;  %v8698_v54 = vld [vmem:[%s10502_s0 + $0xe8] sm:$0xff]  }
0x19d3   : > { %4769 = vmatprep.subr.bf16.mxu1 %v7729_v26  ;;  %v8701_v26 = vld [vmem:[%s10502_s0 + $0x60] sm:$0xff]  }
0x19d4   : > { %v8928_v37 = vpop.eup %8927 }
0x19d5   : > { %v4438_v22 = vmul.f32 %v8928_v37, %v8924_v31  ;;  %v1508_v31 = vld [vmem:[%s10499_s26 + $0x20] sm:$0xff]  ;;  %v1519_v37 = vld [vmem:[%s10499_s26 + $0x78] sm:$0xff] }
0x19d6   : > { %v7719_v32 = vcombine.high %v1504_v27, %v1508_v31  ;;  %v7718_v33 = vcombine.low %v1504_v27, %v1508_v31  ;;  %v8702_v27 = vld [vmem:[%s10502_s0 + $0xe0] sm:$0xff]  }
0x19d7   : > { %v4439_v40 = vpack.c.bf16 %v4438_v22, %v4437_v16  ;;  %v7730_v16 = vcombine.low %v1514_v58, %v1518_v35  ;;  %v7732_v22 = vcombine.low %v1515_v3, %v1519_v37  ;;  %v8703_v31 = vld [vmem:[%s10502_s0 + $0x20] sm:$0xff]   ;;  %v8710_v58 = vld [vmem:[%s10502_s0 + $0xd0] sm:$0xff]  }
0x19d8   : > { %v8711_v35 = vld [vmem:[%s10502_s0 + $0x10] sm:$0xff]  }
0x19d9   : > { %8435 = vmatmul.mubr.msk.bf16.vlgmr.msra.gmra.mxu0 %vm1862_vm1, %v4439_v40  ;;  %v7733_v40 = vcombine.high %v1515_v3, %v1519_v37  ;;  %v8712_v3 = vld [vmem:[%s10502_s0 + $0x90] sm:$0xff]   ;;  %v8714_v37 = vld [vmem:[%s10502_s0 + $0xc8] sm:$0xff]  }
0x19da   : > { %4746 = vmatprep.mubr.bf16.mxu0 %v9179_v57  ;;  %4727 = vmatpush1.bf16.msra.mxu0 %v7726_v62  ;;  %v8699_v62 = vld [vmem:[%s10502_s0 + $0x28] sm:$0xff]  }
0x19db   : > { %4728 = vmatprep.subr.bf16.mxu0 %v7719_v32  ;;  %v8705_v32 = vld [vmem:[%s10502_s0 + $0x58] sm:$0xff]  }
0x19de   : > { %4729 = vmatpush1.bf16.msra.mxu0 %v7718_v33  ;;  %v8707_v33 = vld [vmem:[%s10502_s0 + $0x18] sm:$0xff]  }
0x19df   : > { %4812 = vmatprep.subr.bf16.mxu0 %v7731_v36  ;;  %v8713_v36 = vld [vmem:[%s10502_s0 + $0x48] sm:$0xff]  }
0x1a99   : > { %v4480_v47 = vpop.f32.mrf.mxu0 }
0x1a9b   : > { %v8436_v45 = vpop.f32.mrf.mxu0 }
0x1a9d   : > { %v4483_v29 = vpop.f32.mrf.mxu0 }
0x1a9e   : > { %v4487_v42 = vpack.c.bf16 %v4483_v29, %v4480_v47 }
0x1a9f   : > { %v8437_v25 = vpop.f32.mrf.mxu0 }
0x1aa0   : > { %8441 = vmatmul.mubr.msk.bf16.vlgmr.msra.gmra.mxu1 %vm2018_vm3, %v4487_v42 }
0x1aa1   : > { %4789 = vmatprep.mubr.bf16.mxu1 %v9179_v57  ;;  %4770 = vmatpush1.bf16.msra.mxu1 %v7728_v48  ;;  %v8700_v48 = vld [vmem:[%s10502_s0 + $0xa8] sm:$0xff]  }
0x1b60   : > { %v4528_v46 = vpop.f32.mrf.mxu1 }
0x1b61   : > { %v4535_v51 = vadd.f32 %v4528_v46, %v4364_v17  ;;  %v1509_v17 = vld [vmem:[%s10499_s26 + $0x28] sm:$0xff]  ;;  %v7716_v46 = vld [vmem:[%s10500_s28] ss:$0 sm:$0xff]  ;;  %s10504_s28 = sld [smem:[#allocation26_spill]] }
0x1b62   : > { %v8442_v53 = vpop.f32.mrf.mxu1  ;;  %v7721_v34 = vcombine.high %v1505_v56, %v1509_v17 }
0x1b63   : > { %v4543_v55 = vadd.f32 %v7715_v38, %v4535_v51 }
0x1b64   : > { %v4531_v59 = vpop.f32.mrf.mxu1  ;;  %4771 = vmatprep.subr.bf16.mxu1 %v7721_v34  ;;  %v8708_v34 = vld [vmem:[%s10502_s0 + $0x98] sm:$0xff]  }
0x1b65   : > { %v4536_v60 = vadd.f32 %v4531_v59, %v4365_v50  ;;  %v4545_v61 = vadd.f32 %v4543_v55, %v9812_v41  ;;  %v7720_v50 = vcombine.low %v1505_v56, %v1509_v17  ;;  %v7717_v59 = vld [vmem:[%s10501_s1] ss:$0 sm:$0xff]  ;;  %v8706_v17 = vld [vmem:[%s10502_s0 + $0xd8] sm:$0xff]   ;;  %s10503_s1 = sld [smem:[#allocation23_spill]] }
0x1b66   : > { %v8443_v63 = vpop.f32.mrf.mxu1  ;;  %v8704_v56 = vld [vmem:[%s10502_s0 + $0xa0] sm:$0xff]  }
0x1b67   : > { %v4544_v7 = vadd.f32 %v7715_v38, %v4536_v60  ;;  %v4547_v52 = vsel %vm1907_vm2, %v4545_v61, 0.0  ;;  %4772 = vmatpush1.bf16.msra.mxu1 %v7720_v50  ;;  %v1510_v63 = vld [vmem:[%s10499_s26 + $0x30] sm:$0xff] }
0x1b68   : > { %4548 = vadd.xlane.f32.xlu0 %v4547_v52  ;;  %4855 = vmatprep.subr.bf16.mxu1 %v7733_v40  ;;  %v1511_v52 = vld [vmem:[%s10499_s26 + $0x38] sm:$0xff]  ;;  %v8709_v50 = vld [vmem:[%s10502_s0 + $0x50] sm:$0xff]   ;;  %v8717_v40 = vld [vmem:[%s10502_s0 + $0x40] sm:$0xff]  }
0x1b69   : > { %v4546_v12 = vadd.f32 %v4544_v7, %v9814_v28  ;;  %v1507_v7 = vld [vmem:[%s10499_s26 + $0x18] sm:$0xff] }
0x1b6b   : > { %v4550_v13 = vsel %vm1907_vm2, %v4546_v12, 0.0 }
0x1b6c   : > { %4551 = vadd.xlane.f32.xlu0 %v4550_v13 }
0x1bf1   : > { %v4549_v49 = vpop.xlane.xlu0 %4548 }
0x1bf2   : > { %v4553_v14 = vmul.f32 0.03125, %v4549_v49 }
0x1bf4   : > { %v4555_v15 = vsub.f32 %v4545_v61, %v4553_v14  ;;  %v1506_v61 = vld [vmem:[%s10499_s26 + $0x10] sm:$0xff] }
0x1bf5   : > { %v4552_v39 = vpop.xlane.xlu0 %4551  ;;  %v7723_v14 = vcombine.high %v1506_v61, %v1510_v63 }
0x1bf6   : > { %v4554_v5 = vmul.f32 0.03125, %v4552_v39  ;;  %v4557_v41 = vmul.f32 %v4555_v15, %v4555_v15  ;;  %v7722_v39 = vcombine.low %v1506_v61, %v1510_v63 }
0x1bf8   : > { %v4556_v8 = vsub.f32 %v4546_v12, %v4554_v5  ;;  %v4559_v23 = vsel %vm1907_vm2, %v4557_v41, 0.0  ;;  %v7724_v5 = vcombine.low %v1507_v7, %v1511_v52  ;;  %v8689_v41 = vld [vmem:[%s10502_s0 + $0x78] sm:$0xff]  }
0x1bf9   : > { %4560 = vadd.xlane.f32.xlu0 %v4559_v23  ;;  %v8691_v23 = vld [vmem:[%s10502_s0 + $0x38] sm:$0xff]  }
0x1bfa   : > { %v4558_v28 = vmul.f32 %v4556_v8, %v4556_v8 }
0x1bfc   : > { %v4562_v24 = vsel %vm1907_vm2, %v4558_v28, 0.0  ;;  %v8692_v28 = vld [vmem:[%s10502_s0 + $0xb8] sm:$0xff]  }
0x1bfd   : > { %4563 = vadd.xlane.f32.xlu0 %v4562_v24  ;;  %v8693_v24 = vld [vmem:[%s10502_s0 + $0x70] sm:$0xff]  }
0x1c82   : > { %v4561_v1 = vpop.xlane.xlu0 %4560 }
0x1c83   : > { %v4565_v44 = vmul.f32 0.03125, %v4561_v1  ;;  %v8718_v1 = vld [vmem:[%s10502_s0 + $0xc0] sm:$0xff]  }
0x1c85   : > { %v4567_v47 = vadd.f32 1e-05, %v4565_v44  ;;  %v8719_v44 = vld [vmem:[%s10502_s0] sm:$0xff]  }
0x1c86   : > { %v4564_v45 = vpop.xlane.xlu0 %4563 }
0x1c87   : > { %8929 = vrsqrt.f32 %v4567_v47  ;;  %v4566_v29 = vmul.f32 0.03125, %v4564_v45  ;;  %v8720_v47 = vld [vmem:[%s10502_s0 + $0x80] sm:$0xff]   ;;  %v8721_v45 = vld [vmem:[%s10502_s0 + $0x178] sm:$0xff]  }
0x1c89   : > { %v4568_v42 = vadd.f32 1e-05, %v4566_v29  ;;  %v8722_v29 = vld [vmem:[%s10502_s0 + $0x1f8] sm:$0xff]  }
0x1c8b   : > { %8931 = vrsqrt.f32 %v4568_v42  ;;  %v9997_v42 = vld [vmem:[%s10503_s1] sm:$0xff]  ;;  %s10505_s1 = sld [smem:[#allocation25_spill]] }
0x1c94   : > { %v8930_v25 = vpop.eup %8929 }
0x1c95   : > { %v4571_v38 = vmul.f32 %v8930_v25, %v4555_v15  ;;  %v7725_v15 = vcombine.high %v1507_v7, %v1511_v52  ;;  %v4594_v25 = vrot.slane %v9997_v42, %v9667_v4 }
0x1c97   : > { %v4579_v55 = vmul.f32 %v7716_v46, %v4571_v38  ;;  %v4602_v38 = vrot.slane %v9997_v42, %v9670_v6 }
0x1c98   : > { %v8932_v51 = vpop.eup %8931 }
0x1c99   : > { %v4572_v53 = vmul.f32 %v8932_v51, %v4556_v8  ;;  %v9950_v12 = vadd.f32 %v7717_v59, %v4579_v55  ;;  %v8690_v8 = vld [vmem:[%s10502_s0 + $0xf8] sm:$0xff]   ;;  %v4606_v55 = vrot.slane %v9997_v42, %v9679_v10 }
0x1c9b   : > { %v4580_v60 = vmul.f32 %v7716_v46, %v4572_v53  ;;  %v4598_v53 = vrot.slane %v9997_v42, %v9676_v9 }
0x1c9d   : > { %v9952_v13 = vadd.f32 %v7717_v59, %v4580_v60 }
0x1c9f   : > { %v4589_v49 = vpack.c.bf16 %v9952_v13, %v9950_v12 }
0x1ca1   : > { %7734 = vmatmul.mubr.msk.bf16.vlgmr.msra.gmra.mxu0 %vm1907_vm2, %v4589_v49  ;;  %7735 = vmatmul.mubr.msk.bf16.vlgmr.msra.gmra.mxu1 %vm1907_vm2, %v4589_v49 }
0x1ca2   : > { %4813 = vmatpush1.bf16.msra.mxu0 %v7730_v16  ;;  %4856 = vmatpush1.bf16.msra.mxu1 %v7732_v22  ;;  %v8715_v16 = vld [vmem:[%s10502_s0 + $0x8] sm:$0xff]  }
0x1ca3   : > { %4814 = vmatprep.subr.bf16.mxu0 %v7723_v14  ;;  %4857 = vmatprep.subr.bf16.mxu1 %v7725_v15  ;;  %v8716_v22 = vld [vmem:[%s10502_s0 + $0x88] sm:$0xff]  }
0x1ca4   : > { %4832 = vmatprep.mubr.bf16.mxu0 %v9179_v57  ;;  %4875 = vmatprep.mubr.bf16.mxu1 %v9179_v57 }
0x1ca6   : > { %4815 = vmatpush1.bf16.msra.mxu0 %v7722_v39  ;;  %4858 = vmatpush1.bf16.msra.mxu1 %v7724_v5 }
0x1ca7   : > { %8064 = vmatprep.subr.bf16.mxu0 %v8689_v41  ;;  %8086 = vmatprep.subr.bf16.mxu1 %v8690_v8 }
0x1ca9   : > { %7736 = vmatmul.mubr.msk.bf16.vlgmr.msra.gmra.mxu0 %vm1907_vm2, %v4589_v49  ;;  %7737 = vmatmul.mubr.msk.bf16.vlgmr.msra.gmra.mxu1 %vm1907_vm2, %v4589_v49 }
0x1caa   : > { %8065 = vmatpush3.bf16.msra.mxu0 %v8691_v23  ;;  %8087 = vmatpush3.bf16.msra.mxu1 %v8692_v28 }
0x1cab   : > { %8066 = vmatprep.subr.bf16.mxu0 %v8693_v24  ;;  %8088 = vmatprep.subr.bf16.mxu1 %v8694_v18 }
0x1cae   : > { %8067 = vmatpush3.bf16.msra.mxu0 %v8695_v43  ;;  %8089 = vmatpush3.bf16.msra.mxu1 %v8696_v19  ;;  %v4614_v43 = vrot.slane %v9997_v42, %v9693_v21 }
0x1caf   : > { %8068 = vmatprep.subr.bf16.mxu0 %v8697_v20  ;;  %8090 = vmatprep.subr.bf16.mxu1 %v8698_v54 }
0x1cb2   : > { %8069 = vmatpush3.bf16.msra.mxu0 %v8699_v62  ;;  %8091 = vmatpush3.bf16.msra.mxu1 %v8700_v48 }
0x1cb3   : > { %8070 = vmatprep.subr.bf16.mxu0 %v8701_v26  ;;  %8092 = vmatprep.subr.bf16.mxu1 %v8702_v27  ;;  %v4622_v26 = vrot.slane %v9997_v42, %v9698_v30 }
0x1cb6   : > { %8071 = vmatpush3.bf16.msra.mxu0 %v8703_v31  ;;  %8093 = vmatpush3.bf16.msra.mxu1 %v8704_v56 }
0x1cb7   : > { %8072 = vmatprep.subr.bf16.mxu0 %v8705_v32  ;;  %8094 = vmatprep.subr.bf16.mxu1 %v8706_v17 }
0x1cba   : > { %8073 = vmatpush3.bf16.msra.mxu0 %v8707_v33  ;;  %8095 = vmatpush3.bf16.msra.mxu1 %v8708_v34 }
0x1cbb   : > { %8074 = vmatprep.subr.bf16.mxu0 %v8709_v50  ;;  %8096 = vmatprep.subr.bf16.mxu1 %v8710_v58 }
0x1cbe   : > { %8075 = vmatpush3.bf16.msra.mxu0 %v8711_v35  ;;  %8097 = vmatpush3.bf16.msra.mxu1 %v8712_v3 }
0x1cbf   : > { %8076 = vmatprep.subr.bf16.mxu0 %v8713_v36  ;;  %8098 = vmatprep.subr.bf16.mxu1 %v8714_v37 }
0x1cc2   : > { %8077 = vmatpush3.bf16.msra.mxu0 %v8715_v16  ;;  %8099 = vmatpush3.bf16.msra.mxu1 %v8716_v22 }
0x1cc3   : > { %8078 = vmatprep.subr.bf16.mxu0 %v8717_v40  ;;  %8100 = vmatprep.subr.bf16.mxu1 %v8718_v1 }
0x1cc6   : > { %8079 = vmatpush3.bf16.msra.mxu0 %v8719_v44  ;;  %8101 = vmatpush3.bf16.msra.mxu1 %v8720_v47 }
0x1cc7   : > { %8108 = vmatprep.subr.bf16.mxu0 %v8721_v45  ;;  %8130 = vmatprep.subr.bf16.mxu1 %v8722_v29 }
0x1d61   : > { %v4748_v46 = vpop.f32.mrf.mxu0  ;;  %v4791_v51 = vpop.f32.mrf.mxu1 }
0x1d62   : > { %v4749_v59 = vadd.f32 %v4748_v46, %v4594_v25  ;;  %v10007_v60 = vadd.f32 %v4791_v51, %v4602_v38 }
0x1d63   : > { %v4750_v61 = vpop.f32.mrf.mxu0  ;;  %v4793_v63 = vpop.f32.mrf.mxu1 }
0x1d64   : > { %v4902_v7 = vmul.f32 0.70710677, %v4749_v59  ;;  %v4904_v52 = vmul.f32 0.70710677, %v10007_v60  ;;  %v4751_v49 = vadd.f32 %v4750_v61, %v4598_v53  ;;  %v10010_v14 = vadd.f32 %v4793_v63, %v4606_v55 }
0x1d65   : > { %v4752_v15 = vpop.f32.mrf.mxu0  ;;  %v4795_v39 = vpop.f32.mrf.mxu1 }
0x1d66   : > { %v4753_v5 = vadd.f32 %v4752_v15, %v4594_v25  ;;  %v4796_v41 = vadd.f32 %v4795_v39, %v4602_v38  ;;  %8933 = verf.f32 %v4902_v7  ;;  %v4903_v8 = vmul.f32 0.70710677, %v4751_v49 }
0x1d67   : > { %v4754_v23 = vpop.f32.mrf.mxu0  ;;  %v4797_v28 = vpop.f32.mrf.mxu1  ;;  %8935 = verf.f32 %v4904_v52  ;;  %v4905_v24 = vmul.f32 0.70710677, %v10010_v14  ;;  %v4886_v38 = vmul.f32 0.5, %v4749_v59  ;;  %v4887_v46 = vmul.f32 0.5, %v4751_v49 }
0x1d68   : > { %v4910_v18 = vmul.f32 0.70710677, %v4753_v5  ;;  %8937 = verf.f32 %v4903_v8  ;;  %v4912_v19 = vmul.f32 0.70710677, %v4796_v41  ;;  %v4755_v20 = vadd.f32 %v4754_v23, %v4598_v53 }
0x1d69   : > { %v4798_v54 = vadd.f32 %v4797_v28, %v4606_v55  ;;  %v10015_v62 = vpop.f32.mrf.mxu0  ;;  %v10017_v48 = vpop.f32.mrf.mxu1  ;;  %8939 = verf.f32 %v4905_v24  ;;  %v4894_v7 = vmul.f32 0.5, %v4753_v5  ;;  %v4896_v8 = vmul.f32 0.5, %v4796_v41 }
0x1d6a   : > { %8941 = verf.f32 %v4910_v18  ;;  %v4911_v27 = vmul.f32 0.70710677, %v4755_v20  ;;  %v4895_v23 = vmul.f32 0.5, %v4755_v20  ;;  %v4889_v24 = vmul.f32 0.5, %v10010_v14 }
0x1d6b   : > { %v4836_v31 = vpop.f32.mrf.mxu0  ;;  %v4879_v56 = vpop.f32.mrf.mxu1  ;;  %8943 = verf.f32 %v4912_v19  ;;  %v4913_v32 = vmul.f32 0.70710677, %v4798_v54  ;;  %v4888_v59 = vmul.f32 0.5, %v10007_v60  ;;  %v4610_v41 = vrot.slane %v9997_v42, %v9722_v2 }
0x1d6c   : > { %8945 = verf.f32 %v4911_v27  ;;  %v10021_v17 = vadd.f32 %v4836_v31, %v4614_v43  ;;  %v10023_v50 = vadd.f32 %v4879_v56, %v4622_v26 }
0x1d6d   : > { %v4838_v33 = vpop.f32.mrf.mxu0  ;;  %v4881_v34 = vpop.f32.mrf.mxu1  ;;  %8947 = verf.f32 %v4913_v32 }
0x1d6e   : > { %v4907_v58 = vmul.f32 0.70710677, %v10021_v17  ;;  %v4909_v36 = vmul.f32 0.70710677, %v10023_v50 }
0x1d6f   : > { %v4840_v35 = vpop.f32.mrf.mxu0  ;;  %v4883_v3 = vpop.f32.mrf.mxu1 }
0x1d70   : > { %8949 = verf.f32 %v4907_v58  ;;  %v10027_v37 = vadd.f32 %v4840_v35, %v4614_v43  ;;  %v10029_v16 = vadd.f32 %v4883_v3, %v4622_v26  ;;  %v4897_v43 = vmul.f32 0.5, %v4798_v54  ;;  %v8723_v58 = vld [vmem:[%s10502_s0 + $0x138] sm:$0xff]  }
0x1d71   : > { %8951 = verf.f32 %v4909_v36  ;;  %v4618_v54 = vrot.slane %v9997_v42, %v9725_v11  ;;  %v10040_v3 = vadd.f32 %v4838_v33, %v4610_v41 }
0x1d72   : > { %v4915_v40 = vmul.f32 0.70710677, %v10027_v37  ;;  %v4917_v44 = vmul.f32 0.70710677, %v10029_v16 }
0x1d73   : > { %v8934_v22 = vpop.eup %8933  ;;  %v10051_v33 = vadd.f32 %v10017_v48, %v4618_v54  ;;  %v4893_v48 = vmul.f32 0.5, %v10023_v50  ;;  %v8731_v50 = vld [vmem:[%s10502_s0 + $0x128] sm:$0xff]  }
0x1d74   : > { %v8936_v1 = vpop.eup %8935  ;;  %8953 = verf.f32 %v4915_v40  ;;  %v4934_v61 = vadd.f32 1.0, %v8934_v22  ;;  %v8724_v22 = vld [vmem:[%s10502_s0 + $0x1b8] sm:$0xff]   ;;  %v8725_v40 = vld [vmem:[%s10502_s0 + $0x170] sm:$0xff]  }
0x1d75   : > { %v8938_v47 = vpop.eup %8937  ;;  %8955 = verf.f32 %v4917_v44  ;;  %v4936_v39 = vadd.f32 1.0, %v8936_v1  ;;  %v10044_v44 = vadd.f32 %v4881_v34, %v4618_v54  ;;  %v8728_v34 = vld [vmem:[%s10502_s0 + $0x1b0] sm:$0xff]   ;;  %v8745_v54 = vld [vmem:[%s10502_s0 + $0x148] sm:$0xff]  }
0x1d76   : > { %v8940_v45 = vpop.eup %8939  ;;  %v4935_v51 = vadd.f32 1.0, %v8938_v47  ;;  %v4950_v5 = vmul.f32 %v4934_v61, %v4886_v38  ;;  %v8726_v47 = vld [vmem:[%s10502_s0 + $0x1f0] sm:$0xff]   ;;  %v8729_v61 = vld [vmem:[%s10502_s0 + $0x168] sm:$0xff]  }
0x1d77   : > { %v8942_v29 = vpop.eup %8941  ;;  %v4937_v63 = vadd.f32 1.0, %v8940_v45  ;;  %v4952_v14 = vmul.f32 %v4936_v39, %v4888_v59  ;;  %v10048_v45 = vadd.f32 %v10015_v62, %v4610_v41  ;;  %v8727_v38 = vld [vmem:[%s10502_s0 + $0x130] sm:$0xff]   ;;  %v4914_v62 = vmul.f32 0.70710677, %v10040_v3  ;;  %v8735_v59 = vld [vmem:[%s10502_s0 + $0x120] sm:$0xff]  }
0x1d78   : > { %v8944_v25 = vpop.eup %8943  ;;  %v4942_v53 = vadd.f32 1.0, %v8942_v29  ;;  %v4951_v49 = vmul.f32 %v4935_v51, %v4887_v46  ;;  %v4891_v51 = vmul.f32 0.5, %v10021_v17  ;;  %v8730_v17 = vld [vmem:[%s10502_s0 + $0x1e8] sm:$0xff]   ;;  %v8742_v41 = vld [vmem:[%s10502_s0 + $0x1d0] sm:$0xff]  }
0x1d79   : > { %v8946_v55 = vpop.eup %8945  ;;  %v4944_v52 = vadd.f32 1.0, %v8944_v25  ;;  %v4953_v31 = vmul.f32 %v4937_v63, %v4889_v24  ;;  %v4916_v63 = vmul.f32 0.70710677, %v10044_v44  ;;  %8957 = verf.f32 %v4914_v62  ;;  %v8732_v24 = vld [vmem:[%s10502_s0 + $0x1a8] sm:$0xff]  }
0x1d7a   : > { %v8948_v15 = vpop.eup %8947  ;;  %v4943_v28 = vadd.f32 1.0, %v8946_v55  ;;  %v4958_v18 = vmul.f32 %v4942_v53, %v4894_v7  ;;  %v4899_v53 = vmul.f32 0.5, %v10027_v37  ;;  %v4901_v7 = vmul.f32 0.5, %v10029_v16 }
0x1d7b   : > { %v4945_v19 = vadd.f32 1.0, %v8948_v15  ;;  %v4960_v26 = vmul.f32 %v4944_v52, %v4896_v8  ;;  %v4906_v15 = vmul.f32 0.70710677, %v10048_v45  ;;  %v4908_v8 = vmul.f32 0.70710677, %v10051_v33 }
0x1d7c   : > { %v4959_v27 = vmul.f32 %v4943_v28, %v4895_v23  ;;  %v4966_v35 = vpack.c.bf16 %v4958_v18, %v4950_v5  ;;  %v8733_v18 = vld [vmem:[%s10502_s0 + $0x160] sm:$0xff]   ;;  %8959 = verf.f32 %v4916_v63  ;;  %v8739_v5 = vld [vmem:[%s10502_s0 + $0x118] sm:$0xff]   ;;  %v4890_v62 = vmul.f32 0.5, %v10048_v45  ;;  %v8753_v45 = vld [vmem:[%s10504_s28 + $0x8] sm:$0xff]  }
0x1d7d   : > { %v4961_v56 = vmul.f32 %v4945_v19, %v4897_v43  ;;  %v8950_v20 = vpop.eup %8949  ;;  %v4968_v1 = vpack.c.bf16 %v4960_v26, %v4952_v14  ;;  %v8734_v19 = vld [vmem:[%s10502_s0 + $0x1e0] sm:$0xff]   ;;  %8961 = verf.f32 %v4906_v15  ;;  %v8737_v26 = vld [vmem:[%s10502_s0 + $0x158] sm:$0xff]   ;;  %v8744_v14 = vld [vmem:[%s10502_s0 + $0x190] sm:$0xff]  }
0x1d7e   : > { %v4967_v32 = vpack.c.bf16 %v4959_v27, %v4951_v49  ;;  %v8952_v60 = vpop.eup %8951  ;;  %v4939_v42 = vadd.f32 1.0, %v8950_v20  ;;  %8963 = verf.f32 %v4908_v8  ;;  %v8736_v49 = vld [vmem:[%s10502_s0 + $0x1a0] sm:$0xff]   ;;  %v8738_v27 = vld [vmem:[%s10502_s0 + $0x1d8] sm:$0xff]   ;;  %v8743_v20 = vld [vmem:[%s10502_s0 + $0x110] sm:$0xff]  }
0x1d7f   : > { %v4969_v36 = vpack.c.bf16 %v4961_v56, %v4953_v31  ;;  %v4941_v25 = vadd.f32 1.0, %v8952_v60  ;;  %v8740_v31 = vld [vmem:[%s10502_s0 + $0x198] sm:$0xff]   ;;  %v8741_v56 = vld [vmem:[%s10502_s0 + $0x150] sm:$0xff]  }
0x1d80   : > { %5396 = vmatprep.mubr.bf16.mxu0 %v4967_v32  ;;  %v4955_v39 = vmul.f32 %v4939_v42, %v4891_v51  ;;  %v8751_v51 = vld [vmem:[%s10502_s0 + $0x100] sm:$0xff]  }
0x1d81   : > { %5437 = vmatprep.mubr.bf16.mxu1 %v4969_v36  ;;  %5397 = vmatmul.mubr.bf16.vlgmr.msra.gmra.mxu0 %v4966_v35  ;;  %v8954_v29 = vpop.eup %8953  ;;  %v4957_v23 = vmul.f32 %v4941_v25, %v4893_v48  ;;  %v8747_v36 = vld [vmem:[%s10502_s0 + $0x108] sm:$0xff]  }
0x1d82   : > { %5438 = vmatmul.mubr.bf16.vlgmr.msra.gmra.mxu1 %v4968_v1  ;;  %8109 = vmatpush3.bf16.msra.mxu0 %v8723_v58  ;;  %v8956_v46 = vpop.eup %8955  ;;  %v4947_v55 = vadd.f32 1.0, %v8954_v29  ;;  %v8746_v58 = vld [vmem:[%s10502_s0 + $0x1c8] sm:$0xff]   ;;  %v8750_v29 = vld [vmem:[%s10502_s0 + $0x1c0] sm:$0xff]  }
0x1d83   : > { %8131 = vmatpush3.bf16.msra.mxu1 %v8724_v22  ;;  %8110 = vmatprep.subr.bf16.mxu0 %v8725_v40  ;;  %v4949_v52 = vadd.f32 1.0, %v8956_v46  ;;  %v8748_v1 = vld [vmem:[%s10502_s0 + $0x188] sm:$0xff]   ;;  %v4900_v46 = vmul.f32 0.5, %v10044_v44 }
0x1d84   : > { %8132 = vmatprep.subr.bf16.mxu1 %v8726_v47  ;;  %v4963_v37 = vmul.f32 %v4947_v55, %v4899_v53  ;;  %v8749_v47 = vld [vmem:[%s10502_s0 + $0x140] sm:$0xff]  }
0x1d85   : > { %v4965_v28 = vmul.f32 %v4949_v52, %v4901_v7  ;;  %v8752_v55 = vld [vmem:[%s10502_s0 + $0x180] sm:$0xff]   ;;  %s10506_s0 = sld [smem:[#allocation27_spill]] }
0x1d86   : > { %8111 = vmatpush3.bf16.msra.mxu0 %v8727_v38  ;;  %v4971_v16 = vpack.c.bf16 %v4963_v37, %v4955_v39  ;;  %v8958_v32 = vpop.eup %8957  ;;  %v4898_v38 = vmul.f32 0.5, %v10040_v3 }
0x1d87   : > { %8133 = vmatpush3.bf16.msra.mxu1 %v8728_v34  ;;  %8112 = vmatprep.subr.bf16.mxu0 %v8729_v61  ;;  %v4973_v43 = vpack.c.bf16 %v4965_v28, %v4957_v23  ;;  %v4946_v40 = vadd.f32 1.0, %v8958_v32  ;;  %v4892_v61 = vmul.f32 0.5, %v10051_v33  ;;  %v8754_v33 = vld [vmem:[%s10504_s28] sm:$0xff]  }
0x1d88   : > { %8134 = vmatprep.subr.bf16.mxu1 %v8730_v17  ;;  %5478 = vmatprep.mubr.bf16.mxu0 %v4971_v16  ;;  %v7738_v28 = vld [vmem:[%s10505_s1] ss:$0 sm:$0xff]  ;;  %s10507_s1 = sld [smem:[#allocation30_spill]] }
0x1d89   : > { %5519 = vmatprep.mubr.bf16.mxu1 %v4973_v43  ;;  %v8960_v60 = vpop.eup %8959  ;;  %v4962_v53 = vmul.f32 %v4946_v40, %v4898_v38 }
0x1d8a   : > { %8113 = vmatpush3.bf16.msra.mxu0 %v8731_v50  ;;  %v8962_v35 = vpop.eup %8961  ;;  %v4948_v42 = vadd.f32 1.0, %v8960_v60 }
0x1d8b   : > { %8135 = vmatpush3.bf16.msra.mxu1 %v8732_v24  ;;  %8114 = vmatprep.subr.bf16.mxu0 %v8733_v18  ;;  %v8964_v22 = vpop.eup %8963  ;;  %v4938_v25 = vadd.f32 1.0, %v8962_v35 }
0x1d8c   : > { %8136 = vmatprep.subr.bf16.mxu1 %v8734_v19  ;;  %v4940_v34 = vadd.f32 1.0, %v8964_v22  ;;  %v4964_v48 = vmul.f32 %v4948_v42, %v4900_v46 }
0x1d8d   : > { %v4954_v63 = vmul.f32 %v4938_v25, %v4890_v62  ;;  %v7803_v25 = vld [vmem:[%s10506_s0] ss:$0 sm:$0xff]  ;;  %s10508_s0 = sld [smem:[#allocation28_spill]] }
0x1d8e   : > { %8115 = vmatpush3.bf16.msra.mxu0 %v8735_v59  ;;  %v4956_v7 = vmul.f32 %v4940_v34, %v4892_v61 }
0x1d8f   : > { %8137 = vmatpush3.bf16.msra.mxu1 %v8736_v49  ;;  %8116 = vmatprep.subr.bf16.mxu0 %v8737_v26  ;;  %v4970_v3 = vpack.c.bf16 %v4962_v53, %v4954_v63 }
0x1d90   : > { %8138 = vmatprep.subr.bf16.mxu1 %v8738_v27  ;;  %v4972_v44 = vpack.c.bf16 %v4964_v48, %v4956_v7 }
0x1d92   : > { %8117 = vmatpush3.bf16.msra.mxu0 %v8739_v5 }
0x1d93   : > { %8139 = vmatpush3.bf16.msra.mxu1 %v8740_v31  ;;  %8118 = vmatprep.subr.bf16.mxu0 %v8741_v56 }
0x1d94   : > { %8140 = vmatprep.subr.bf16.mxu1 %v8742_v41 }
0x1d96   : > { %8119 = vmatpush3.bf16.msra.mxu0 %v8743_v20 }
0x1d97   : > { %8141 = vmatpush3.bf16.msra.mxu1 %v8744_v14  ;;  %8120 = vmatprep.subr.bf16.mxu0 %v8745_v54 }
0x1d98   : > { %8142 = vmatprep.subr.bf16.mxu1 %v8746_v58 }
0x1d9a   : > { %8121 = vmatpush3.bf16.msra.mxu0 %v8747_v36 }
0x1d9b   : > { %8143 = vmatpush3.bf16.msra.mxu1 %v8748_v1  ;;  %8122 = vmatprep.subr.bf16.mxu0 %v8749_v47 }
0x1d9c   : > { %8144 = vmatprep.subr.bf16.mxu1 %v8750_v29 }
0x1d9e   : > { %8123 = vmatpush3.bf16.msra.mxu0 %v8751_v51 }
0x1d9f   : > { %8145 = vmatpush3.bf16.msra.mxu1 %v8752_v55  ;;  %8444 = vmatprep.subr.bf16.mxu0 %v9166_v0 }
0x1da0   : > { %8452 = vmatprep.subr.bf16.mxu1 %v9166_v0 }
0x1da1   : > { %5479 = vmatmul.mubr.bf16.vlgmr.msra.gmra.mxu0 %v4970_v3 }
0x1da2   : > { %5520 = vmatmul.mubr.bf16.vlgmr.msra.gmra.mxu1 %v4972_v44  ;;  %8448 = vmatprep.mubr.msk.bf16.mxu0 %vm9167_vm0, %v9166_v0 }
0x1da3   : > { %8456 = vmatprep.mubr.msk.bf16.mxu1 %vm9167_vm0, %v9166_v0  ;;  %8445 = vmatpush3.bf16.msra.mxu0 %v8753_v45 }
0x1da4   : > { %8446 = vmatprep.subr.bf16.mxu0 %v9166_v0 }
0x1da7   : > { %8447 = vmatpush3.bf16.msra.mxu0 %v8754_v33 }
0x1da8   : > { %8460 = vmatprep.subr.bf16.mxu0 %v9166_v0 }
0x1e41   : > { %v8080_v52 = vpop.f32.mrf.mxu0 }
0x1e42   : > { %v8102_v17 = vpop.f32.mrf.mxu1 }
0x1e43   : > { %v8081_v15 = vpop.f32.mrf.mxu0 }
0x1e44   : > { %v8103_v39 = vpop.f32.mrf.mxu1  ;;  %v8082_v8 = vadd.f32 %v8081_v15, %v8080_v52  ;;  %v8756_v15 = vld [vmem:[%s10507_s1] sm:$0xff]  }
0x1e45   : > { %v8083_v37 = vpop.f32.mrf.mxu0  ;;  %v8104_v19 = vadd.f32 %v8103_v39, %v8102_v17  ;;  %v8755_v17 = vld [vmem:[%s10507_s1 + $0x8] sm:$0xff]   ;;  %s10513_s1 = smov 88  }
0x1e46   : > { %v8105_v23 = vpop.f32.mrf.mxu1  ;;  %v5399_v16 = vadd.f32 %v8082_v8, %v7738_v28  ;;  %8453 = vmatpush3.bf16.msra.mxu1 %v8755_v17 }
0x1e47   : > { %v8084_v50 = vpop.f32.mrf.mxu0  ;;  %8454 = vmatprep.subr.bf16.mxu1 %v9166_v0 }
0x1e48   : > { %v8085_v24 = vadd.f32 %v8084_v50, %v8083_v37  ;;  %v8106_v18 = vpop.f32.mrf.mxu1  ;;  %v5440_v26 = vadd.f32 %v8104_v19, %v5399_v16 }
0x1e49   : > { %v8107_v41 = vadd.f32 %v8106_v18, %v8105_v23  ;;  %v7807_v18 = vld [vmem:[%s10508_s0] ss:$0 sm:$0xff]  ;;  %s10512_s0 = smov 96  }
0x1e4a   : > { %v5402_v27 = vadd.f32 %v8085_v24, %v7738_v28  ;;  %8455 = vmatpush3.bf16.msra.mxu1 %v8756_v15 }
0x1e4b   : > { %8466 = vmatprep.subr.bf16.mxu1 %v9166_v0 }
0x1e4c   : > { %v5443_v32 = vadd.f32 %v8107_v41, %v5402_v27  ;;  %v7809_v41 = vld [vmem:[%s10510_s5] ss:$0 sm:$0xff]  ;;  %s10514_s5 = smov 56  }
0x1e61   : > { %v8124_v43 = vpop.f32.mrf.mxu0 }
0x1e62   : > { %v8146_v59 = vpop.f32.mrf.mxu1 }
0x1e63   : > { %v8125_v49 = vpop.f32.mrf.mxu0 }
0x1e64   : > { %v8126_v5 = vadd.f32 %v8125_v49, %v8124_v43  ;;  %v8147_v31 = vpop.f32.mrf.mxu1  ;;  %v7808_v49 = vld [vmem:[%s10509_s3] ss:$0 sm:$0xff]  ;;  %s10511_s3 = smov 120  }
0x1e65   : > { %v8127_v56 = vpop.f32.mrf.mxu0  ;;  %v8148_v58 = vadd.f32 %v8147_v31, %v8146_v59 }
0x1e66   : > { %v5481_v20 = vadd.f32 %v8126_v5, %v5440_v26  ;;  %v8149_v14 = vpop.f32.mrf.mxu1 }
0x1e67   : > { %v8128_v54 = vpop.f32.mrf.mxu0 }
0x1e68   : > { %v8129_v60 = vadd.f32 %v8128_v54, %v8127_v56  ;;  %v8150_v35 = vpop.f32.mrf.mxu1  ;;  %v5522_v36 = vadd.f32 %v8148_v58, %v5481_v20 }
0x1e69   : > { %v8151_v40 = vadd.f32 %v8150_v35, %v8149_v14 }
0x1e6a   : > { %v5484_v22 = vadd.f32 %v8129_v60, %v5443_v32  ;;  %v5528_v47 = vadd.f32 %v5522_v36, %v9950_v12 }
0x1e6c   : > { %v5525_v1 = vadd.f32 %v8151_v40, %v5484_v22 }
0x1e6e   : > { %v5529_v42 = vadd.f32 %v5525_v1, %v9952_v13 }
0x1e70   : > { %v5530_v29 = vpack.c.bf16 %v5529_v42, %v5528_v47 }
0x1e72   : > { %8449 = vmatmul.mubr.msk.bf16.vlgmr.msra.gmra.mxu0 %vm1907_vm2, %v5530_v29 }
0x1e73   : > { %8462 = vmatprep.mubr.msk.bf16.mxu0 %vm9167_vm0, %v9166_v0 }
0x1f32   : > { %v5586_v38 = vpop.f32.mrf.mxu0 }
0x1f33   : > { %v5587_v34 = vadd.f32 %v7803_v25, %v5586_v38 }
0x1f34   : > { %v8450_v46 = vpop.f32.mrf.mxu0 }
0x1f35   : > { %v5593_v51 = vsel %vm1907_vm2, %v5587_v34, 0.0 }
0x1f36   : > { %5594 = vadd.xlane.f32.xlu1 %v5593_v51  ;;  %v5589_v62 = vpop.f32.mrf.mxu0 }
0x1f37   : > { %v5590_v53 = vadd.f32 %v7803_v25, %v5589_v62 }
0x1f38   : > { %v8451_v55 = vpop.f32.mrf.mxu0 }
0x1f39   : > { %v5596_v12 = vsel %vm1907_vm2, %v5590_v53, 0.0 }
0x1f3a   : > { %5597 = vadd.xlane.f32.xlu0 %v5596_v12 }
0x1fbf   : > { %v5595_v13 = vpop.xlane.xlu1 %5594 }
0x1fc0   : > { %v5599_v61 = vmul.f32 0.03125, %v5595_v13 }
0x1fc2   : > { %v5601_v48 = vsub.f32 %v5587_v34, %v5599_v61 }
0x1fc3   : > { %v5598_v63 = vpop.xlane.xlu0 %5597 }
0x1fc4   : > { %v5600_v7 = vmul.f32 0.03125, %v5598_v63  ;;  %v5603_v3 = vmul.f32 %v5601_v48, %v5601_v48 }
0x1fc6   : > { %v5602_v44 = vsub.f32 %v5590_v53, %v5600_v7  ;;  %v5605_v45 = vsel %vm1907_vm2, %v5603_v3, 0.0 }
0x1fc7   : > { %5606 = vadd.xlane.f32.xlu0 %v5605_v45 }
0x1fc8   : > { %v5604_v33 = vmul.f32 %v5602_v44, %v5602_v44 }
0x1fca   : > { %v5608_v52 = vsel %vm1907_vm2, %v5604_v33, 0.0 }
0x1fcb   : > { %5609 = vadd.xlane.f32.xlu0 %v5608_v52 }
0x2050   : > { %v5607_v39 = vpop.xlane.xlu0 %5606 }
0x2051   : > { %v5611_v37 = vmul.f32 0.03125, %v5607_v39 }
0x2053   : > { %v5613_v8 = vadd.f32 1e-05, %v5611_v37 }
0x2054   : > { %v5610_v23 = vpop.xlane.xlu0 %5609 }
0x2055   : > { %8965 = vrsqrt.f32 %v5613_v8  ;;  %v5612_v28 = vmul.f32 0.03125, %v5610_v23 }
0x2057   : > { %v5614_v50 = vadd.f32 1e-05, %v5612_v28 }
0x2059   : > { %8967 = vrsqrt.f32 %v5614_v50 }
0x2062   : > { %v8966_v16 = vpop.eup %8965 }
0x2063   : > { %v5617_v24 = vmul.f32 %v8966_v16, %v5601_v48 }
0x2065   : > { %v5625_v59 = vmul.f32 %v7807_v18, %v5617_v24 }
0x2066   : > { %v8968_v43 = vpop.eup %8967 }
0x2067   : > { %v5618_v19 = vmul.f32 %v8968_v43, %v5602_v44  ;;  %v10118_v27 = vadd.f32 %v7808_v49, %v5625_v59 }
0x2069   : > { %v5626_v26 = vmul.f32 %v7807_v18, %v5618_v19 }
0x206b   : > { %v10120_v5 = vadd.f32 %v7808_v49, %v5626_v26 }
0x206d   : > { %v5635_v31 = vpack.c.bf16 %v10120_v5, %v10118_v27 }
0x206f   : > { %8457 = vmatmul.mubr.msk.bf16.vlgmr.msra.gmra.mxu1 %vm1907_vm2, %v5635_v31 }
0x2070   : > { %8468 = vmatprep.mubr.msk.bf16.mxu1 %vm9167_vm0, %v9166_v0 }
0x212f   : > { %v5691_v56 = vpop.f32.mrf.mxu1 }
0x2130   : > { %v5692_v54 = vadd.f32 %v7809_v41, %v5691_v56 }
0x2131   : > { %v8458_v20 = vpop.f32.mrf.mxu1 }
0x2133   : > { %v5694_v14 = vpop.f32.mrf.mxu1 }
0x2134   : > { %v5695_v32 = vadd.f32 %v7809_v41, %v5694_v14 }
0x2135   : > { %v8459_v58 = vpop.f32.mrf.mxu1 }
0x2136   : > { %v10128_v60 = vpack.c.bf16 %v5695_v32, %v5692_v54 }
0x2138   : > { %5820 = vrot.lane.b32.xlu1 %v10128_v60, %s10511_s3  ;;  %5700 = vrot.lane.b32.xlu0 %v10128_v60, %s10512_s0  ;;  %s10516_s3 = smov 80   ;;  %s10517_s0 = sld [smem:[#allocation32_spill]] }
0x213c   : > { %5822 = vrot.lane.b32.xlu0 %v10128_v60, %s10513_s1  ;;  %s10515_s1 = smov 64  }
0x21aa   : > { %v5701_v35 = vpop.permute.xlu0 %5700  ;;  %v5821_v1 = vpop.permute.xlu1 %5820 }
0x21ab   : > { %v5706_v36 = vsel %vm2018_vm3, %v5701_v35, 0 }
0x21ac   : > { %8461 = vmatpush3.bf16.xpose.msra.mxu0 %v5706_v36 }
0x21ad   : > { %8472 = vmatprep.subr.bf16.mxu0 %v9166_v0 }
0x21ae   : > { %v5823_v22 = vpop.permute.xlu0 %5822 }
0x21af   : > { %v5828_v40 = vsel %vm2018_vm3, %v5823_v22, 0  ;;  %v1662_v22 = vld [vmem:[%s10517_s0] sm:$0xf] }
0x21b3   : > { %8463 = vmatmul.mubr.msk.bf16.vlgmr.msra.gmra.mxu0 %vm2018_vm3, %v10128_v60 }
0x21b4   : > { %8473 = vmatpush3.bf16.xpose.msra.mxu0 %v5828_v40  ;;  %8474 = vmatprep.mubr.msk.bf16.mxu0 %vm9167_vm0, %v9166_v0  ;;  %v5993_v40 = vsel %vm2262_vm4, %v1662_v22, 0 }
0x21b5   : > { %8484 = vmatprep.subr.bf16.mxu0 %v9166_v0 }
0x21bb   : > { %8475 = vmatmul.mubr.msk.bf16.vlgmr.msra.gmra.mxu0 %vm2018_vm3, %v5821_v1  ;;  %v1663_v1 = vld [vmem:[%s10517_s0 + $0x4] sm:$0xf] }
0x21bc   : > { %8486 = vmatprep.mubr.msk.bf16.mxu0 %vm9167_vm0, %v9166_v0 }
0x2273   : > { %v5742_v47 = vpop.f32.mrf.mxu0 }
0x2274   : > { %v5749_v42 = vsel %vm1862_vm1, %v5742_v47, -inf }
0x2275   : > { %5750 = vmax.xlane.f32.xlu0 %v5749_v42  ;;  %v8464_v29 = vpop.f32.mrf.mxu0 }
0x2277   : > { %v5745_v25 = vpop.f32.mrf.mxu0 }
0x2278   : > { %v5752_v38 = vsel %vm1862_vm1, %v5745_v25, -inf }
0x2279   : > { %5753 = vmax.xlane.f32.xlu1 %v5752_v38  ;;  %v8465_v34 = vpop.f32.mrf.mxu0 }
0x227b   : > { %v5864_v46 = vpop.f32.mrf.mxu0 }
0x227c   : > { %v5871_v51 = vsel %vm1862_vm1, %v5864_v46, -inf }
0x227d   : > { %5872 = vmax.xlane.f32.xlu0 %v5871_v51  ;;  %v8476_v62 = vpop.f32.mrf.mxu0 }
0x227f   : > { %v5867_v53 = vpop.f32.mrf.mxu0 }
0x2280   : > { %v5874_v55 = vsel %vm1862_vm1, %v5867_v53, -inf }
0x2281   : > { %5875 = vmax.xlane.f32.xlu0 %v5874_v55  ;;  %v8477_v12 = vpop.f32.mrf.mxu0 }
0x22fe   : > { %v5751_v13 = vpop.xlane.xlu0 %5750 }
0x22ff   : > { %v5755_v61 = vsub.f32 %v5742_v47, %v5751_v13  ;;  %v5946_v47 = vsel %vm2262_vm4, %v1663_v1, 0 }
0x2300   : > { %8485 = vmatpush3.bf16.msra.mxu0 %v5946_v47  ;;  %v1664_v47 = vld [vmem:[%s10517_s0 + $0x8] sm:$0xf] }
0x2301   : > { %v5757_v48 = vmul.f32 1.442695, %v5755_v61  ;;  %8496 = vmatprep.subr.bf16.mxu0 %v9166_v0 }
0x2302   : > { %v5754_v63 = vpop.xlane.xlu1 %5753 }
0x2303   : > { %8969 = vpow2.f32 %v5757_v48  ;;  %v5756_v7 = vsub.f32 %v5745_v25, %v5754_v63 }
0x2305   : > { %v5759_v3 = vmul.f32 1.442695, %v5756_v7 }
0x2306   : > { %v5873_v44 = vpop.xlane.xlu0 %5872 }
0x2307   : > { %8971 = vpow2.f32 %v5759_v3  ;;  %v5877_v45 = vsub.f32 %v5864_v46, %v5873_v44 }
0x2309   : > { %v5879_v33 = vmul.f32 1.442695, %v5877_v45 }
0x230a   : > { %v5876_v52 = vpop.xlane.xlu0 %5875 }
0x230b   : > { %8973 = vpow2.f32 %v5879_v33  ;;  %v5878_v17 = vsub.f32 %v5867_v53, %v5876_v52 }
0x230d   : > { %v5881_v15 = vmul.f32 1.442695, %v5878_v17 }
0x230f   : > { %8975 = vpow2.f32 %v5881_v15 }
0x2310   : > { %v8970_v39 = vpop.eup %8969 }
0x2311   : > { %v5761_v37 = vsel %vm1862_vm1, %v8970_v39, 0.0 }
0x2312   : > { %5762 = vadd.xlane.f32.xlu0 %v5761_v37 }
0x2314   : > { %v8972_v8 = vpop.eup %8971 }
0x2315   : > { %v5764_v23 = vsel %vm1862_vm1, %v8972_v8, 0.0 }
0x2316   : > { %5765 = vadd.xlane.f32.xlu0 %v5764_v23 }
0x2318   : > { %v8974_v28 = vpop.eup %8973 }
0x2319   : > { %v5883_v50 = vsel %vm1862_vm1, %v8974_v28, 0.0 }
0x231a   : > { %5884 = vadd.xlane.f32.xlu0 %v5883_v50 }
0x231c   : > { %v8976_v16 = vpop.eup %8975 }
0x231d   : > { %v5886_v24 = vsel %vm1862_vm1, %v8976_v16, 0.0 }
0x231e   : > { %5887 = vadd.xlane.f32.xlu1 %v5886_v24 }
0x232f   : > { %5894 = vrot.lane.b32.xlu1 %v10128_v60, %s10514_s5 }
0x2330   : > { %5772 = vrot.lane.b32.xlu0 %v10128_v60, %s10515_s1 }
0x2333   : > { %6038 = vrot.lane.b32.xlu1 %v10128_v60, %s10516_s3 }
0x2334   : > { %6036 = vrot.lane.b32.xlu0 %v10128_v60, %s10492_s11  ;;  %s7916_s11 = sshll.u32 %s10522_s23, 5 }
0x239b   : > { %v5763_v18 = vpop.xlane.xlu0 %5762 }
0x239c   : > { %8977 = vrcp.f32 %v5763_v18 }
0x239f   : > { %v5766_v43 = vpop.xlane.xlu0 %5765 }
0x23a0   : > { %8979 = vrcp.f32 %v5766_v43 }
0x23a3   : > { %v5885_v19 = vpop.xlane.xlu0 %5884 }
0x23a4   : > { %8981 = vrcp.f32 %v5885_v19 }
0x23a7   : > { %v5888_v59 = vpop.xlane.xlu1 %5887  ;;  %v5773_v49 = vpop.permute.xlu0 %5772 }
0x23a8   : > { %8983 = vrcp.f32 %v5888_v59  ;;  %8467 = vmatpush3.bf16.msra.mxu1 %v5773_v49 }
0x23a9   : > { %8478 = vmatprep.subr.bf16.mxu1 %v9166_v0  ;;  %v8978_v26 = vpop.eup %8977 }
0x23aa   : > { %v5769_v56 = vmul.f32 %v8978_v26, %v8970_v39 }
0x23ab   : > { %v5895_v14 = vpop.permute.xlu1 %5894  ;;  %v6037_v61 = vpop.permute.xlu0 %6036 }
0x23ad   : > { %v8980_v31 = vpop.eup %8979 }
0x23ae   : > { %v5770_v41 = vmul.f32 %v8980_v31, %v8972_v8 }
0x23af   : > { %v6039_v62 = vpop.permute.xlu1 %6038 }
0x23b0   : > { %v5771_v20 = vpack.c.bf16 %v5770_v41, %v5769_v56  ;;  %v6044_v13 = vsel %vm2018_vm3, %v6039_v62, 0 }
0x23b1   : > { %v8982_v54 = vpop.eup %8981 }
0x23b2   : > { %8469 = vmatmul.mubr.msk.bf16.vlgmr.msra.gmra.mxu1 %vm1862_vm1, %v5771_v20  ;;  %v5891_v58 = vmul.f32 %v8982_v54, %v8974_v28 }
0x23b3   : > { %8479 = vmatpush3.bf16.msra.mxu1 %v5895_v14  ;;  %8480 = vmatprep.mubr.msk.bf16.mxu1 %vm9167_vm0, %v9166_v0 }
0x23b4   : > { %8490 = vmatprep.subr.bf16.mxu1 %v9166_v0 }
0x23b5   : > { %v8984_v32 = vpop.eup %8983 }
0x23b6   : > { %v5892_v35 = vmul.f32 %v8984_v32, %v8976_v16 }
0x23b8   : > { %v5893_v36 = vpack.c.bf16 %v5892_v35, %v5891_v58 }
0x23ba   : > { %8481 = vmatmul.mubr.msk.bf16.vlgmr.msra.gmra.mxu1 %vm1862_vm1, %v5893_v36 }
0x23bb   : > { %8492 = vmatprep.mubr.msk.bf16.mxu1 %vm9167_vm0, %v9166_v0  ;;  %8491 = vmatpush3.bf16.msra.mxu1 %v5993_v40 }
0x23bc   : > { %8502 = vmatprep.subr.bf16.mxu1 %v9166_v0 }
0x2472   : > { %v5812_v42 = vpop.f32.mrf.mxu1 }
0x2474   : > { %v8470_v29 = vpop.f32.mrf.mxu1 }
0x2476   : > { %v5815_v25 = vpop.f32.mrf.mxu1 }
0x2477   : > { %v5819_v38 = vpack.c.bf16 %v5815_v25, %v5812_v42  ;;  %v6162_v42 = vsel %vm2262_vm4, %v1664_v47, 0 }
0x2478   : > { %v8471_v34 = vpop.f32.mrf.mxu1 }
0x2479   : > { %8493 = vmatmul.mubr.msk.bf16.vlgmr.msra.gmra.mxu1 %vm2018_vm3, %v5819_v38 }
0x247a   : > { %v5934_v46 = vpop.f32.mrf.mxu1  ;;  %8504 = vmatprep.mubr.msk.bf16.mxu1 %vm9167_vm0, %v9166_v0 }
0x247c   : > { %v8482_v51 = vpop.f32.mrf.mxu1 }
0x247e   : > { %v5937_v53 = vpop.f32.mrf.mxu1 }
0x247f   : > { %v5941_v55 = vpack.c.bf16 %v5937_v53, %v5934_v46 }
0x2480   : > { %v8483_v12 = vpop.f32.mrf.mxu1 }
0x2481   : > { %8487 = vmatmul.mubr.msk.bf16.vlgmr.msra.gmra.mxu0 %vm2018_vm3, %v5941_v55 }
0x2482   : > { %8497 = vmatpush3.bf16.xpose.msra.mxu0 %v6044_v13  ;;  %8498 = vmatprep.mubr.msk.bf16.mxu0 %vm9167_vm0, %v9166_v0 }
0x2483   : > { %8508 = vmatprep.subr.bf16.mxu0 %v9166_v0 }
0x2489   : > { %8499 = vmatmul.mubr.msk.bf16.vlgmr.msra.gmra.mxu0 %vm2018_vm3, %v6037_v61 }
0x248a   : > { %8510 = vmatprep.mubr.msk.bf16.mxu0 %vm9167_vm0, %v9166_v0  ;;  %8509 = vmatpush3.bf16.msra.mxu0 %v6162_v42 }
0x248b   : > { %8520 = vmatprep.subr.bf16.mxu0 %v9166_v0 }
0x2539   : > { %v6029_v48 = vpop.f32.mrf.mxu1 }
0x253b   : > { %v8494_v63 = vpop.f32.mrf.mxu1 }
0x253d   : > { %v6032_v7 = vpop.f32.mrf.mxu1 }
0x253f   : > { %v8495_v3 = vpop.f32.mrf.mxu1 }
0x2541   : > { %v5982_v44 = vpop.f32.mrf.mxu0 }
0x2542   : > { %v10188_v45 = vadd.f32 %v6029_v48, %v5982_v44 }
0x2543   : > { %v8488_v33 = vpop.f32.mrf.mxu0 }
0x2545   : > { %v5985_v52 = vpop.f32.mrf.mxu0 }
0x2546   : > { %v10190_v17 = vadd.f32 %v6032_v7, %v5985_v52 }
0x2547   : > { %v8489_v15 = vpop.f32.mrf.mxu0 }
0x2549   : > { %v6080_v39 = vpop.f32.mrf.mxu0 }
0x254a   : > { %v6087_v37 = vsel %vm1862_vm1, %v6080_v39, -inf }
0x254b   : > { %6088 = vmax.xlane.f32.xlu1 %v6087_v37  ;;  %v8500_v8 = vpop.f32.mrf.mxu0 }
0x254d   : > { %v6083_v23 = vpop.f32.mrf.mxu0 }
0x254e   : > { %v6090_v28 = vsel %vm1862_vm1, %v6083_v23, -inf }
0x254f   : > { %6091 = vmax.xlane.f32.xlu0 %v6090_v28  ;;  %v8501_v50 = vpop.f32.mrf.mxu0 }
0x25d4   : > { %v6089_v16 = vpop.xlane.xlu1 %6088 }
0x25d5   : > { %v6093_v24 = vsub.f32 %v6080_v39, %v6089_v16 }
0x25d7   : > { %v6095_v18 = vmul.f32 1.442695, %v6093_v24 }
0x25d8   : > { %v6092_v43 = vpop.xlane.xlu0 %6091 }
0x25d9   : > { %8985 = vpow2.f32 %v6095_v18  ;;  %v6094_v19 = vsub.f32 %v6083_v23, %v6092_v43 }
0x25db   : > { %v6097_v59 = vmul.f32 1.442695, %v6094_v19 }
0x25dd   : > { %8987 = vpow2.f32 %v6097_v59 }
0x25e6   : > { %v8986_v49 = vpop.eup %8985 }
0x25e7   : > { %v6099_v26 = vsel %vm1862_vm1, %v8986_v49, 0.0 }
0x25e8   : > { %6100 = vadd.xlane.f32.xlu0 %v6099_v26 }
0x25ea   : > { %v8988_v31 = vpop.eup %8987 }
0x25eb   : > { %v6102_v56 = vsel %vm1862_vm1, %v8988_v31, 0.0 }
0x25ec   : > { %6103 = vadd.xlane.f32.xlu1 %v6102_v56 }
0x25fd   : > { %6209 = vrot.lane.b32.xlu1 %v10128_v60, %s10494_s18  ;;  %s1320_s18 = scalar_lea.vmem %s9403_s20, %s7916_s11 }
0x25fe   : > { %6110 = vrot.lane.b32.xlu0 %v10128_v60, %s10495_s10  ;;  %s10520_s10 = sld [smem:[#allocation34_spill]] }
0x2601   : > { %6207 = vrot.lane.b32.xlu1 %v10128_v60, %s10496_s7  ;;  %s10519_s7 = sld [smem:[#allocation35_spill]] }
0x2671   : > { %v6101_v41 = vpop.xlane.xlu0 %6100 }
0x2672   : > { %8989 = vrcp.f32 %v6101_v41 }
0x2675   : > { %v6104_v20 = vpop.xlane.xlu1 %6103  ;;  %v6111_v14 = vpop.permute.xlu0 %6110 }
0x2676   : > { %8991 = vrcp.f32 %v6104_v20  ;;  %8503 = vmatpush3.bf16.msra.mxu1 %v6111_v14 }
0x2677   : > { %8514 = vmatprep.subr.bf16.mxu1 %v9166_v0 }
0x2679   : > { %v6210_v36 = vpop.permute.xlu1 %6209 }
0x267a   : > { %v6215_v40 = vsel %vm2018_vm3, %v6210_v36, 0 }
0x267d   : > { %v6208_v1 = vpop.permute.xlu1 %6207 }
0x267f   : > { %v8990_v54 = vpop.eup %8989 }
0x2680   : > { %v6107_v58 = vmul.f32 %v8990_v54, %v8986_v49 }
0x2683   : > { %v8992_v32 = vpop.eup %8991 }
0x2684   : > { %v6108_v35 = vmul.f32 %v8992_v32, %v8988_v31 }
0x2686   : > { %v6109_v22 = vpack.c.bf16 %v6108_v35, %v6107_v58 }
0x2688   : > { %8505 = vmatmul.mubr.msk.bf16.vlgmr.msra.gmra.mxu1 %vm1862_vm1, %v6109_v22 }
0x2689   : > { %8515 = vmatpush3.bf16.xpose.msra.mxu1 %v6215_v40  ;;  %8516 = vmatprep.mubr.msk.bf16.mxu1 %vm9167_vm0, %v9166_v0 }
0x268a   : > { %8526 = vmatprep.subr.bf16.mxu1 %v9166_v0 }
0x2690   : > { %8517 = vmatmul.mubr.msk.bf16.vlgmr.msra.gmra.mxu1 %vm2018_vm3, %v6208_v1 }
0x2691   : > { %8528 = vmatprep.mubr.msk.bf16.mxu1 %vm9167_vm0, %v9166_v0 }
0x2748   : > { %v6150_v29 = vpop.f32.mrf.mxu1 }
0x274a   : > { %v8506_v25 = vpop.f32.mrf.mxu1 }
0x274c   : > { %v6153_v38 = vpop.f32.mrf.mxu1 }
0x274d   : > { %v6157_v34 = vpack.c.bf16 %v6153_v38, %v6150_v29 }
0x274e   : > { %v8507_v46 = vpop.f32.mrf.mxu1 }
0x274f   : > { %8511 = vmatmul.mubr.msk.bf16.vlgmr.msra.gmra.mxu0 %vm2018_vm3, %v6157_v34 }
0x2750   : > { %v6251_v51 = vpop.f32.mrf.mxu1  ;;  %8522 = vmatprep.mubr.msk.bf16.mxu0 %vm9167_vm0, %v9166_v0 }
0x2751   : > { %v6258_v62 = vsel %vm1862_vm1, %v6251_v51, -inf }
0x2752   : > { %6259 = vmax.xlane.f32.xlu0 %v6258_v62  ;;  %v8518_v53 = vpop.f32.mrf.mxu1 }
0x2754   : > { %v6254_v55 = vpop.f32.mrf.mxu1 }
0x2755   : > { %v6261_v12 = vsel %vm1862_vm1, %v6254_v55, -inf }
0x2756   : > { %6262 = vmax.xlane.f32.xlu1 %v6261_v12  ;;  %v8519_v13 = vpop.f32.mrf.mxu1 }
0x2757   : > { %v1677_v13 = vld [vmem:[%s10519_s7 + $0x40] sm:$0xff] }
0x2767   : > { %6281 = vrot.lane.b32.xlu1 %v10128_v60, %s10497_s2  ;;  %s10518_s2 = sld [smem:[#allocation33_spill]] }
0x276d   : > { %v7825_v14 = vld [vmem:[%s10518_s2] ss:$0 sm:$0xff] }
0x27db   : > { %v6260_v61 = vpop.xlane.xlu0 %6259 }
0x27dc   : > { %v6264_v48 = vsub.f32 %v6251_v51, %v6260_v61  ;;  %v1681_v61 = vld [vmem:[%s10519_s7 + $0x60] sm:$0xff] }
0x27de   : > { %v6266_v63 = vmul.f32 1.442695, %v6264_v48  ;;  %v1678_v48 = vld [vmem:[%s10519_s7 + $0x48] sm:$0xff] }
0x27df   : > { %v6263_v7 = vpop.xlane.xlu1 %6262 }
0x27e0   : > { %8993 = vpow2.f32 %v6266_v63  ;;  %v6265_v3 = vsub.f32 %v6254_v55, %v6263_v7  ;;  %v7837_v63 = vcombine.high %v1677_v13, %v1681_v61  ;;  %v1682_v7 = vld [vmem:[%s10519_s7 + $0x68] sm:$0xff] }
0x27e2   : > { %v6268_v44 = vmul.f32 1.442695, %v6265_v3  ;;  %v7836_v3 = vcombine.low %v1677_v13, %v1681_v61  ;;  %v8764_v13 = vld [vmem:[%s9393_s4 + $0xb0] sm:$0xff]   ;;  %v8765_v61 = vld [vmem:[%s9393_s4 + $0x68] sm:$0xff]  }
0x27e3   : > { %v6282_v0 = vpop.permute.xlu1 %6281 }
0x27e4   : > { %8995 = vpow2.f32 %v6268_v44  ;;  %8521 = vmatpush3.bf16.msra.mxu0 %v6282_v0  ;;  %v7838_v44 = vcombine.low %v1678_v48, %v1682_v7  ;;  %v7839_v0 = vcombine.high %v1678_v48, %v1682_v7  ;;  %v8766_v48 = vld [vmem:[%s9393_s4 + $0xe8] sm:$0xff]  }
0x27e5   : > { %6567 = vmatprep.subr.bf16.mxu0 %v7837_v63  ;;  %v8767_v63 = vld [vmem:[%s9393_s4 + $0x28] sm:$0xff]  }
0x27e6   : > { %v8768_v7 = vld [vmem:[%s9393_s4 + $0xa8] sm:$0xff]  }
0x27ed   : > { %v8994_v33 = vpop.eup %8993 }
0x27ee   : > { %v6270_v52 = vsel %vm1862_vm1, %v8994_v33, 0.0 }
0x27ef   : > { %6271 = vadd.xlane.f32.xlu0 %v6270_v52  ;;  %v1673_v52 = vld [vmem:[%s10519_s7 + $0x20] sm:$0xff] }
0x27f1   : > { %v8996_v15 = vpop.eup %8995 }
0x27f2   : > { %v6273_v39 = vsel %vm1862_vm1, %v8996_v15, 0.0 }
0x27f3   : > { %6274 = vadd.xlane.f32.xlu0 %v6273_v39 }
0x280f   : > { %v6198_v37 = vpop.f32.mrf.mxu0 }
0x2810   : > { %v6205_v60 = vadd.f32 %v6198_v37, %v10188_v45  ;;  %v1665_v45 = vld [vmem:[%s10517_s0 + $0xc] sm:$0xf] }
0x2811   : > { %v8512_v8 = vpop.f32.mrf.mxu0  ;;  %v6333_v26 = vsel %vm2262_vm4, %v1665_v45, 0 }
0x2812   : > { %8527 = vmatpush3.bf16.msra.mxu1 %v6333_v26 }
0x2813   : > { %v6201_v23 = vpop.f32.mrf.mxu0  ;;  %6610 = vmatprep.subr.bf16.mxu1 %v7839_v0  ;;  %v8771_v0 = vld [vmem:[%s9393_s4 + $0x20] sm:$0xff]  }
0x2814   : > { %v6206_v28 = vadd.f32 %v6201_v23, %v10190_v17 }
0x2815   : > { %v8513_v50 = vpop.f32.mrf.mxu0 }
0x2816   : > { %v1683_v50 = vld [vmem:[%s10519_s7 + $0x70] sm:$0xff] }
0x2878   : > { %v6272_v16 = vpop.xlane.xlu0 %6271 }
0x2879   : > { %8997 = vrcp.f32 %v6272_v16  ;;  %v1680_v16 = vld [vmem:[%s10519_s7 + $0x58] sm:$0xff] }
0x287c   : > { %v6275_v24 = vpop.xlane.xlu0 %6274 }
0x287d   : > { %8999 = vrcp.f32 %v6275_v24 }
0x2886   : > { %v8998_v18 = vpop.eup %8997 }
0x2887   : > { %v6278_v19 = vmul.f32 %v8998_v18, %v8994_v33  ;;  %v1669_v33 = vld [vmem:[%s10519_s7] sm:$0xff]  ;;  %v1684_v18 = vld [vmem:[%s10519_s7 + $0x78] sm:$0xff] }
0x2888   : > { %v7828_v39 = vcombine.low %v1669_v33, %v1673_v52  ;;  %v7829_v37 = vcombine.high %v1669_v33, %v1673_v52  ;;  %v8772_v33 = vld [vmem:[%s9393_s4 + $0xa0] sm:$0xff]   ;;  %v8773_v52 = vld [vmem:[%s9393_s4 + $0x58] sm:$0xff]  }
0x288a   : > { %v9000_v43 = vpop.eup %8999 }
0x288b   : > { %v6279_v59 = vmul.f32 %v9000_v43, %v8996_v15  ;;  %v1670_v15 = vld [vmem:[%s10519_s7 + $0x8] sm:$0xff] }
0x288d   : > { %v6280_v49 = vpack.c.bf16 %v6279_v59, %v6278_v19  ;;  %v7842_v19 = vcombine.low %v1680_v16, %v1684_v18  ;;  %v7843_v59 = vcombine.high %v1680_v16, %v1684_v18  ;;  %v8782_v16 = vld [vmem:[%s9393_s4 + $0xc8] sm:$0xff]  }
0x288e   : > { %v8784_v18 = vld [vmem:[%s9393_s4 + $0x88] sm:$0xff]  }
0x288f   : > { %8523 = vmatmul.mubr.msk.bf16.vlgmr.msra.gmra.mxu0 %vm1862_vm1, %v6280_v49 }
0x2890   : > { %6587 = vmatprep.mubr.bf16.mxu0 %v9179_v57  ;;  %6568 = vmatpush1.bf16.msra.mxu0 %v7836_v3  ;;  %v8769_v3 = vld [vmem:[%s9393_s4 + $0x60] sm:$0xff]  }
0x2891   : > { %6569 = vmatprep.subr.bf16.mxu0 %v7829_v37  ;;  %v8776_v37 = vld [vmem:[%s9393_s4 + $0x98] sm:$0xff]  }
0x2894   : > { %6570 = vmatpush1.bf16.msra.mxu0 %v7828_v39  ;;  %v8775_v39 = vld [vmem:[%s9393_s4 + $0x18] sm:$0xff]  }
0x294f   : > { %v6321_v17 = vpop.f32.mrf.mxu0 }
0x2951   : > { %v8524_v31 = vpop.f32.mrf.mxu0 }
0x2953   : > { %v6324_v56 = vpop.f32.mrf.mxu0 }
0x2954   : > { %v6328_v41 = vpack.c.bf16 %v6324_v56, %v6321_v17 }
0x2955   : > { %v8525_v20 = vpop.f32.mrf.mxu0 }
0x2956   : > { %8529 = vmatmul.mubr.msk.bf16.vlgmr.msra.gmra.mxu1 %vm2018_vm3, %v6328_v41 }
0x2957   : > { %6630 = vmatprep.mubr.bf16.mxu1 %v9179_v57  ;;  %6611 = vmatpush1.bf16.msra.mxu1 %v7838_v44  ;;  %v8770_v44 = vld [vmem:[%s9393_s4 + $0xe0] sm:$0xff]  }
0x2a16   : > { %v6369_v54 = vpop.f32.mrf.mxu1 }
0x2a17   : > { %v6376_v32 = vadd.f32 %v6369_v54, %v6205_v60  ;;  %v1674_v60 = vld [vmem:[%s10519_s7 + $0x28] sm:$0xff] }
0x2a18   : > { %v8530_v58 = vpop.f32.mrf.mxu1  ;;  %v7830_v8 = vcombine.low %v1670_v15, %v1674_v60  ;;  %v7831_v23 = vcombine.high %v1670_v15, %v1674_v60  ;;  %v8774_v15 = vld [vmem:[%s9393_s4 + $0xd8] sm:$0xff]   ;;  %v8777_v60 = vld [vmem:[%s9393_s4 + $0x50] sm:$0xff]  }
0x2a19   : > { %v6384_v35 = vadd.f32 %v7825_v14, %v6376_v32 }
0x2a1a   : > { %v6372_v36 = vpop.f32.mrf.mxu1  ;;  %6612 = vmatprep.subr.bf16.mxu1 %v7831_v23  ;;  %v8779_v23 = vld [vmem:[%s9393_s4 + $0x10] sm:$0xff]  }
0x2a1b   : > { %v6377_v22 = vadd.f32 %v6372_v36, %v6206_v28  ;;  %v6386_v40 = vadd.f32 %v6384_v35, %v10118_v27  ;;  %v1679_v28 = vld [vmem:[%s10519_s7 + $0x50] sm:$0xff]  ;;  %6613 = vmatpush1.bf16.msra.mxu1 %v7830_v8  ;;  %v7827_v35 = vld [vmem:[#allocation2] ss:$0 sm:$0xff] }
0x2a1c   : > { %v8531_v1 = vpop.f32.mrf.mxu1  ;;  %v7841_v24 = vcombine.high %v1679_v28, %v1683_v50  ;;  %v7840_v43 = vcombine.low %v1679_v28, %v1683_v50  ;;  %6696 = vmatprep.subr.bf16.mxu1 %v7843_v59  ;;  %v8778_v8 = vld [vmem:[%s9393_s4 + $0xd0] sm:$0xff]   ;;  %v8781_v50 = vld [vmem:[%s9393_s4 + $0x48] sm:$0xff]   ;;  %v8787_v59 = vld [vmem:[%s9393_s4] sm:$0xff]  }
0x2a1d   : > { %v6385_v47 = vadd.f32 %v7825_v14, %v6377_v22  ;;  %v6388_v42 = vsel %vm1907_vm2, %v6386_v40, 0.0  ;;  %v7826_v14 = vld [vmem:[%s10520_s10] ss:$0 sm:$0xff]  ;;  %v1671_v22 = vld [vmem:[%s10519_s7 + $0x10] sm:$0xff]  ;;  %v1672_v1 = vld [vmem:[%s10519_s7 + $0x18] sm:$0xff] }
0x2a1e   : > { %6389 = vadd.xlane.f32.xlu0 %v6388_v42  ;;  %6653 = vmatprep.subr.bf16.mxu0 %v7841_v24  ;;  %v8780_v28 = vld [vmem:[%s9393_s4 + $0x90] sm:$0xff]   ;;  %v8783_v24 = vld [vmem:[%s9393_s4 + $0x8] sm:$0xff]  }
0x2a1f   : > { %v6387_v29 = vadd.f32 %v6385_v47, %v10120_v5  ;;  %v1676_v47 = vld [vmem:[%s10519_s7 + $0x38] sm:$0xff] }
0x2a21   : > { %v6391_v25 = vsel %vm1907_vm2, %v6387_v29, 0.0 }
0x2a22   : > { %6392 = vadd.xlane.f32.xlu0 %v6391_v25 }
0x2aa7   : > { %v6390_v38 = vpop.xlane.xlu0 %6389 }
0x2aa8   : > { %v6394_v34 = vmul.f32 0.03125, %v6390_v38 }
0x2aaa   : > { %v6396_v46 = vsub.f32 %v6386_v40, %v6394_v34  ;;  %v1675_v40 = vld [vmem:[%s10519_s7 + $0x30] sm:$0xff]  ;;  %v7835_v34 = vcombine.high %v1672_v1, %v1676_v47 }
0x2aab   : > { %v6393_v51 = vpop.xlane.xlu0 %6392  ;;  %v7833_v38 = vcombine.high %v1671_v22, %v1675_v40 }
0x2aac   : > { %v6395_v62 = vmul.f32 0.03125, %v6393_v51  ;;  %v6398_v27 = vmul.f32 %v6396_v46, %v6396_v46  ;;  %v7834_v51 = vcombine.low %v1672_v1, %v1676_v47 }
0x2aae   : > { %v6397_v53 = vsub.f32 %v6387_v29, %v6395_v62  ;;  %v6400_v55 = vsel %vm1907_vm2, %v6398_v27, 0.0  ;;  %v8757_v62 = vld [vmem:[%s9393_s4 + $0x78] sm:$0xff]  }
0x2aaf   : > { %6401 = vadd.xlane.f32.xlu0 %v6400_v55  ;;  %v8758_v27 = vld [vmem:[%s9393_s4 + $0xf8] sm:$0xff]  }
0x2ab0   : > { %v6399_v12 = vmul.f32 %v6397_v53, %v6397_v53  ;;  %v8760_v55 = vld [vmem:[%s9393_s4 + $0xb8] sm:$0xff]  }
0x2ab2   : > { %v6403_v5 = vsel %vm1907_vm2, %v6399_v12, 0.0  ;;  %v8761_v12 = vld [vmem:[%s9393_s4 + $0x70] sm:$0xff]  }
0x2ab3   : > { %6404 = vadd.xlane.f32.xlu0 %v6403_v5  ;;  %v8762_v5 = vld [vmem:[%s9393_s4 + $0xf0] sm:$0xff]  }
0x2b38   : > { %v6402_v49 = vpop.xlane.xlu0 %6401 }
0x2b39   : > { %v6406_v45 = vmul.f32 0.03125, %v6402_v49  ;;  %v8788_v49 = vld [vmem:[%s9393_s4 + $0x80] sm:$0xff]  }
0x2b3b   : > { %v6408_v26 = vadd.f32 1e-05, %v6406_v45  ;;  %v8789_v45 = vld [vmem:[%s9393_s4 + $0x178] sm:$0xff]  }
0x2b3c   : > { %v6405_v17 = vpop.xlane.xlu0 %6404 }
0x2b3d   : > { %9001 = vrsqrt.f32 %v6408_v26  ;;  %v6407_v31 = vmul.f32 0.03125, %v6405_v17  ;;  %v8790_v26 = vld [vmem:[%s9393_s4 + $0x1f8] sm:$0xff]   ;;  %v10302_v17 = vld [vmem:[%s9388_s27] sm:$0xff] }
0x2b3f   : > { %v6409_v56 = vadd.f32 1e-05, %v6407_v31  ;;  %v6435_v31 = vrot.slane %v10302_v17, %v9667_v4 }
0x2b41   : > { %9003 = vrsqrt.f32 %v6409_v56  ;;  %v6443_v56 = vrot.slane %v10302_v17, %v9670_v6 }
0x2b4a   : > { %v9002_v41 = vpop.eup %9001 }
0x2b4b   : > { %v6412_v20 = vmul.f32 %v9002_v41, %v6396_v46  ;;  %v7832_v46 = vcombine.low %v1671_v22, %v1675_v40 }
0x2b4d   : > { %v6420_v32 = vmul.f32 %v7826_v14, %v6412_v20 }
0x2b4e   : > { %v9004_v54 = vpop.eup %9003 }
0x2b4f   : > { %v6413_v58 = vmul.f32 %v9004_v54, %v6397_v53  ;;  %v10255_v42 = vadd.f32 %v7827_v35, %v6420_v32  ;;  %v8759_v53 = vld [vmem:[%s9393_s4 + $0x38] sm:$0xff]   ;;  %v6447_v54 = vrot.slane %v10302_v17, %v9679_v10 }
0x2b51   : > { %v6421_v36 = vmul.f32 %v7826_v14, %v6413_v58  ;;  %v6439_v14 = vrot.slane %v10302_v17, %v9676_v9 }
0x2b53   : > { %v10257_v29 = vadd.f32 %v7827_v35, %v6421_v36 }
0x2b55   : > { %v6430_v25 = vpack.c.bf16 %v10257_v29, %v10255_v42 }
0x2b57   : > { %7844 = vmatmul.mubr.msk.bf16.vlgmr.msra.gmra.mxu0 %vm1907_vm2, %v6430_v25  ;;  %7845 = vmatmul.mubr.msk.bf16.vlgmr.msra.gmra.mxu1 %vm1907_vm2, %v6430_v25 }
0x2b58   : > { %6654 = vmatpush1.bf16.msra.mxu0 %v7840_v43  ;;  %6697 = vmatpush1.bf16.msra.mxu1 %v7842_v19  ;;  %v8785_v43 = vld [vmem:[%s9393_s4 + $0x40] sm:$0xff]  }
0x2b59   : > { %6655 = vmatprep.subr.bf16.mxu0 %v7833_v38  ;;  %6698 = vmatprep.subr.bf16.mxu1 %v7835_v34  ;;  %v8786_v19 = vld [vmem:[%s9393_s4 + $0xc0] sm:$0xff]  }
0x2b5a   : > { %6673 = vmatprep.mubr.bf16.mxu0 %v9179_v57  ;;  %6716 = vmatprep.mubr.bf16.mxu1 %v9179_v57  ;;  %v8763_v57 = vld [vmem:[%s9393_s4 + $0x30] sm:$0xff]  }
0x2b5c   : > { %6656 = vmatpush1.bf16.msra.mxu0 %v7832_v46  ;;  %6699 = vmatpush1.bf16.msra.mxu1 %v7834_v51 }
0x2b5d   : > { %8182 = vmatprep.subr.bf16.mxu0 %v8757_v62  ;;  %8204 = vmatprep.subr.bf16.mxu1 %v8758_v27  ;;  %v6455_v62 = vrot.slane %v10302_v17, %v9693_v21 }
0x2b5f   : > { %7846 = vmatmul.mubr.msk.bf16.vlgmr.msra.gmra.mxu0 %vm1907_vm2, %v6430_v25  ;;  %7847 = vmatmul.mubr.msk.bf16.vlgmr.msra.gmra.mxu1 %vm1907_vm2, %v6430_v25 }
0x2b60   : > { %8183 = vmatpush3.bf16.msra.mxu0 %v8759_v53  ;;  %8205 = vmatpush3.bf16.msra.mxu1 %v8760_v55 }
0x2b61   : > { %8184 = vmatprep.subr.bf16.mxu0 %v8761_v12  ;;  %8206 = vmatprep.subr.bf16.mxu1 %v8762_v5 }
0x2b64   : > { %8185 = vmatpush3.bf16.msra.mxu0 %v8763_v57  ;;  %8207 = vmatpush3.bf16.msra.mxu1 %v8764_v13  ;;  %v6463_v57 = vrot.slane %v10302_v17, %v9698_v30 }
0x2b65   : > { %8186 = vmatprep.subr.bf16.mxu0 %v8765_v61  ;;  %8208 = vmatprep.subr.bf16.mxu1 %v8766_v48 }
0x2b68   : > { %8187 = vmatpush3.bf16.msra.mxu0 %v8767_v63  ;;  %8209 = vmatpush3.bf16.msra.mxu1 %v8768_v7 }
0x2b69   : > { %8188 = vmatprep.subr.bf16.mxu0 %v8769_v3  ;;  %8210 = vmatprep.subr.bf16.mxu1 %v8770_v44 }
0x2b6c   : > { %8189 = vmatpush3.bf16.msra.mxu0 %v8771_v0  ;;  %8211 = vmatpush3.bf16.msra.mxu1 %v8772_v33 }
0x2b6d   : > { %8190 = vmatprep.subr.bf16.mxu0 %v8773_v52  ;;  %8212 = vmatprep.subr.bf16.mxu1 %v8774_v15 }
0x2b70   : > { %8191 = vmatpush3.bf16.msra.mxu0 %v8775_v39  ;;  %8213 = vmatpush3.bf16.msra.mxu1 %v8776_v37 }
0x2b71   : > { %8192 = vmatprep.subr.bf16.mxu0 %v8777_v60  ;;  %8214 = vmatprep.subr.bf16.mxu1 %v8778_v8 }
0x2b74   : > { %8193 = vmatpush3.bf16.msra.mxu0 %v8779_v23  ;;  %8215 = vmatpush3.bf16.msra.mxu1 %v8780_v28 }
0x2b75   : > { %8194 = vmatprep.subr.bf16.mxu0 %v8781_v50  ;;  %8216 = vmatprep.subr.bf16.mxu1 %v8782_v16 }
0x2b78   : > { %8195 = vmatpush3.bf16.msra.mxu0 %v8783_v24  ;;  %8217 = vmatpush3.bf16.msra.mxu1 %v8784_v18 }
0x2b79   : > { %8196 = vmatprep.subr.bf16.mxu0 %v8785_v43  ;;  %8218 = vmatprep.subr.bf16.mxu1 %v8786_v19 }
0x2b7c   : > { %8197 = vmatpush3.bf16.msra.mxu0 %v8787_v59  ;;  %8219 = vmatpush3.bf16.msra.mxu1 %v8788_v49 }
0x2b7d   : > { %8226 = vmatprep.subr.bf16.mxu0 %v8789_v45  ;;  %8248 = vmatprep.subr.bf16.mxu1 %v8790_v26 }
0x2c17   : > { %v6589_v41 = vpop.f32.mrf.mxu0  ;;  %v6632_v20 = vpop.f32.mrf.mxu1 }
0x2c18   : > { %v6590_v32 = vadd.f32 %v6589_v41, %v6435_v31  ;;  %v10312_v58 = vadd.f32 %v6632_v20, %v6443_v56 }
0x2c19   : > { %v6591_v35 = vpop.f32.mrf.mxu0  ;;  %v6634_v36 = vpop.f32.mrf.mxu1 }
0x2c1a   : > { %v6743_v22 = vmul.f32 0.70710677, %v6590_v32  ;;  %v6745_v40 = vmul.f32 0.70710677, %v10312_v58  ;;  %v6592_v4 = vadd.f32 %v6591_v35, %v6439_v14  ;;  %v10315_v1 = vadd.f32 %v6634_v36, %v6447_v54 }
0x2c1b   : > { %v6593_v6 = vpop.f32.mrf.mxu0  ;;  %v6636_v47 = vpop.f32.mrf.mxu1  ;;  %v6727_v18 = vmul.f32 0.5, %v6590_v32  ;;  %v6729_v32 = vmul.f32 0.5, %v10312_v58 }
0x2c1c   : > { %v6594_v25 = vadd.f32 %v6593_v6, %v6435_v31  ;;  %v6637_v38 = vadd.f32 %v6636_v47, %v6443_v56  ;;  %9005 = verf.f32 %v6743_v22  ;;  %v6744_v9 = vmul.f32 0.70710677, %v6592_v4 }
0x2c1d   : > { %v6595_v34 = vpop.f32.mrf.mxu0  ;;  %v6638_v46 = vpop.f32.mrf.mxu1  ;;  %9007 = verf.f32 %v6745_v40  ;;  %v6746_v10 = vmul.f32 0.70710677, %v10315_v1  ;;  %v6728_v43 = vmul.f32 0.5, %v6592_v4  ;;  %v6730_v36 = vmul.f32 0.5, %v10315_v1 }
0x2c1e   : > { %v6751_v51 = vmul.f32 0.70710677, %v6594_v25  ;;  %9009 = verf.f32 %v6744_v9  ;;  %v6753_v27 = vmul.f32 0.70710677, %v6637_v38  ;;  %v6596_v53 = vadd.f32 %v6595_v34, %v6439_v14 }
0x2c1f   : > { %v6639_v55 = vadd.f32 %v6638_v46, %v6447_v54  ;;  %v10320_v12 = vpop.f32.mrf.mxu0  ;;  %v10322_v5 = vpop.f32.mrf.mxu1  ;;  %9011 = verf.f32 %v6746_v10  ;;  %v6735_v31 = vmul.f32 0.5, %v6594_v25  ;;  %v6737_v14 = vmul.f32 0.5, %v6637_v38 }
0x2c20   : > { %9013 = verf.f32 %v6751_v51  ;;  %v6752_v13 = vmul.f32 0.70710677, %v6596_v53  ;;  %v6736_v54 = vmul.f32 0.5, %v6596_v53  ;;  %v6451_v38 = vrot.slane %v10302_v17, %v9722_v2  ;;  %v8794_v2 = vld [vmem:[%s9393_s4 + $0x1f0] sm:$0xff]  }
0x2c21   : > { %v6677_v61 = vpop.f32.mrf.mxu0  ;;  %v6720_v48 = vpop.f32.mrf.mxu1  ;;  %9015 = verf.f32 %v6753_v27  ;;  %v6754_v63 = vmul.f32 0.70710677, %v6639_v55  ;;  %v6738_v40 = vmul.f32 0.5, %v6639_v55  ;;  %v6459_v51 = vrot.slane %v10302_v17, %v9725_v11  ;;  %v8791_v27 = vld [vmem:[%s9393_s4 + $0x138] sm:$0xff]  }
0x2c22   : > { %9017 = verf.f32 %v6752_v13  ;;  %v10326_v21 = vadd.f32 %v6677_v61, %v6455_v62  ;;  %v10328_v44 = vadd.f32 %v6720_v48, %v6463_v57  ;;  %v8792_v13 = vld [vmem:[%s9393_s4 + $0x1b8] sm:$0xff]   ;;  %v8793_v61 = vld [vmem:[%s9393_s4 + $0x170] sm:$0xff]  }
0x2c23   : > { %v6679_v7 = vpop.f32.mrf.mxu0  ;;  %v6722_v3 = vpop.f32.mrf.mxu1  ;;  %9019 = verf.f32 %v6754_v63 }
0x2c24   : > { %v6748_v0 = vmul.f32 0.70710677, %v10326_v21  ;;  %v6750_v30 = vmul.f32 0.70710677, %v10328_v44  ;;  %v10345_v55 = vadd.f32 %v6679_v7, %v6451_v38  ;;  %v10349_v63 = vadd.f32 %v6722_v3, %v6459_v51  ;;  %v8796_v3 = vld [vmem:[%s9393_s4 + $0x1b0] sm:$0xff]  }
0x2c25   : > { %v6681_v33 = vpop.f32.mrf.mxu0  ;;  %v6724_v52 = vpop.f32.mrf.mxu1  ;;  %v10356_v7 = vadd.f32 %v10322_v5, %v6459_v51  ;;  %v6734_v5 = vmul.f32 0.5, %v10328_v44  ;;  %v8799_v44 = vld [vmem:[%s9393_s4 + $0x128] sm:$0xff]  }
0x2c26   : > { %9021 = verf.f32 %v6748_v0  ;;  %v10332_v15 = vadd.f32 %v6681_v33, %v6455_v62  ;;  %v10334_v39 = vadd.f32 %v6724_v52, %v6463_v57  ;;  %v10353_v0 = vadd.f32 %v10320_v12, %v6451_v38  ;;  %v8795_v52 = vld [vmem:[%s9393_s4 + $0x130] sm:$0xff]  }
0x2c27   : > { %9023 = verf.f32 %v6750_v30  ;;  %v6755_v12 = vmul.f32 0.70710677, %v10345_v55 }
0x2c28   : > { %v6756_v60 = vmul.f32 0.70710677, %v10332_v15  ;;  %v6758_v23 = vmul.f32 0.70710677, %v10334_v39 }
0x2c29   : > { %v9006_v37 = vpop.eup %9005 }
0x2c2a   : > { %v9008_v8 = vpop.eup %9007  ;;  %9025 = verf.f32 %v6756_v60  ;;  %v6775_v45 = vadd.f32 1.0, %v9006_v37  ;;  %v6732_v37 = vmul.f32 0.5, %v10326_v21  ;;  %v6740_v60 = vmul.f32 0.5, %v10332_v15  ;;  %v8798_v21 = vld [vmem:[%s9393_s4 + $0x1e8] sm:$0xff]  }
0x2c2b   : > { %v9010_v28 = vpop.eup %9009  ;;  %9027 = verf.f32 %v6758_v23  ;;  %v6777_v20 = vadd.f32 1.0, %v9008_v8  ;;  %v8797_v23 = vld [vmem:[%s9393_s4 + $0x168] sm:$0xff]  }
0x2c2c   : > { %v9012_v50 = vpop.eup %9011  ;;  %v6776_v19 = vadd.f32 1.0, %v9010_v28  ;;  %v6791_v25 = vmul.f32 %v6775_v45, %v6727_v18  ;;  %v6757_v28 = vmul.f32 0.70710677, %v10349_v63  ;;  %9029 = verf.f32 %v6755_v12  ;;  %v8801_v45 = vld [vmem:[%s9393_s4 + $0x160] sm:$0xff]  }
0x2c2d   : > { %v9014_v16 = vpop.eup %9013  ;;  %v6778_v26 = vadd.f32 1.0, %v9012_v50  ;;  %v6793_v1 = vmul.f32 %v6777_v20, %v6729_v32  ;;  %v6742_v50 = vmul.f32 0.5, %v10334_v39  ;;  %v8805_v20 = vld [vmem:[%s9393_s4 + $0x158] sm:$0xff]   ;;  %v8813_v32 = vld [vmem:[%s9393_s4 + $0x148] sm:$0xff]  }
0x2c2e   : > { %v9016_v24 = vpop.eup %9015  ;;  %v6783_v59 = vadd.f32 1.0, %v9014_v16  ;;  %v6792_v4 = vmul.f32 %v6776_v19, %v6728_v43  ;;  %v6749_v43 = vmul.f32 0.70710677, %v10356_v7  ;;  %9031 = verf.f32 %v6757_v28 }
0x2c2f   : > { %v9018_v49 = vpop.eup %9017  ;;  %v6785_v56 = vadd.f32 1.0, %v9016_v24  ;;  %v6794_v34 = vmul.f32 %v6778_v26, %v6730_v36  ;;  %v6747_v24 = vmul.f32 0.70710677, %v10353_v0  ;;  %v8809_v36 = vld [vmem:[%s9393_s4 + $0x150] sm:$0xff]  }
0x2c30   : > { %v9020_v41 = vpop.eup %9019  ;;  %v6784_v35 = vadd.f32 1.0, %v9018_v49  ;;  %v6799_v22 = vmul.f32 %v6783_v59, %v6735_v31  ;;  %v8800_v49 = vld [vmem:[%s9393_s4 + $0x1a8] sm:$0xff]   ;;  %v8802_v31 = vld [vmem:[%s9393_s4 + $0x1e0] sm:$0xff]  }
0x2c31   : > { %v6786_v6 = vadd.f32 1.0, %v9020_v41  ;;  %v6801_v47 = vmul.f32 %v6785_v56, %v6737_v14  ;;  %9033 = verf.f32 %v6747_v24  ;;  %v8803_v56 = vld [vmem:[%s9393_s4 + $0x120] sm:$0xff]   ;;  %v8806_v14 = vld [vmem:[%s9393_s4 + $0x1d8] sm:$0xff]  }
0x2c32   : > { %v6800_v9 = vmul.f32 %v6784_v35, %v6736_v54  ;;  %v6807_v53 = vpack.c.bf16 %v6799_v22, %v6791_v25  ;;  %9035 = verf.f32 %v6749_v43  ;;  %v8804_v41 = vld [vmem:[%s9393_s4 + $0x1a0] sm:$0xff]   ;;  %v8807_v54 = vld [vmem:[%s9393_s4 + $0x118] sm:$0xff]   ;;  %v8810_v22 = vld [vmem:[%s9393_s4 + $0x1d0] sm:$0xff]  }
0x2c33   : > { %v6802_v46 = vmul.f32 %v6786_v6, %v6738_v40  ;;  %v9022_v10 = vpop.eup %9021  ;;  %v6809_v48 = vpack.c.bf16 %v6801_v47, %v6793_v1  ;;  %v8808_v35 = vld [vmem:[%s9393_s4 + $0x198] sm:$0xff]   ;;  %v8811_v40 = vld [vmem:[%s9393_s4 + $0x110] sm:$0xff]   ;;  %v8814_v47 = vld [vmem:[%s9393_s4 + $0x1c8] sm:$0xff]  }
0x2c34   : > { %v6808_v62 = vpack.c.bf16 %v6800_v9, %v6792_v4  ;;  %v9024_v58 = vpop.eup %9023  ;;  %v6780_v11 = vadd.f32 1.0, %v9022_v10  ;;  %v8812_v6 = vld [vmem:[%s9393_s4 + $0x190] sm:$0xff]   ;;  %v8816_v10 = vld [vmem:[%s9393_s4 + $0x188] sm:$0xff]   ;;  %v8817_v1 = vld [vmem:[%s9393_s4 + $0x140] sm:$0xff]  }
0x2c35   : > { %v6810_v57 = vpack.c.bf16 %v6802_v46, %v6794_v34  ;;  %v6782_v33 = vadd.f32 1.0, %v9024_v58  ;;  %v8815_v34 = vld [vmem:[%s9393_s4 + $0x108] sm:$0xff]   ;;  %v6739_v58 = vmul.f32 0.5, %v10345_v55 }
0x2c36   : > { %7237 = vmatprep.mubr.bf16.mxu0 %v6808_v62  ;;  %v6796_v18 = vmul.f32 %v6780_v11, %v6732_v37  ;;  %v8818_v62 = vld [vmem:[%s9393_s4 + $0x1c0] sm:$0xff]   ;;  %v6733_v11 = vmul.f32 0.5, %v10356_v7 }
0x2c37   : > { %7278 = vmatprep.mubr.bf16.mxu1 %v6810_v57  ;;  %7238 = vmatmul.mubr.bf16.vlgmr.msra.gmra.mxu0 %v6807_v53  ;;  %v9026_v17 = vpop.eup %9025  ;;  %v6798_v19 = vmul.f32 %v6782_v33, %v6734_v5  ;;  %v6741_v57 = vmul.f32 0.5, %v10349_v63 }
0x2c38   : > { %7279 = vmatmul.mubr.bf16.vlgmr.msra.gmra.mxu1 %v6809_v48  ;;  %8227 = vmatpush3.bf16.msra.mxu0 %v8791_v27  ;;  %v9028_v30 = vpop.eup %9027  ;;  %v6788_v8 = vadd.f32 1.0, %v9026_v17 }
0x2c39   : > { %8249 = vmatpush3.bf16.msra.mxu1 %v8792_v13  ;;  %8228 = vmatprep.subr.bf16.mxu0 %v8793_v61  ;;  %v6790_v16 = vadd.f32 1.0, %v9028_v30  ;;  %v9030_v4 = vpop.eup %9029  ;;  %v8819_v13 = vld [vmem:[%s9393_s4 + $0x100] sm:$0xff]   ;;  %v6731_v61 = vmul.f32 0.5, %v10353_v0 }
0x2c3a   : > { %8250 = vmatprep.subr.bf16.mxu1 %v8794_v2  ;;  %v6804_v15 = vmul.f32 %v6788_v8, %v6740_v60  ;;  %v6787_v38 = vadd.f32 1.0, %v9030_v4  ;;  %v8820_v2 = vld [vmem:[%s9393_s4 + $0x180] sm:$0xff]  }
0x2c3b   : > { %v6806_v59 = vmul.f32 %v6790_v16, %v6742_v50  ;;  %v9032_v9 = vpop.eup %9031 }
0x2c3c   : > { %8229 = vmatpush3.bf16.msra.mxu0 %v8795_v52  ;;  %v6812_v39 = vpack.c.bf16 %v6804_v15, %v6796_v18  ;;  %v6789_v51 = vadd.f32 1.0, %v9032_v9  ;;  %v6803_v48 = vmul.f32 %v6787_v38, %v6739_v58 }
0x2c3d   : > { %8251 = vmatpush3.bf16.msra.mxu1 %v8796_v3  ;;  %8230 = vmatprep.subr.bf16.mxu0 %v8797_v23  ;;  %v6814_v26 = vpack.c.bf16 %v6806_v59, %v6798_v19  ;;  %v7848_v23 = vld [vmem:[#allocation4] ss:$0 sm:$0xff] }
0x2c3e   : > { %8252 = vmatprep.subr.bf16.mxu1 %v8798_v21  ;;  %7319 = vmatprep.mubr.bf16.mxu0 %v6812_v39  ;;  %v9034_v25 = vpop.eup %9033  ;;  %v6805_v17 = vmul.f32 %v6789_v51, %v6741_v57 }
0x2c3f   : > { %7360 = vmatprep.mubr.bf16.mxu1 %v6814_v26  ;;  %v9036_v46 = vpop.eup %9035  ;;  %v6779_v27 = vadd.f32 1.0, %v9034_v25 }
0x2c40   : > { %8231 = vmatpush3.bf16.msra.mxu0 %v8799_v44  ;;  %v6781_v53 = vadd.f32 1.0, %v9036_v46 }
0x2c41   : > { %8253 = vmatpush3.bf16.msra.mxu1 %v8800_v49  ;;  %8232 = vmatprep.subr.bf16.mxu0 %v8801_v45  ;;  %v6795_v33 = vmul.f32 %v6779_v27, %v6731_v61 }
0x2c42   : > { %8254 = vmatprep.subr.bf16.mxu1 %v8802_v31  ;;  %v6797_v52 = vmul.f32 %v6781_v53, %v6733_v11 }
0x2c43   : > { %v6811_v3 = vpack.c.bf16 %v6803_v48, %v6795_v33 }
0x2c44   : > { %8233 = vmatpush3.bf16.msra.mxu0 %v8803_v56  ;;  %v6813_v55 = vpack.c.bf16 %v6805_v17, %v6797_v52 }
0x2c45   : > { %8255 = vmatpush3.bf16.msra.mxu1 %v8804_v41  ;;  %8234 = vmatprep.subr.bf16.mxu0 %v8805_v20 }
0x2c46   : > { %8256 = vmatprep.subr.bf16.mxu1 %v8806_v14 }
0x2c48   : > { %8235 = vmatpush3.bf16.msra.mxu0 %v8807_v54 }
0x2c49   : > { %8257 = vmatpush3.bf16.msra.mxu1 %v8808_v35  ;;  %8236 = vmatprep.subr.bf16.mxu0 %v8809_v36 }
0x2c4a   : > { %8258 = vmatprep.subr.bf16.mxu1 %v8810_v22 }
0x2c4c   : > { %8237 = vmatpush3.bf16.msra.mxu0 %v8811_v40 }
0x2c4d   : > { %8259 = vmatpush3.bf16.msra.mxu1 %v8812_v6  ;;  %8238 = vmatprep.subr.bf16.mxu0 %v8813_v32 }
0x2c4e   : > { %8260 = vmatprep.subr.bf16.mxu1 %v8814_v47 }
0x2c50   : > { %8239 = vmatpush3.bf16.msra.mxu0 %v8815_v34 }
0x2c51   : > { %8261 = vmatpush3.bf16.msra.mxu1 %v8816_v10  ;;  %8240 = vmatprep.subr.bf16.mxu0 %v8817_v1 }
0x2c52   : > { %8262 = vmatprep.subr.bf16.mxu1 %v8818_v62 }
0x2c54   : > { %8241 = vmatpush3.bf16.msra.mxu0 %v8819_v13 }
0x2c55   : > { %8263 = vmatpush3.bf16.msra.mxu1 %v8820_v2 }
0x2c57   : > { %7320 = vmatmul.mubr.bf16.vlgmr.msra.gmra.mxu0 %v6811_v3 }
0x2c58   : > { %7361 = vmatmul.mubr.bf16.vlgmr.msra.gmra.mxu1 %v6813_v55 }
0x2cf7   : > { %v8198_v63 = vpop.f32.mrf.mxu0 }
0x2cf8   : > { %v8220_v30 = vpop.f32.mrf.mxu1 }
0x2cf9   : > { %v8199_v37 = vpop.f32.mrf.mxu0 }
0x2cfa   : > { %v8221_v0 = vpop.f32.mrf.mxu1  ;;  %v8200_v60 = vadd.f32 %v8199_v37, %v8198_v63 }
0x2cfb   : > { %v8201_v12 = vpop.f32.mrf.mxu0  ;;  %v8222_v21 = vadd.f32 %v8221_v0, %v8220_v30 }
0x2cfc   : > { %v8223_v8 = vpop.f32.mrf.mxu1  ;;  %v7240_v7 = vadd.f32 %v8200_v60, %v7848_v23 }
0x2cfd   : > { %v8202_v5 = vpop.f32.mrf.mxu0 }
0x2cfe   : > { %v8203_v28 = vadd.f32 %v8202_v5, %v8201_v12  ;;  %v8224_v50 = vpop.f32.mrf.mxu1  ;;  %v7281_v15 = vadd.f32 %v8222_v21, %v7240_v7 }
0x2cff   : > { %v8225_v39 = vadd.f32 %v8224_v50, %v8223_v8 }
0x2d00   : > { %v7243_v43 = vadd.f32 %v8203_v28, %v7848_v23 }
0x2d02   : > { %v7284_v56 = vadd.f32 %v8225_v39, %v7243_v43 }
0x2d17   : > { %v8242_v16 = vpop.f32.mrf.mxu0 }
0x2d18   : > { %v8264_v24 = vpop.f32.mrf.mxu1 }
0x2d19   : > { %v8243_v18 = vpop.f32.mrf.mxu0 }
0x2d1a   : > { %v8244_v19 = vadd.f32 %v8243_v18, %v8242_v16  ;;  %v8265_v59 = vpop.f32.mrf.mxu1 }
0x2d1b   : > { %v8245_v44 = vpop.f32.mrf.mxu0  ;;  %v8266_v45 = vadd.f32 %v8265_v59, %v8264_v24 }
0x2d1c   : > { %v7322_v49 = vadd.f32 %v8244_v19, %v7281_v15  ;;  %v8267_v26 = vpop.f32.mrf.mxu1 }
0x2d1d   : > { %v8246_v31 = vpop.f32.mrf.mxu0 }
0x2d1e   : > { %v7363_v41 = vadd.f32 %v8266_v45, %v7322_v49  ;;  %v8247_v20 = vadd.f32 %v8246_v31, %v8245_v44  ;;  %v8268_v14 = vpop.f32.mrf.mxu1 }
0x2d1f   : > { %v8269_v35 = vadd.f32 %v8268_v14, %v8267_v26 }
0x2d20   : > { %v7325_v54 = vadd.f32 %v8247_v20, %v7284_v56  ;;  %v7369_v36 = vadd.f32 %v7363_v41, %v10255_v42 }
0x2d22   : > { %v7366_v22 = vadd.f32 %v8269_v35, %v7325_v54  ;;  %7371 = vxpose.xlu1.b32.start [1/2] (short) (narrow) %v7369_v36, 32 }
0x2d24   : > { %v7370_v40 = vadd.f32 %v7366_v22, %v10257_v29 }
0x2d26   : > { %7372 = vxpose.xlu1.b32.end [2/2] (short) (narrow) %v7370_v40, 32 }
0x2d9e   : > { %v7387_v6 = vpop.trf.xlu1 }
0x2d9f   : > { %v7403_v32 = vsel %vm1862_vm1, %v7387_v6, -inf }
0x2da0   : > { %7404 = vmax.xlane.f32.xlu0 %v7403_v32 }
0x2da2   : > { %v7388_v4 = vpop.trf.xlu1 }
0x2da3   : > { %v7406_v47 = vsel %vm1862_vm1, %v7388_v4, -inf }
0x2da4   : > { %7407 = vmax.xlane.f32.xlu0 %v7406_v47 }
0x2da6   : > { %v7389_v9 = vpop.trf.xlu1 }
0x2da7   : > { %v7409_v25 = vsel %vm1862_vm1, %v7389_v9, -inf }
0x2da8   : > { %7410 = vmax.xlane.f32.xlu0 %v7409_v25 }
0x2daa   : > { %v7390_v34 = vpop.trf.xlu1 }
0x2dab   : > { %v7412_v42 = vsel %vm1862_vm1, %v7390_v34, -inf }
0x2dac   : > { %7413 = vmax.xlane.f32.xlu0 %v7412_v42 }
0x2e29   : > { %v7405_v46 = vpop.xlane.xlu0 %7404 }
0x2e2a   : > { %v7415_v38 = vsub.f32 %v7387_v6, %v7405_v46 }
0x2e2c   : > { %v7419_v29 = vmul.f32 1.442695, %v7415_v38 }
0x2e2d   : > { %v7408_v10 = vpop.xlane.xlu0 %7407 }
0x2e2e   : > { %9037 = vpow2.f32 %v7419_v29  ;;  %v7416_v1 = vsub.f32 %v7388_v4, %v7408_v10 }
0x2e30   : > { %v7421_v51 = vmul.f32 1.442695, %v7416_v1 }
0x2e31   : > { %v7411_v62 = vpop.xlane.xlu0 %7410 }
0x2e32   : > { %9039 = vpow2.f32 %v7421_v51  ;;  %v7417_v27 = vsub.f32 %v7389_v9, %v7411_v62 }
0x2e34   : > { %v7423_v58 = vmul.f32 1.442695, %v7417_v27 }
0x2e35   : > { %v7414_v53 = vpop.xlane.xlu0 %7413 }
0x2e36   : > { %9041 = vpow2.f32 %v7423_v58  ;;  %v7418_v57 = vsub.f32 %v7390_v34, %v7414_v53 }
0x2e38   : > { %v7425_v13 = vmul.f32 1.442695, %v7418_v57 }
0x2e3a   : > { %9043 = vpow2.f32 %v7425_v13 }
0x2e3b   : > { %v9038_v61 = vpop.eup %9037 }
0x2e3c   : > { %v7427_v48 = vsel %vm1862_vm1, %v9038_v61, 0.0 }
0x2e3d   : > { %7428 = vadd.xlane.f32.xlu0 %v7427_v48 }
0x2e3f   : > { %v9040_v2 = vpop.eup %9039 }
0x2e40   : > { %v7430_v11 = vsel %vm1862_vm1, %v9040_v2, 0.0 }
0x2e41   : > { %7431 = vadd.xlane.f32.xlu0 %v7430_v11 }
0x2e43   : > { %v9042_v17 = vpop.eup %9041 }
0x2e44   : > { %v7433_v33 = vsel %vm1862_vm1, %v9042_v17, 0.0 }
0x2e45   : > { %7434 = vadd.xlane.f32.xlu0 %v7433_v33 }
0x2e47   : > { %v9044_v52 = vpop.eup %9043 }
0x2e48   : > { %v7436_v3 = vsel %vm1862_vm1, %v9044_v52, 0.0 }
0x2e49   : > { %7437 = vadd.xlane.f32.xlu0 %v7436_v3 }
0x2ec6   : > { %v7429_v55 = vpop.xlane.xlu0 %7428 }
0x2ec7   : > { %9045 = vrcp.f32 %v7429_v55 }
0x2eca   : > { %v7432_v63 = vpop.xlane.xlu0 %7431 }
0x2ecb   : > { %9047 = vrcp.f32 %v7432_v63 }
0x2ece   : > { %v7435_v30 = vpop.xlane.xlu0 %7434 }
0x2ecf   : > { %9049 = vrcp.f32 %v7435_v30 }
0x2ed2   : > { %v7438_v37 = vpop.xlane.xlu0 %7437 }
0x2ed3   : > { %9051 = vrcp.f32 %v7438_v37 }
0x2ed4   : > { %v9046_v0 = vpop.eup %9045 }
0x2ed5   : > { %v7440_v12 = vmul.f32 %v9046_v0, %v9038_v61 }
0x2ed7   : > { %7447 = vst.msk [vmem:[%s1320_s18] sm:$0xff] %vm1862_vm1, %v7440_v12 }
0x2ed8   : > { %v9048_v60 = vpop.eup %9047 }
0x2ed9   : > { %v7442_v8 = vmul.f32 %v9048_v60, %v9040_v2 }
0x2edb   : > { %7448 = vst.msk [vmem:[%s1320_s18 + $0x8] sm:$0xff] %vm1862_vm1, %v7442_v8 }
0x2edc   : > { %v9050_v23 = vpop.eup %9049 }
0x2edd   : > { %v7444_v5 = vmul.f32 %v9050_v23, %v9042_v17 }
0x2edf   : > { %7449 = vst.msk [vmem:[%s1320_s18 + $0x10] sm:$0xff] %vm1862_vm1, %v7444_v5 }
0x2ee0   : > { %v9052_v7 = vpop.eup %9051 }
0x2ee1   : > { %v7446_v28 = vmul.f32 %v9052_v7, %v9044_v52 }
0x2ee3   : > { %7450 = vst.msk [vmem:[%s1320_s18 + $0x18] sm:$0xff] %vm1862_vm1, %v7446_v28 }
0x2ee4 PF: > { %s99_s22 = sadd.s32 1, %s9119_s22  }
0x2ee5   : > { %p96_p3 = scmp.ge.s32.totalorder %s99_s22, 4  }
0x2ee7   :  { %98 = sbr.rel (!%p96_p3) target bundleno = 81 (0x51), region = 274 }
0x2eec   :  { %7472 = vsyncpa [#allocation3], 1 }
0x2eed   :  { %7474 = vsyncpa [#allocation3 + $0x1], 1 }
0x2eee   :  { %7475 = vsyncpa [#allocation5], 1 }

</bundles_post_ra>
